<compile_context>
chip_gen: v7x
topology: tpu7x:2x2x1
jax: 0.10.0
libtpu: 0.0.40
codegen_flags: <defaults>
</compile_context>

<pallas_src>
import functools
import math

import jax
import jax.numpy as jnp
from jax import lax
from jax.experimental import pallas as pl
from jax.experimental.pallas import tpu as pltpu


D_MODEL = 256
NHEAD = 8
DIM_FF = 2048
LN_EPS = 1e-5


# ----------------------------------------------------------------------------
# Fused kernel: attention + LN1 + FFN + LN2  (one batch element per grid step)
# ----------------------------------------------------------------------------
def _fused_block_kernel(x_ref, in_w_ref, in_b_ref, out_w_ref, out_b_ref,
                        g1_ref, beta1_ref, w1_ref, b1_ref, w2_ref, b2_ref,
                        g2_ref, beta2_ref, o_ref, *, nhead):
    x = x_ref[...].astype(jnp.float32)                       # (S, D)
    seq, d_model = x.shape
    head_dim = d_model // nhead
    scale = 1.0 / math.sqrt(head_dim)

    # --- fused QKV projection: (S, D) @ (D, 3D) + (1, 3D) ---
    qkv = jnp.dot(x, in_w_ref[...], preferred_element_type=jnp.float32)
    qkv = qkv + in_b_ref[...].astype(jnp.float32)            # (S, 3D)
    q = qkv[:, :d_model]                                     # 128-aligned slices
    k = qkv[:, d_model:2 * d_model]
    v = qkv[:, 2 * d_model:]

    # --- per-head attention; fold context straight into the output proj ---
    # acc = sum_h softmax(q_h k_h^T / sqrt(hd)) v_h @ Wout[h*hd:(h+1)*hd, :]
    acc = jnp.zeros((seq, d_model), jnp.float32)
    for h in range(nhead):                                   # static unroll (8)
        lo = h * head_dim
        qh = q[:, lo:lo + head_dim] * scale                  # (S, hd)
        kh = k[:, lo:lo + head_dim]
        vh = v[:, lo:lo + head_dim]
        s = lax.dot_general(qh, kh, (((1,), (1,)), ((), ())),
                            preferred_element_type=jnp.float32)   # (S, S)
        m = jnp.max(s, axis=-1, keepdims=True)
        e = jnp.exp(s - m)
        denom = jnp.sum(e, axis=-1, keepdims=True)
        p = e * pl.reciprocal(denom, approx=True)            # EUP slot, near-free
        ctx_h = jnp.dot(p, vh, preferred_element_type=jnp.float32)     # (S, hd)
        w_out_h = out_w_ref[pl.ds(lo, head_dim), :]          # sublane-aligned slice
        acc = acc + jnp.dot(ctx_h, w_out_h, preferred_element_type=jnp.float32)

    # --- residual + LayerNorm1 ---
    y = x + acc + out_b_ref[...].astype(jnp.float32)
    mu = jnp.mean(y, axis=-1, keepdims=True)
    yc = y - mu
    var = jnp.mean(yc * yc, axis=-1, keepdims=True)
    xn = (yc * lax.rsqrt(var + LN_EPS) * g1_ref[...].astype(jnp.float32)
          + beta1_ref[...].astype(jnp.float32))              # (S, D)

    # --- FFN: Linear1 + ReLU + Linear2 ---
    h1 = jnp.dot(xn, w1_ref[...], preferred_element_type=jnp.float32)
    h1 = jnp.maximum(h1 + b1_ref[...].astype(jnp.float32), 0.0)   # (S, FF)
    ff = jnp.dot(h1, w2_ref[...], preferred_element_type=jnp.float32)
    ff = ff + b2_ref[...].astype(jnp.float32)                # (S, D)

    # --- residual + LayerNorm2 ---
    z = xn + ff
    mu2 = jnp.mean(z, axis=-1, keepdims=True)
    zc = z - mu2
    var2 = jnp.mean(zc * zc, axis=-1, keepdims=True)
    zn = zc * lax.rsqrt(var2 + LN_EPS)
    o_ref[...] = (zn * g2_ref[...].astype(jnp.float32)
                  + beta2_ref[...].astype(jnp.float32)).astype(o_ref.dtype)


# ----------------------------------------------------------------------------
# Wrapper
# ----------------------------------------------------------------------------
def _fused_block(x_bsd, params):
    B, S, D = x_bsd.shape
    ff = params["w1_t"].shape[1]
    kernel = functools.partial(_fused_block_kernel, nhead=NHEAD)
    return pl.pallas_call(
        kernel,
        out_shape=jax.ShapeDtypeStruct((B, S, D), x_bsd.dtype),
        grid_spec=pltpu.PrefetchScalarGridSpec(
            num_scalar_prefetch=0,
            grid=(B,),
            in_specs=[
                pl.BlockSpec((None, S, D), lambda b: (b, 0, 0)),   # batch slice
                pl.BlockSpec((D, 3 * D), lambda b: (0, 0)),        # in_proj W^T (resident)
                pl.BlockSpec((1, 3 * D), lambda b: (0, 0)),        # in_proj bias
                pl.BlockSpec((D, D), lambda b: (0, 0)),            # out_proj W^T
                pl.BlockSpec((1, D), lambda b: (0, 0)),            # out_proj bias
                pl.BlockSpec((1, D), lambda b: (0, 0)),            # LN1 gamma
                pl.BlockSpec((1, D), lambda b: (0, 0)),            # LN1 beta
                pl.BlockSpec((D, ff), lambda b: (0, 0)),           # W1^T (resident)
                pl.BlockSpec((1, ff), lambda b: (0, 0)),           # b1
                pl.BlockSpec((ff, D), lambda b: (0, 0)),           # W2^T (resident)
                pl.BlockSpec((1, D), lambda b: (0, 0)),            # b2
                pl.BlockSpec((1, D), lambda b: (0, 0)),            # LN2 gamma
                pl.BlockSpec((1, D), lambda b: (0, 0)),            # LN2 beta
            ],
            out_specs=pl.BlockSpec((None, S, D), lambda b: (b, 0, 0)),  # lane-dense D=256
        ),
        compiler_params=pltpu.CompilerParams(
            dimension_semantics=("parallel",),              # shards batch across TCs
            vmem_limit_bytes=32 * 1024 * 1024),             # weights resident on v5e too
    )(x_bsd, params["in_w_t"], params["in_b"], params["out_w_t"], params["out_b"],
      params["ln1_w"], params["ln1_b"], params["w1_t"], params["b1"],
      params["w2_t"], params["b2"], params["ln2_w"], params["ln2_b"])


def recursive_transformer_block(src, params, depth=1):
    """src: (seq, batch, d_model); applies the block `depth` times."""
    if depth == 0:
        return src
    x = jnp.transpose(src, (1, 0, 2))                        # (B, S, D), once
    for _ in range(depth):
        x = _fused_block(x, params)
    return jnp.transpose(x, (1, 0, 2))                       # back to (S, B, D)


# ----------------------------------------------------------------------------
# Parameter init (PyTorch layouts) + pure-JAX reference
# ----------------------------------------------------------------------------
def init_params(key, d_model=D_MODEL, dim_ff=DIM_FF):
    ks = jax.random.split(key, 12)
    bd = 1.0 / math.sqrt(d_model)
    bf = 1.0 / math.sqrt(dim_ff)
    in_w = jax.random.uniform(ks[0], (3 * d_model, d_model), jnp.float32, -bd, bd)
    in_b = jax.random.uniform(ks[1], (3 * d_model,), jnp.float32, -bd, bd)
    out_w = jax.random.uniform(ks[2], (d_model, d_model), jnp.float32, -bd, bd)
    out_b = jax.random.uniform(ks[3], (d_model,), jnp.float32, -bd, bd)
    w1 = jax.random.uniform(ks[4], (dim_ff, d_model), jnp.float32, -bd, bd)
    b1 = jax.random.uniform(ks[5], (dim_ff,), jnp.float32, -bd, bd)
    w2 = jax.random.uniform(ks[6], (d_model, dim_ff), jnp.float32, -bf, bf)
    b2 = jax.random.uniform(ks[7], (d_model,), jnp.float32, -bf, bf)
    ln1_w = 1.0 + 0.1 * jax.random.normal(ks[8], (d_model,), jnp.float32)
    ln1_b = 0.1 * jax.random.normal(ks[9], (d_model,), jnp.float32)
    ln2_w = 1.0 + 0.1 * jax.random.normal(ks[10], (d_model,), jnp.float32)
    ln2_b = 0.1 * jax.random.normal(ks[11], (d_model,), jnp.float32)

    raw = dict(in_w=in_w, in_b=in_b, out_w=out_w, out_b=out_b,
               w1=w1, b1=b1, w2=w2, b2=b2,
               ln1_w=ln1_w, ln1_b=ln1_b, ln2_w=ln2_w, ln2_b=ln2_b)
    params = dict(
        in_w_t=in_w.T, in_b=in_b.reshape(1, -1),
        out_w_t=out_w.T, out_b=out_b.reshape(1, -1),
        w1_t=w1.T, b1=b1.reshape(1, -1),
        w2_t=w2.T, b2=b2.reshape(1, -1),
        ln1_w=ln1_w.reshape(1, -1), ln1_b=ln1_b.reshape(1, -1),
        ln2_w=ln2_w.reshape(1, -1), ln2_b=ln2_b.reshape(1, -1),
    )
    return params, raw


def _ln(x, w, b):
    mu = jnp.mean(x, axis=-1, keepdims=True)
    var = jnp.mean((x - mu) ** 2, axis=-1, keepdims=True)
    return (x - mu) * lax.rsqrt(var + LN_EPS) * w + b


def _reference_block(src, raw, depth=1):
    x = src
    for _ in range(depth):
        S, B, D = x.shape
        H, hd = NHEAD, D // NHEAD
        qkv = x @ raw["in_w"].T + raw["in_b"]                       # (S,B,3D)
        q, k, v = jnp.split(qkv, 3, axis=-1)

        def heads(t):
            return t.reshape(S, B, H, hd).transpose(1, 2, 0, 3)     # (B,H,S,hd)

        qh, kh, vh = heads(q), heads(k), heads(v)
        s = jnp.einsum("bhqd,bhkd->bhqk", qh, kh) / math.sqrt(hd)
        p = jax.nn.softmax(s, axis=-1)
        ctx = jnp.einsum("bhqk,bhkd->bhqd", p, vh)
        ctx = ctx.transpose(2, 0, 1, 3).reshape(S, B, D)
        attn_out = ctx @ raw["out_w"].T + raw["out_b"]
        x = _ln(x + attn_out, raw["ln1_w"], raw["ln1_b"])
        h = jax.nn.relu(x @ raw["w1"].T + raw["b1"])
        ff = h @ raw["w2"].T + raw["b2"]
        x = _ln(x + ff, raw["ln2_w"], raw["ln2_b"])
    return x


if __name__ == "__main__":
    seq, batch = 8, 2                       # d_model=256, nhead=8, ff=2048 fixed above
    key = jax.random.PRNGKey(0)
    kx, kp = jax.random.split(key)
    src = jax.random.normal(kx, (seq, batch, D_MODEL), jnp.float32)
    params, raw = init_params(kp)

    # depth=1 against the pure-JAX reference
    out = recursive_transformer_block(src, params, depth=1)
    out = jax.block_until_ready(out)
    ref = _reference_block(src, raw, depth=1)
    assert out.shape == (seq, batch, D_MODEL)
    err = float(jnp.max(jnp.abs(out - ref)))
    # slightly loose tolerance: approx reciprocal (EUP) in the softmax + MXU
    # accumulation-order differences vs the XLA reference.
    assert jnp.allclose(out, ref, atol=5e-3, rtol=5e-3), err

    # depth=2: exercise the recursion path; check it runs and stays finite.
    out2 = jax.block_until_ready(recursive_transformer_block(src, params, depth=2))
    assert out2.shape == (seq, batch, D_MODEL)
    assert bool(jnp.all(jnp.isfinite(out2)))

    print("KERNEL_OK")
</pallas_src>

<mosaic_0001>
module attributes {stable_mosaic.version = 11 : i64} {
  func.func @_fused_block_kernel(%arg0: i32, %arg1: memref<1x8x256xf32, #tpu.memory_space<vmem>>, %arg2: memref<256x768xf32, #tpu.memory_space<vmem>>, %arg3: memref<1x768xf32, #tpu.memory_space<vmem>>, %arg4: memref<256x256xf32, #tpu.memory_space<vmem>>, %arg5: memref<1x256xf32, #tpu.memory_space<vmem>>, %arg6: memref<1x256xf32, #tpu.memory_space<vmem>>, %arg7: memref<1x256xf32, #tpu.memory_space<vmem>>, %arg8: memref<256x2048xf32, #tpu.memory_space<vmem>>, %arg9: memref<1x2048xf32, #tpu.memory_space<vmem>>, %arg10: memref<2048x256xf32, #tpu.memory_space<vmem>>, %arg11: memref<1x256xf32, #tpu.memory_space<vmem>>, %arg12: memref<1x256xf32, #tpu.memory_space<vmem>>, %arg13: memref<1x256xf32, #tpu.memory_space<vmem>>, %arg14: memref<1x8x256xf32, #tpu.memory_space<vmem>>) attributes {dimension_semantics = [#tpu.dimension_semantics<parallel>], iteration_bounds = array<i64: 2>, scalar_prefetch = 0 : i64, scratch_operands = 0 : i64, tpu.core_type = #tpu.core_type<tc>, window_params = [{transform_indices = @transform_0, window_bounds = array<i64: 1, 8, 256>}, {pipeline_mode = #tpu.pipeline_mode<synchronous>, transform_indices = @transform_1, window_bounds = array<i64: 256, 768>}, {pipeline_mode = #tpu.pipeline_mode<synchronous>, transform_indices = @transform_2, window_bounds = array<i64: 1, 768>}, {pipeline_mode = #tpu.pipeline_mode<synchronous>, transform_indices = @transform_3, window_bounds = array<i64: 256, 256>}, {pipeline_mode = #tpu.pipeline_mode<synchronous>, transform_indices = @transform_4, window_bounds = array<i64: 1, 256>}, {pipeline_mode = #tpu.pipeline_mode<synchronous>, transform_indices = @transform_5, window_bounds = array<i64: 1, 256>}, {pipeline_mode = #tpu.pipeline_mode<synchronous>, transform_indices = @transform_6, window_bounds = array<i64: 1, 256>}, {pipeline_mode = #tpu.pipeline_mode<synchronous>, transform_indices = @transform_7, window_bounds = array<i64: 256, 2048>}, {pipeline_mode = #tpu.pipeline_mode<synchronous>, transform_indices = @transform_8, window_bounds = array<i64: 1, 2048>}, {pipeline_mode = #tpu.pipeline_mode<synchronous>, transform_indices = @transform_9, window_bounds = array<i64: 2048, 256>}, {pipeline_mode = #tpu.pipeline_mode<synchronous>, transform_indices = @transform_10, window_bounds = array<i64: 1, 256>}, {pipeline_mode = #tpu.pipeline_mode<synchronous>, transform_indices = @transform_11, window_bounds = array<i64: 1, 256>}, {pipeline_mode = #tpu.pipeline_mode<synchronous>, transform_indices = @transform_12, window_bounds = array<i64: 1, 256>}, {transform_indices = @transform_13, window_bounds = array<i64: 1, 8, 256>}]} {
    %c0 = arith.constant 0 : index
    %c0_0 = arith.constant 0 : index
    %c0_1 = arith.constant 0 : index
    %0 = vector.load %arg1[%c0, %c0_0, %c0_1] : memref<1x8x256xf32, #tpu.memory_space<vmem>>, vector<1x8x256xf32>
    %1 = vector.shape_cast %0 : vector<1x8x256xf32> to vector<8x256xf32>
    %c0_2 = arith.constant 0 : index
    %c0_3 = arith.constant 0 : index
    %2 = vector.load %arg2[%c0_2, %c0_3] : memref<256x768xf32, #tpu.memory_space<vmem>>, vector<256x768xf32>
    %cst = arith.constant dense<0.000000e+00> : vector<8x768xf32>
    %3 = tpu.matmul %1, %2, %cst {dimension_numbers = #tpu.dot_dimension_numbers<[1], [0], [0], [1], [0, 0, 1, 1], [], []>} : vector<8x256xf32>, vector<256x768xf32>, vector<8x768xf32> -> vector<8x768xf32>
    %c0_4 = arith.constant 0 : index
    %c0_5 = arith.constant 0 : index
    %4 = vector.load %arg3[%c0_4, %c0_5] : memref<1x768xf32, #tpu.memory_space<vmem>>, vector<1x768xf32>
    %5 = vector.broadcast %4 : vector<1x768xf32> to vector<8x768xf32>
    %6 = arith.addf %3, %5 : vector<8x768xf32>
    %7 = vector.extract_strided_slice %6 {offsets = [0, 0], sizes = [8, 256], strides = [1, 1]} : vector<8x768xf32> to vector<8x256xf32>
    %8 = vector.extract_strided_slice %6 {offsets = [0, 256], sizes = [8, 256], strides = [1, 1]} : vector<8x768xf32> to vector<8x256xf32>
    %9 = vector.extract_strided_slice %6 {offsets = [0, 512], sizes = [8, 256], strides = [1, 1]} : vector<8x768xf32> to vector<8x256xf32>
    %cst_6 = arith.constant 0.000000e+00 : f32
    %10 = vector.broadcast %cst_6 : f32 to vector<8x256xf32>
    %11 = vector.extract_strided_slice %7 {offsets = [0, 0], sizes = [8, 32], strides = [1, 1]} : vector<8x256xf32> to vector<8x32xf32>
    %cst_7 = arith.constant 0.176776692 : f32
    %12 = vector.broadcast %cst_7 : f32 to vector<8x32xf32>
    %13 = arith.mulf %11, %12 : vector<8x32xf32>
    %14 = vector.extract_strided_slice %8 {offsets = [0, 0], sizes = [8, 32], strides = [1, 1]} : vector<8x256xf32> to vector<8x32xf32>
    %15 = vector.extract_strided_slice %9 {offsets = [0, 0], sizes = [8, 32], strides = [1, 1]} : vector<8x256xf32> to vector<8x32xf32>
    %cst_8 = arith.constant dense<0.000000e+00> : vector<8x8xf32>
    %16 = tpu.matmul %13, %14, %cst_8 {dimension_numbers = #tpu.dot_dimension_numbers<[1], [1], [0], [0], [0, 0, 1, 0], [], []>} : vector<8x32xf32>, vector<8x32xf32>, vector<8x8xf32> -> vector<8x8xf32>
    %cst_9 = arith.constant dense<0xFF800000> : vector<8xf32>
    %17 = vector.multi_reduction <maximumf>, %16, %cst_9 [1] : vector<8x8xf32> to vector<8xf32>
    %18 = vector.shape_cast %17 : vector<8xf32> to vector<8x1xf32>
    %19 = vector.broadcast %18 : vector<8x1xf32> to vector<8x8xf32>
    %20 = arith.subf %16, %19 : vector<8x8xf32>
    %21 = math.exp %20 : vector<8x8xf32>
    %cst_10 = arith.constant dense<0.000000e+00> : vector<8xf32>
    %22 = vector.multi_reduction <add>, %21, %cst_10 [1] : vector<8x8xf32> to vector<8xf32>
    %23 = vector.shape_cast %22 : vector<8xf32> to vector<8x1xf32>
    %24 = tpu.reciprocal %23 {approx = true} : vector<8x1xf32> -> vector<8x1xf32>
    %25 = vector.broadcast %24 : vector<8x1xf32> to vector<8x8xf32>
    %26 = arith.mulf %21, %25 : vector<8x8xf32>
    %cst_11 = arith.constant dense<0.000000e+00> : vector<8x32xf32>
    %27 = tpu.matmul %26, %15, %cst_11 {dimension_numbers = #tpu.dot_dimension_numbers<[1], [0], [0], [1], [0, 0, 1, 1], [], []>} : vector<8x8xf32>, vector<8x32xf32>, vector<8x32xf32> -> vector<8x32xf32>
    %c0_12 = arith.constant 0 : index
    %c0_13 = arith.constant 0 : index
    %28 = vector.load %arg4[%c0_12, %c0_13] : memref<256x256xf32, #tpu.memory_space<vmem>>, vector<32x256xf32>
    %cst_14 = arith.constant dense<0.000000e+00> : vector<8x256xf32>
    %29 = tpu.matmul %27, %28, %cst_14 {dimension_numbers = #tpu.dot_dimension_numbers<[1], [0], [0], [1], [0, 0, 1, 1], [], []>} : vector<8x32xf32>, vector<32x256xf32>, vector<8x256xf32> -> vector<8x256xf32>
    %30 = arith.addf %10, %29 : vector<8x256xf32>
    %31 = vector.extract_strided_slice %7 {offsets = [0, 32], sizes = [8, 32], strides = [1, 1]} : vector<8x256xf32> to vector<8x32xf32>
    %cst_15 = arith.constant 0.176776692 : f32
    %32 = vector.broadcast %cst_15 : f32 to vector<8x32xf32>
    %33 = arith.mulf %31, %32 : vector<8x32xf32>
    %34 = vector.extract_strided_slice %8 {offsets = [0, 32], sizes = [8, 32], strides = [1, 1]} : vector<8x256xf32> to vector<8x32xf32>
    %35 = vector.extract_strided_slice %9 {offsets = [0, 32], sizes = [8, 32], strides = [1, 1]} : vector<8x256xf32> to vector<8x32xf32>
    %cst_16 = arith.constant dense<0.000000e+00> : vector<8x8xf32>
    %36 = tpu.matmul %33, %34, %cst_16 {dimension_numbers = #tpu.dot_dimension_numbers<[1], [1], [0], [0], [0, 0, 1, 0], [], []>} : vector<8x32xf32>, vector<8x32xf32>, vector<8x8xf32> -> vector<8x8xf32>
    %cst_17 = arith.constant dense<0xFF800000> : vector<8xf32>
    %37 = vector.multi_reduction <maximumf>, %36, %cst_17 [1] : vector<8x8xf32> to vector<8xf32>
    %38 = vector.shape_cast %37 : vector<8xf32> to vector<8x1xf32>
    %39 = vector.broadcast %38 : vector<8x1xf32> to vector<8x8xf32>
    %40 = arith.subf %36, %39 : vector<8x8xf32>
    %41 = math.exp %40 : vector<8x8xf32>
    %cst_18 = arith.constant dense<0.000000e+00> : vector<8xf32>
    %42 = vector.multi_reduction <add>, %41, %cst_18 [1] : vector<8x8xf32> to vector<8xf32>
    %43 = vector.shape_cast %42 : vector<8xf32> to vector<8x1xf32>
    %44 = tpu.reciprocal %43 {approx = true} : vector<8x1xf32> -> vector<8x1xf32>
    %45 = vector.broadcast %44 : vector<8x1xf32> to vector<8x8xf32>
    %46 = arith.mulf %41, %45 : vector<8x8xf32>
    %cst_19 = arith.constant dense<0.000000e+00> : vector<8x32xf32>
    %47 = tpu.matmul %46, %35, %cst_19 {dimension_numbers = #tpu.dot_dimension_numbers<[1], [0], [0], [1], [0, 0, 1, 1], [], []>} : vector<8x8xf32>, vector<8x32xf32>, vector<8x32xf32> -> vector<8x32xf32>
    %c32 = arith.constant 32 : index
    %c0_20 = arith.constant 0 : index
    %48 = vector.load %arg4[%c32, %c0_20] : memref<256x256xf32, #tpu.memory_space<vmem>>, vector<32x256xf32>
    %cst_21 = arith.constant dense<0.000000e+00> : vector<8x256xf32>
    %49 = tpu.matmul %47, %48, %cst_21 {dimension_numbers = #tpu.dot_dimension_numbers<[1], [0], [0], [1], [0, 0, 1, 1], [], []>} : vector<8x32xf32>, vector<32x256xf32>, vector<8x256xf32> -> vector<8x256xf32>
    %50 = arith.addf %30, %49 : vector<8x256xf32>
    %51 = vector.extract_strided_slice %7 {offsets = [0, 64], sizes = [8, 32], strides = [1, 1]} : vector<8x256xf32> to vector<8x32xf32>
    %cst_22 = arith.constant 0.176776692 : f32
    %52 = vector.broadcast %cst_22 : f32 to vector<8x32xf32>
    %53 = arith.mulf %51, %52 : vector<8x32xf32>
    %54 = vector.extract_strided_slice %8 {offsets = [0, 64], sizes = [8, 32], strides = [1, 1]} : vector<8x256xf32> to vector<8x32xf32>
    %55 = vector.extract_strided_slice %9 {offsets = [0, 64], sizes = [8, 32], strides = [1, 1]} : vector<8x256xf32> to vector<8x32xf32>
    %cst_23 = arith.constant dense<0.000000e+00> : vector<8x8xf32>
    %56 = tpu.matmul %53, %54, %cst_23 {dimension_numbers = #tpu.dot_dimension_numbers<[1], [1], [0], [0], [0, 0, 1, 0], [], []>} : vector<8x32xf32>, vector<8x32xf32>, vector<8x8xf32> -> vector<8x8xf32>
    %cst_24 = arith.constant dense<0xFF800000> : vector<8xf32>
    %57 = vector.multi_reduction <maximumf>, %56, %cst_24 [1] : vector<8x8xf32> to vector<8xf32>
    %58 = vector.shape_cast %57 : vector<8xf32> to vector<8x1xf32>
    %59 = vector.broadcast %58 : vector<8x1xf32> to vector<8x8xf32>
    %60 = arith.subf %56, %59 : vector<8x8xf32>
    %61 = math.exp %60 : vector<8x8xf32>
    %cst_25 = arith.constant dense<0.000000e+00> : vector<8xf32>
    %62 = vector.multi_reduction <add>, %61, %cst_25 [1] : vector<8x8xf32> to vector<8xf32>
    %63 = vector.shape_cast %62 : vector<8xf32> to vector<8x1xf32>
    %64 = tpu.reciprocal %63 {approx = true} : vector<8x1xf32> -> vector<8x1xf32>
    %65 = vector.broadcast %64 : vector<8x1xf32> to vector<8x8xf32>
    %66 = arith.mulf %61, %65 : vector<8x8xf32>
    %cst_26 = arith.constant dense<0.000000e+00> : vector<8x32xf32>
    %67 = tpu.matmul %66, %55, %cst_26 {dimension_numbers = #tpu.dot_dimension_numbers<[1], [0], [0], [1], [0, 0, 1, 1], [], []>} : vector<8x8xf32>, vector<8x32xf32>, vector<8x32xf32> -> vector<8x32xf32>
    %c64 = arith.constant 64 : index
    %c0_27 = arith.constant 0 : index
    %68 = vector.load %arg4[%c64, %c0_27] : memref<256x256xf32, #tpu.memory_space<vmem>>, vector<32x256xf32>
    %cst_28 = arith.constant dense<0.000000e+00> : vector<8x256xf32>
    %69 = tpu.matmul %67, %68, %cst_28 {dimension_numbers = #tpu.dot_dimension_numbers<[1], [0], [0], [1], [0, 0, 1, 1], [], []>} : vector<8x32xf32>, vector<32x256xf32>, vector<8x256xf32> -> vector<8x256xf32>
    %70 = arith.addf %50, %69 : vector<8x256xf32>
    %71 = vector.extract_strided_slice %7 {offsets = [0, 96], sizes = [8, 32], strides = [1, 1]} : vector<8x256xf32> to vector<8x32xf32>
    %cst_29 = arith.constant 0.176776692 : f32
    %72 = vector.broadcast %cst_29 : f32 to vector<8x32xf32>
    %73 = arith.mulf %71, %72 : vector<8x32xf32>
    %74 = vector.extract_strided_slice %8 {offsets = [0, 96], sizes = [8, 32], strides = [1, 1]} : vector<8x256xf32> to vector<8x32xf32>
    %75 = vector.extract_strided_slice %9 {offsets = [0, 96], sizes = [8, 32], strides = [1, 1]} : vector<8x256xf32> to vector<8x32xf32>
    %cst_30 = arith.constant dense<0.000000e+00> : vector<8x8xf32>
    %76 = tpu.matmul %73, %74, %cst_30 {dimension_numbers = #tpu.dot_dimension_numbers<[1], [1], [0], [0], [0, 0, 1, 0], [], []>} : vector<8x32xf32>, vector<8x32xf32>, vector<8x8xf32> -> vector<8x8xf32>
    %cst_31 = arith.constant dense<0xFF800000> : vector<8xf32>
    %77 = vector.multi_reduction <maximumf>, %76, %cst_31 [1] : vector<8x8xf32> to vector<8xf32>
    %78 = vector.shape_cast %77 : vector<8xf32> to vector<8x1xf32>
    %79 = vector.broadcast %78 : vector<8x1xf32> to vector<8x8xf32>
    %80 = arith.subf %76, %79 : vector<8x8xf32>
    %81 = math.exp %80 : vector<8x8xf32>
    %cst_32 = arith.constant dense<0.000000e+00> : vector<8xf32>
    %82 = vector.multi_reduction <add>, %81, %cst_32 [1] : vector<8x8xf32> to vector<8xf32>
    %83 = vector.shape_cast %82 : vector<8xf32> to vector<8x1xf32>
    %84 = tpu.reciprocal %83 {approx = true} : vector<8x1xf32> -> vector<8x1xf32>
    %85 = vector.broadcast %84 : vector<8x1xf32> to vector<8x8xf32>
    %86 = arith.mulf %81, %85 : vector<8x8xf32>
    %cst_33 = arith.constant dense<0.000000e+00> : vector<8x32xf32>
    %87 = tpu.matmul %86, %75, %cst_33 {dimension_numbers = #tpu.dot_dimension_numbers<[1], [0], [0], [1], [0, 0, 1, 1], [], []>} : vector<8x8xf32>, vector<8x32xf32>, vector<8x32xf32> -> vector<8x32xf32>
    %c96 = arith.constant 96 : index
    %c0_34 = arith.constant 0 : index
    %88 = vector.load %arg4[%c96, %c0_34] : memref<256x256xf32, #tpu.memory_space<vmem>>, vector<32x256xf32>
    %cst_35 = arith.constant dense<0.000000e+00> : vector<8x256xf32>
    %89 = tpu.matmul %87, %88, %cst_35 {dimension_numbers = #tpu.dot_dimension_numbers<[1], [0], [0], [1], [0, 0, 1, 1], [], []>} : vector<8x32xf32>, vector<32x256xf32>, vector<8x256xf32> -> vector<8x256xf32>
    %90 = arith.addf %70, %89 : vector<8x256xf32>
    %91 = vector.extract_strided_slice %7 {offsets = [0, 128], sizes = [8, 32], strides = [1, 1]} : vector<8x256xf32> to vector<8x32xf32>
    %cst_36 = arith.constant 0.176776692 : f32
    %92 = vector.broadcast %cst_36 : f32 to vector<8x32xf32>
    %93 = arith.mulf %91, %92 : vector<8x32xf32>
    %94 = vector.extract_strided_slice %8 {offsets = [0, 128], sizes = [8, 32], strides = [1, 1]} : vector<8x256xf32> to vector<8x32xf32>
    %95 = vector.extract_strided_slice %9 {offsets = [0, 128], sizes = [8, 32], strides = [1, 1]} : vector<8x256xf32> to vector<8x32xf32>
    %cst_37 = arith.constant dense<0.000000e+00> : vector<8x8xf32>
    %96 = tpu.matmul %93, %94, %cst_37 {dimension_numbers = #tpu.dot_dimension_numbers<[1], [1], [0], [0], [0, 0, 1, 0], [], []>} : vector<8x32xf32>, vector<8x32xf32>, vector<8x8xf32> -> vector<8x8xf32>
    %cst_38 = arith.constant dense<0xFF800000> : vector<8xf32>
    %97 = vector.multi_reduction <maximumf>, %96, %cst_38 [1] : vector<8x8xf32> to vector<8xf32>
    %98 = vector.shape_cast %97 : vector<8xf32> to vector<8x1xf32>
    %99 = vector.broadcast %98 : vector<8x1xf32> to vector<8x8xf32>
    %100 = arith.subf %96, %99 : vector<8x8xf32>
    %101 = math.exp %100 : vector<8x8xf32>
    %cst_39 = arith.constant dense<0.000000e+00> : vector<8xf32>
    %102 = vector.multi_reduction <add>, %101, %cst_39 [1] : vector<8x8xf32> to vector<8xf32>
    %103 = vector.shape_cast %102 : vector<8xf32> to vector<8x1xf32>
    %104 = tpu.reciprocal %103 {approx = true} : vector<8x1xf32> -> vector<8x1xf32>
    %105 = vector.broadcast %104 : vector<8x1xf32> to vector<8x8xf32>
    %106 = arith.mulf %101, %105 : vector<8x8xf32>
    %cst_40 = arith.constant dense<0.000000e+00> : vector<8x32xf32>
    %107 = tpu.matmul %106, %95, %cst_40 {dimension_numbers = #tpu.dot_dimension_numbers<[1], [0], [0], [1], [0, 0, 1, 1], [], []>} : vector<8x8xf32>, vector<8x32xf32>, vector<8x32xf32> -> vector<8x32xf32>
    %c128 = arith.constant 128 : index
    %c0_41 = arith.constant 0 : index
    %108 = vector.load %arg4[%c128, %c0_41] : memref<256x256xf32, #tpu.memory_space<vmem>>, vector<32x256xf32>
    %cst_42 = arith.constant dense<0.000000e+00> : vector<8x256xf32>
    %109 = tpu.matmul %107, %108, %cst_42 {dimension_numbers = #tpu.dot_dimension_numbers<[1], [0], [0], [1], [0, 0, 1, 1], [], []>} : vector<8x32xf32>, vector<32x256xf32>, vector<8x256xf32> -> vector<8x256xf32>
    %110 = arith.addf %90, %109 : vector<8x256xf32>
    %111 = vector.extract_strided_slice %7 {offsets = [0, 160], sizes = [8, 32], strides = [1, 1]} : vector<8x256xf32> to vector<8x32xf32>
    %cst_43 = arith.constant 0.176776692 : f32
    %112 = vector.broadcast %cst_43 : f32 to vector<8x32xf32>
    %113 = arith.mulf %111, %112 : vector<8x32xf32>
    %114 = vector.extract_strided_slice %8 {offsets = [0, 160], sizes = [8, 32], strides = [1, 1]} : vector<8x256xf32> to vector<8x32xf32>
    %115 = vector.extract_strided_slice %9 {offsets = [0, 160], sizes = [8, 32], strides = [1, 1]} : vector<8x256xf32> to vector<8x32xf32>
    %cst_44 = arith.constant dense<0.000000e+00> : vector<8x8xf32>
    %116 = tpu.matmul %113, %114, %cst_44 {dimension_numbers = #tpu.dot_dimension_numbers<[1], [1], [0], [0], [0, 0, 1, 0], [], []>} : vector<8x32xf32>, vector<8x32xf32>, vector<8x8xf32> -> vector<8x8xf32>
    %cst_45 = arith.constant dense<0xFF800000> : vector<8xf32>
    %117 = vector.multi_reduction <maximumf>, %116, %cst_45 [1] : vector<8x8xf32> to vector<8xf32>
    %118 = vector.shape_cast %117 : vector<8xf32> to vector<8x1xf32>
    %119 = vector.broadcast %118 : vector<8x1xf32> to vector<8x8xf32>
    %120 = arith.subf %116, %119 : vector<8x8xf32>
    %121 = math.exp %120 : vector<8x8xf32>
    %cst_46 = arith.constant dense<0.000000e+00> : vector<8xf32>
    %122 = vector.multi_reduction <add>, %121, %cst_46 [1] : vector<8x8xf32> to vector<8xf32>
    %123 = vector.shape_cast %122 : vector<8xf32> to vector<8x1xf32>
    %124 = tpu.reciprocal %123 {approx = true} : vector<8x1xf32> -> vector<8x1xf32>
    %125 = vector.broadcast %124 : vector<8x1xf32> to vector<8x8xf32>
    %126 = arith.mulf %121, %125 : vector<8x8xf32>
    %cst_47 = arith.constant dense<0.000000e+00> : vector<8x32xf32>
    %127 = tpu.matmul %126, %115, %cst_47 {dimension_numbers = #tpu.dot_dimension_numbers<[1], [0], [0], [1], [0, 0, 1, 1], [], []>} : vector<8x8xf32>, vector<8x32xf32>, vector<8x32xf32> -> vector<8x32xf32>
    %c160 = arith.constant 160 : index
    %c0_48 = arith.constant 0 : index
    %128 = vector.load %arg4[%c160, %c0_48] : memref<256x256xf32, #tpu.memory_space<vmem>>, vector<32x256xf32>
    %cst_49 = arith.constant dense<0.000000e+00> : vector<8x256xf32>
    %129 = tpu.matmul %127, %128, %cst_49 {dimension_numbers = #tpu.dot_dimension_numbers<[1], [0], [0], [1], [0, 0, 1, 1], [], []>} : vector<8x32xf32>, vector<32x256xf32>, vector<8x256xf32> -> vector<8x256xf32>
    %130 = arith.addf %110, %129 : vector<8x256xf32>
    %131 = vector.extract_strided_slice %7 {offsets = [0, 192], sizes = [8, 32], strides = [1, 1]} : vector<8x256xf32> to vector<8x32xf32>
    %cst_50 = arith.constant 0.176776692 : f32
    %132 = vector.broadcast %cst_50 : f32 to vector<8x32xf32>
    %133 = arith.mulf %131, %132 : vector<8x32xf32>
    %134 = vector.extract_strided_slice %8 {offsets = [0, 192], sizes = [8, 32], strides = [1, 1]} : vector<8x256xf32> to vector<8x32xf32>
    %135 = vector.extract_strided_slice %9 {offsets = [0, 192], sizes = [8, 32], strides = [1, 1]} : vector<8x256xf32> to vector<8x32xf32>
    %cst_51 = arith.constant dense<0.000000e+00> : vector<8x8xf32>
    %136 = tpu.matmul %133, %134, %cst_51 {dimension_numbers = #tpu.dot_dimension_numbers<[1], [1], [0], [0], [0, 0, 1, 0], [], []>} : vector<8x32xf32>, vector<8x32xf32>, vector<8x8xf32> -> vector<8x8xf32>
    %cst_52 = arith.constant dense<0xFF800000> : vector<8xf32>
    %137 = vector.multi_reduction <maximumf>, %136, %cst_52 [1] : vector<8x8xf32> to vector<8xf32>
    %138 = vector.shape_cast %137 : vector<8xf32> to vector<8x1xf32>
    %139 = vector.broadcast %138 : vector<8x1xf32> to vector<8x8xf32>
    %140 = arith.subf %136, %139 : vector<8x8xf32>
    %141 = math.exp %140 : vector<8x8xf32>
    %cst_53 = arith.constant dense<0.000000e+00> : vector<8xf32>
    %142 = vector.multi_reduction <add>, %141, %cst_53 [1] : vector<8x8xf32> to vector<8xf32>
    %143 = vector.shape_cast %142 : vector<8xf32> to vector<8x1xf32>
    %144 = tpu.reciprocal %143 {approx = true} : vector<8x1xf32> -> vector<8x1xf32>
    %145 = vector.broadcast %144 : vector<8x1xf32> to vector<8x8xf32>
    %146 = arith.mulf %141, %145 : vector<8x8xf32>
    %cst_54 = arith.constant dense<0.000000e+00> : vector<8x32xf32>
    %147 = tpu.matmul %146, %135, %cst_54 {dimension_numbers = #tpu.dot_dimension_numbers<[1], [0], [0], [1], [0, 0, 1, 1], [], []>} : vector<8x8xf32>, vector<8x32xf32>, vector<8x32xf32> -> vector<8x32xf32>
    %c192 = arith.constant 192 : index
    %c0_55 = arith.constant 0 : index
    %148 = vector.load %arg4[%c192, %c0_55] : memref<256x256xf32, #tpu.memory_space<vmem>>, vector<32x256xf32>
    %cst_56 = arith.constant dense<0.000000e+00> : vector<8x256xf32>
    %149 = tpu.matmul %147, %148, %cst_56 {dimension_numbers = #tpu.dot_dimension_numbers<[1], [0], [0], [1], [0, 0, 1, 1], [], []>} : vector<8x32xf32>, vector<32x256xf32>, vector<8x256xf32> -> vector<8x256xf32>
    %150 = arith.addf %130, %149 : vector<8x256xf32>
    %151 = vector.extract_strided_slice %7 {offsets = [0, 224], sizes = [8, 32], strides = [1, 1]} : vector<8x256xf32> to vector<8x32xf32>
    %cst_57 = arith.constant 0.176776692 : f32
    %152 = vector.broadcast %cst_57 : f32 to vector<8x32xf32>
    %153 = arith.mulf %151, %152 : vector<8x32xf32>
    %154 = vector.extract_strided_slice %8 {offsets = [0, 224], sizes = [8, 32], strides = [1, 1]} : vector<8x256xf32> to vector<8x32xf32>
    %155 = vector.extract_strided_slice %9 {offsets = [0, 224], sizes = [8, 32], strides = [1, 1]} : vector<8x256xf32> to vector<8x32xf32>
    %cst_58 = arith.constant dense<0.000000e+00> : vector<8x8xf32>
    %156 = tpu.matmul %153, %154, %cst_58 {dimension_numbers = #tpu.dot_dimension_numbers<[1], [1], [0], [0], [0, 0, 1, 0], [], []>} : vector<8x32xf32>, vector<8x32xf32>, vector<8x8xf32> -> vector<8x8xf32>
    %cst_59 = arith.constant dense<0xFF800000> : vector<8xf32>
    %157 = vector.multi_reduction <maximumf>, %156, %cst_59 [1] : vector<8x8xf32> to vector<8xf32>
    %158 = vector.shape_cast %157 : vector<8xf32> to vector<8x1xf32>
    %159 = vector.broadcast %158 : vector<8x1xf32> to vector<8x8xf32>
    %160 = arith.subf %156, %159 : vector<8x8xf32>
    %161 = math.exp %160 : vector<8x8xf32>
    %cst_60 = arith.constant dense<0.000000e+00> : vector<8xf32>
    %162 = vector.multi_reduction <add>, %161, %cst_60 [1] : vector<8x8xf32> to vector<8xf32>
    %163 = vector.shape_cast %162 : vector<8xf32> to vector<8x1xf32>
    %164 = tpu.reciprocal %163 {approx = true} : vector<8x1xf32> -> vector<8x1xf32>
    %165 = vector.broadcast %164 : vector<8x1xf32> to vector<8x8xf32>
    %166 = arith.mulf %161, %165 : vector<8x8xf32>
    %cst_61 = arith.constant dense<0.000000e+00> : vector<8x32xf32>
    %167 = tpu.matmul %166, %155, %cst_61 {dimension_numbers = #tpu.dot_dimension_numbers<[1], [0], [0], [1], [0, 0, 1, 1], [], []>} : vector<8x8xf32>, vector<8x32xf32>, vector<8x32xf32> -> vector<8x32xf32>
    %c224 = arith.constant 224 : index
    %c0_62 = arith.constant 0 : index
    %168 = vector.load %arg4[%c224, %c0_62] : memref<256x256xf32, #tpu.memory_space<vmem>>, vector<32x256xf32>
    %cst_63 = arith.constant dense<0.000000e+00> : vector<8x256xf32>
    %169 = tpu.matmul %167, %168, %cst_63 {dimension_numbers = #tpu.dot_dimension_numbers<[1], [0], [0], [1], [0, 0, 1, 1], [], []>} : vector<8x32xf32>, vector<32x256xf32>, vector<8x256xf32> -> vector<8x256xf32>
    %170 = arith.addf %150, %169 : vector<8x256xf32>
    %171 = arith.addf %1, %170 : vector<8x256xf32>
    %c0_64 = arith.constant 0 : index
    %c0_65 = arith.constant 0 : index
    %172 = vector.load %arg5[%c0_64, %c0_65] : memref<1x256xf32, #tpu.memory_space<vmem>>, vector<1x256xf32>
    %173 = vector.broadcast %172 : vector<1x256xf32> to vector<8x256xf32>
    %174 = arith.addf %171, %173 : vector<8x256xf32>
    %cst_66 = arith.constant dense<0.000000e+00> : vector<8xf32>
    %175 = vector.multi_reduction <add>, %174, %cst_66 [1] : vector<8x256xf32> to vector<8xf32>
    %176 = vector.shape_cast %175 : vector<8xf32> to vector<8x1xf32>
    %cst_67 = arith.constant 2.560000e+02 : f32
    %177 = vector.broadcast %cst_67 : f32 to vector<8x1xf32>
    %178 = arith.divf %176, %177 : vector<8x1xf32>
    %179 = vector.broadcast %178 : vector<8x1xf32> to vector<8x256xf32>
    %180 = arith.subf %174, %179 : vector<8x256xf32>
    %181 = arith.mulf %180, %180 : vector<8x256xf32>
    %cst_68 = arith.constant dense<0.000000e+00> : vector<8xf32>
    %182 = vector.multi_reduction <add>, %181, %cst_68 [1] : vector<8x256xf32> to vector<8xf32>
    %183 = vector.shape_cast %182 : vector<8xf32> to vector<8x1xf32>
    %cst_69 = arith.constant 2.560000e+02 : f32
    %184 = vector.broadcast %cst_69 : f32 to vector<8x1xf32>
    %185 = arith.divf %183, %184 : vector<8x1xf32>
    %cst_70 = arith.constant 9.99999974E-6 : f32
    %186 = vector.broadcast %cst_70 : f32 to vector<8x1xf32>
    %187 = arith.addf %185, %186 : vector<8x1xf32>
    %188 = math.rsqrt %187 : vector<8x1xf32>
    %189 = vector.broadcast %188 : vector<8x1xf32> to vector<8x256xf32>
    %190 = arith.mulf %180, %189 : vector<8x256xf32>
    %c0_71 = arith.constant 0 : index
    %c0_72 = arith.constant 0 : index
    %191 = vector.load %arg6[%c0_71, %c0_72] : memref<1x256xf32, #tpu.memory_space<vmem>>, vector<1x256xf32>
    %192 = vector.broadcast %191 : vector<1x256xf32> to vector<8x256xf32>
    %193 = arith.mulf %190, %192 : vector<8x256xf32>
    %c0_73 = arith.constant 0 : index
    %c0_74 = arith.constant 0 : index
    %194 = vector.load %arg7[%c0_73, %c0_74] : memref<1x256xf32, #tpu.memory_space<vmem>>, vector<1x256xf32>
    %195 = vector.broadcast %194 : vector<1x256xf32> to vector<8x256xf32>
    %196 = arith.addf %193, %195 : vector<8x256xf32>
    %c0_75 = arith.constant 0 : index
    %c0_76 = arith.constant 0 : index
    %197 = vector.load %arg8[%c0_75, %c0_76] : memref<256x2048xf32, #tpu.memory_space<vmem>>, vector<256x2048xf32>
    %cst_77 = arith.constant dense<0.000000e+00> : vector<8x2048xf32>
    %198 = tpu.matmul %196, %197, %cst_77 {dimension_numbers = #tpu.dot_dimension_numbers<[1], [0], [0], [1], [0, 0, 1, 1], [], []>} : vector<8x256xf32>, vector<256x2048xf32>, vector<8x2048xf32> -> vector<8x2048xf32>
    %c0_78 = arith.constant 0 : index
    %c0_79 = arith.constant 0 : index
    %199 = vector.load %arg9[%c0_78, %c0_79] : memref<1x2048xf32, #tpu.memory_space<vmem>>, vector<1x2048xf32>
    %200 = vector.broadcast %199 : vector<1x2048xf32> to vector<8x2048xf32>
    %201 = arith.addf %198, %200 : vector<8x2048xf32>
    %cst_80 = arith.constant 0.000000e+00 : f32
    %202 = vector.broadcast %cst_80 : f32 to vector<8x2048xf32>
    %203 = arith.maximumf %201, %202 : vector<8x2048xf32>
    %c0_81 = arith.constant 0 : index
    %c0_82 = arith.constant 0 : index
    %204 = vector.load %arg10[%c0_81, %c0_82] : memref<2048x256xf32, #tpu.memory_space<vmem>>, vector<2048x256xf32>
    %cst_83 = arith.constant dense<0.000000e+00> : vector<8x256xf32>
    %205 = tpu.matmul %203, %204, %cst_83 {dimension_numbers = #tpu.dot_dimension_numbers<[1], [0], [0], [1], [0, 0, 1, 1], [], []>} : vector<8x2048xf32>, vector<2048x256xf32>, vector<8x256xf32> -> vector<8x256xf32>
    %c0_84 = arith.constant 0 : index
    %c0_85 = arith.constant 0 : index
    %206 = vector.load %arg11[%c0_84, %c0_85] : memref<1x256xf32, #tpu.memory_space<vmem>>, vector<1x256xf32>
    %207 = vector.broadcast %206 : vector<1x256xf32> to vector<8x256xf32>
    %208 = arith.addf %205, %207 : vector<8x256xf32>
    %209 = arith.addf %196, %208 : vector<8x256xf32>
    %cst_86 = arith.constant dense<0.000000e+00> : vector<8xf32>
    %210 = vector.multi_reduction <add>, %209, %cst_86 [1] : vector<8x256xf32> to vector<8xf32>
    %211 = vector.shape_cast %210 : vector<8xf32> to vector<8x1xf32>
    %cst_87 = arith.constant 2.560000e+02 : f32
    %212 = vector.broadcast %cst_87 : f32 to vector<8x1xf32>
    %213 = arith.divf %211, %212 : vector<8x1xf32>
    %214 = vector.broadcast %213 : vector<8x1xf32> to vector<8x256xf32>
    %215 = arith.subf %209, %214 : vector<8x256xf32>
    %216 = arith.mulf %215, %215 : vector<8x256xf32>
    %cst_88 = arith.constant dense<0.000000e+00> : vector<8xf32>
    %217 = vector.multi_reduction <add>, %216, %cst_88 [1] : vector<8x256xf32> to vector<8xf32>
    %218 = vector.shape_cast %217 : vector<8xf32> to vector<8x1xf32>
    %cst_89 = arith.constant 2.560000e+02 : f32
    %219 = vector.broadcast %cst_89 : f32 to vector<8x1xf32>
    %220 = arith.divf %218, %219 : vector<8x1xf32>
    %cst_90 = arith.constant 9.99999974E-6 : f32
    %221 = vector.broadcast %cst_90 : f32 to vector<8x1xf32>
    %222 = arith.addf %220, %221 : vector<8x1xf32>
    %223 = math.rsqrt %222 : vector<8x1xf32>
    %224 = vector.broadcast %223 : vector<8x1xf32> to vector<8x256xf32>
    %225 = arith.mulf %215, %224 : vector<8x256xf32>
    %c0_91 = arith.constant 0 : index
    %c0_92 = arith.constant 0 : index
    %226 = vector.load %arg12[%c0_91, %c0_92] : memref<1x256xf32, #tpu.memory_space<vmem>>, vector<1x256xf32>
    %227 = vector.broadcast %226 : vector<1x256xf32> to vector<8x256xf32>
    %228 = arith.mulf %225, %227 : vector<8x256xf32>
    %c0_93 = arith.constant 0 : index
    %c0_94 = arith.constant 0 : index
    %229 = vector.load %arg13[%c0_93, %c0_94] : memref<1x256xf32, #tpu.memory_space<vmem>>, vector<1x256xf32>
    %230 = vector.broadcast %229 : vector<1x256xf32> to vector<8x256xf32>
    %231 = arith.addf %228, %230 : vector<8x256xf32>
    %c0_95 = arith.constant 0 : index
    %c0_96 = arith.constant 0 : index
    %c0_97 = arith.constant 0 : index
    %232 = vector.load %arg14[%c0_95, %c0_96, %c0_97] : memref<1x8x256xf32, #tpu.memory_space<vmem>>, vector<1x8x256xf32>
    %233 = vector.shape_cast %232 : vector<1x8x256xf32> to vector<8x256xf32>
    %234 = vector.shape_cast %231 : vector<8x256xf32> to vector<1x8x256xf32>
    tpu.vector_store %arg14[%c0_95, %c0_96, %c0_97], %234 {strides = array<i32>} : memref<1x8x256xf32, #tpu.memory_space<vmem>>, vector<1x8x256xf32>,
    return
  }
  func.func @transform_0(%arg0: i32) -> (i32, i32, i32) {
    %c0_i32 = arith.constant 0 : i32
    %c0_i32_0 = arith.constant 0 : i32
    %c0_i32_1 = arith.constant 0 : i32
    return %arg0, %c0_i32, %c0_i32_0 : i32, i32, i32
  }
  func.func @transform_1(%arg0: i32) -> (i32, i32) {
    %c0_i32 = arith.constant 0 : i32
    %c0_i32_0 = arith.constant 0 : i32
    %c0_i32_1 = arith.constant 0 : i32
    return %c0_i32, %c0_i32_0 : i32, i32
  }
  func.func @transform_2(%arg0: i32) -> (i32, i32) {
    %c0_i32 = arith.constant 0 : i32
    %c0_i32_0 = arith.constant 0 : i32
    %c0_i32_1 = arith.constant 0 : i32
    return %c0_i32, %c0_i32_0 : i32, i32
  }
  func.func @transform_3(%arg0: i32) -> (i32, i32) {
    %c0_i32 = arith.constant 0 : i32
    %c0_i32_0 = arith.constant 0 : i32
    %c0_i32_1 = arith.constant 0 : i32
    return %c0_i32, %c0_i32_0 : i32, i32
  }
  func.func @transform_4(%arg0: i32) -> (i32, i32) {
    %c0_i32 = arith.constant 0 : i32
    %c0_i32_0 = arith.constant 0 : i32
    %c0_i32_1 = arith.constant 0 : i32
    return %c0_i32, %c0_i32_0 : i32, i32
  }
  func.func @transform_5(%arg0: i32) -> (i32, i32) {
    %c0_i32 = arith.constant 0 : i32
    %c0_i32_0 = arith.constant 0 : i32
    %c0_i32_1 = arith.constant 0 : i32
    return %c0_i32, %c0_i32_0 : i32, i32
  }
  func.func @transform_6(%arg0: i32) -> (i32, i32) {
    %c0_i32 = arith.constant 0 : i32
    %c0_i32_0 = arith.constant 0 : i32
    %c0_i32_1 = arith.constant 0 : i32
    return %c0_i32, %c0_i32_0 : i32, i32
  }
  func.func @transform_7(%arg0: i32) -> (i32, i32) {
    %c0_i32 = arith.constant 0 : i32
    %c0_i32_0 = arith.constant 0 : i32
    %c0_i32_1 = arith.constant 0 : i32
    return %c0_i32, %c0_i32_0 : i32, i32
  }
  func.func @transform_8(%arg0: i32) -> (i32, i32) {
    %c0_i32 = arith.constant 0 : i32
    %c0_i32_0 = arith.constant 0 : i32
    %c0_i32_1 = arith.constant 0 : i32
    return %c0_i32, %c0_i32_0 : i32, i32
  }
  func.func @transform_9(%arg0: i32) -> (i32, i32) {
    %c0_i32 = arith.constant 0 : i32
    %c0_i32_0 = arith.constant 0 : i32
    %c0_i32_1 = arith.constant 0 : i32
    return %c0_i32, %c0_i32_0 : i32, i32
  }
  func.func @transform_10(%arg0: i32) -> (i32, i32) {
    %c0_i32 = arith.constant 0 : i32
    %c0_i32_0 = arith.constant 0 : i32
    %c0_i32_1 = arith.constant 0 : i32
    return %c0_i32, %c0_i32_0 : i32, i32
  }
  func.func @transform_11(%arg0: i32) -> (i32, i32) {
    %c0_i32 = arith.constant 0 : i32
    %c0_i32_0 = arith.constant 0 : i32
    %c0_i32_1 = arith.constant 0 : i32
    return %c0_i32, %c0_i32_0 : i32, i32
  }
  func.func @transform_12(%arg0: i32) -> (i32, i32) {
    %c0_i32 = arith.constant 0 : i32
    %c0_i32_0 = arith.constant 0 : i32
    %c0_i32_1 = arith.constant 0 : i32
    return %c0_i32, %c0_i32_0 : i32, i32
  }
  func.func @transform_13(%arg0: i32) -> (i32, i32, i32) {
    %c0_i32 = arith.constant 0 : i32
    %c0_i32_0 = arith.constant 0 : i32
    %c0_i32_1 = arith.constant 0 : i32
    return %arg0, %c0_i32, %c0_i32_0 : i32, i32, i32
  }
}

</mosaic_0001>

<bundles_post_ra>
// kernel: tpu_custom_call.1
= control target key start
LH: loop header
LB: loop body
LE: loop exit
PB: predicated region body
PF: predicated region fallthrough
CT: control target
= control target key end

     0   :  { %s8693_s0 = inlined_call_operand.hbm [shape: f32[2,8,256], index: 0, kind: input, shape index: {}]   ;;  %s8694_s1 = inlined_call_operand.hbm [shape: f32[256,768], index: 1, kind: input, shape index: {}]   ;;  %s8695_s2 = inlined_call_operand.hbm [shape: f32[1,768], index: 2, kind: input, shape index: {}]   ;;  %s8696_s3 = inlined_call_operand.hbm [shape: f32[256,256], index: 3, kind: input, shape index: {}]   ;;  %s8697_s4 = inlined_call_operand.hbm [shape: f32[1,256], index: 4, kind: input, shape index: {}]   ;;  %s8698_s5 = inlined_call_operand.hbm [shape: f32[1,256], index: 5, kind: input, shape index: {}]   ;;  %s8699_s6 = inlined_call_operand.hbm [shape: f32[1,256], index: 6, kind: input, shape index: {}]   ;;  %s8700_s7 = inlined_call_operand.hbm [shape: f32[256,2048], index: 7, kind: input, shape index: {}]   ;;  %s8701_s8 = inlined_call_operand.hbm [shape: f32[1,2048], index: 8, kind: input, shape index: {}]   ;;  %s8702_s9 = inlined_call_operand.hbm [shape: f32[2048,256], index: 9, kind: input, shape index: {}]   ;;  %s8703_s10 = inlined_call_operand.hbm [shape: f32[1,256], index: 10, kind: input, shape index: {}]   ;;  %s8704_s11 = inlined_call_operand.hbm [shape: f32[1,256], index: 11, kind: input, shape index: {}]   ;;  %s8705_s12 = inlined_call_operand.hbm [shape: f32[1,256], index: 12, kind: input, shape index: {}]   ;;  %s8706_s13 = inlined_call_operand.hbm [shape: f32[2,8,256], index: 13, kind: output, shape index: {}]  }
   0x1   :  { %8718 = sst [smem:[#allocation35_spill]] %s8693_s0 }
   0x2   :  { %8719 = sst [smem:[#allocation36_spill]] %s8694_s1 }
   0x3   :  { %8720 = sst [smem:[#allocation37_spill]] %s8695_s2 }
   0x4   :  { %8721 = sst [smem:[#allocation38_spill]] %s8696_s3 }
   0x5   :  { %8722 = sst [smem:[#allocation39_spill]] %s8706_s13 }
   0x6   :  { %18 = vsyncpa [#allocation3], 0 }
   0x7   :  { %20 = vsyncpa [#allocation3 + $0x1], 0 }
   0x8   :  { %21 = vsyncpa [#allocation6], 0 }
   0x9   :  { %22 = vsyncpa [#allocation9], 0 }
   0xa   :  { %23 = vsyncpa [#allocation12], 0 }
   0xb   :  { %24 = vsyncpa [#allocation15], 0 }
   0xc   :  { %25 = vsyncpa [#allocation18], 0 }
   0xd   :  { %26 = vsyncpa [#allocation21], 0 }
   0xe   :  { %27 = vsyncpa [#allocation4], 0 }
   0xf   :  { %29 = vsyncpa [#allocation4 + $0x1], 0  ;;  %s7883_s25 = smov 0   ;;  %s7885_s26 = smov 0  }
  0x10   :  { %s7887_s27 = smov 0   ;;  %s7889_s28 = smov 0  }
  0x11 LB: > { %8723 = sst [smem:[#allocation32_spill]] %s7774_s25  ;;  %s7788_s29 = smov [#allocation5]   ;;  %s7786_s28 = sphi %s7889_s28, %s8767_s28   ;;  %s7782_s27 = sphi %s7887_s27, %s8766_s27   ;;  %s7778_s26 = sphi %s7885_s26, %s8765_s26   ;;  %s7774_s25 = sphi %s7883_s25, %s8764_s25  }
  0x12   : > { %s356_s30 = sshll.u32 %s7788_s29, 4  ;;  %s7904_s14 = sadd.s32 4294967295, %s7786_s28   ;;  %s7909_s30 = int_to_ptr.vmem [resolvable:$true] %s356_s30 }
  0x13   : > { %8724 = sst [smem:[#allocation33_spill]] %s7904_s14  ;;  %p5619_p0 = scmp.ge.s32.totalorder %s7786_s28, 1 }
  0x14   : > { %p8713_p1 = scmp.eq.s32.totalorder %s7904_s14, 0  ;;  %p344_p2 = scmp.lt.s32.totalorder %s7786_s28, 3 }
  0x15   : > { %s7789_s16 = smov [#allocation8]   ;;  %s7790_s19 = smov [#allocation11]  }
  0x16   : > { %p7911_p3 = pnand %p5619_p0, %p344_p2  ;;  %s380_s17 = sshll.u32 %s7789_s16, 4  ;;  %s7924_s17 = int_to_ptr.vmem [resolvable:$true] %s380_s17 }
  0x17   : > { %s7926_s20 = sshll.u32 %s7790_s19, 4  ;;  %s8728_s1 = sld [smem:[#allocation36_spill]]  ;;  %s406_s20 = int_to_ptr.vmem [resolvable:$true] %s7926_s20 }
  0x18   : > { %s8725_s15 = scalar_select %p7911_p3, 1, 0 }
  0x19   : > { %p7164_p5 = pneg %p7911_p3 }
  0x1a   : > { %8726 = sst [smem:[#allocation34_spill]] %s8725_s15 }
  0x1b   : > { %p7920_p6 = pnand %p7164_p5, %p8713_p1 }
  0x1d   : > { %s7330_s23 = scalar_lea.hbm %s8728_s1, 24576  ;;  %p7936_p8 = pneg %p7920_p6 }
  0x1e   : > { %p7331_p7 = scmp.ne.s32.totalorder %s8728_s1, %s7330_s23  ;;  %p7337_p11 = scmp.lt.u32.totalorder %s7330_s23, %s8728_s1 }
  0x20   : > { %p7333_p9 = pnand %p7936_p8, %p7331_p7 }
  0x22   : > { %p7334_p10 = pneg %p7333_p9 }
  0x24   : > { %p7339_p12 = pnand %p7337_p11, %p7334_p10 }
  0x26   : > { %7342 = shalt.err (!%p7339_p12)
}
  0x27   : > { %s7343_s21 = scalar_lea.vmem %s7909_s30, 24576  ;;  %p7351_p5 = scmp.lt.s32.totalorder %s7909_s30, %s7909_s30 }
  0x28   : > { %p7344_p13 = scmp.ne.s32.totalorder %s7909_s30, %s7343_s21  ;;  %p7352_p4 = scmp.lt.s32.totalorder %s7343_s21, %s7343_s21 }
  0x2a   : > { %p7346_p0 = pnand %p7344_p13, %p7936_p8  ;;  %p7353_p7 = por %p7352_p4, %p7351_p5 }
  0x2c   : > { %p7347_p2 = pneg %p7346_p0 }
  0x2e   : > { %p7354_p9 = pnand %p7353_p7, %p7347_p2 }
  0x30   : > { %7357 = shalt.err (!%p7354_p9)
}
  0x31   : > { %s7791_s22 = smov 768   ;;  %s7792_s13 = smov 48  }
  0x32   : > { %7167 = dma.hbm_to_vmem [thread:$0]  (!%p7920_p6), %s8728_s1, 24576, %s7909_s30, [#allocation6], %s7791_s22, %s7791_s22, %s7792_s13  }
  0x33   : > { %s8730_s3 = sld [smem:[#allocation38_spill]] }
  0x39   : > { %s7358_s15 = scalar_lea.hbm %s8730_s3, 8192 }
  0x3a   : > { %p7359_p4 = scmp.ne.s32.totalorder %s8730_s3, %s7358_s15  ;;  %p7365_p12 = scmp.lt.u32.totalorder %s7358_s15, %s8730_s3 }
  0x3c   : > { %p7361_p10 = pnand %p7359_p4, %p7936_p8 }
  0x3e   : > { %p7362_p11 = pneg %p7361_p10 }
  0x40   : > { %p7367_p13 = pnand %p7365_p12, %p7362_p11 }
  0x42   : > { %7370 = shalt.err (!%p7367_p13)
}
  0x43   : > { %s7371_s30 = scalar_lea.vmem %s7924_s17, 8192  ;;  %p7379_p7 = scmp.lt.s32.totalorder %s7924_s17, %s7924_s17 }
  0x44   : > { %p7372_p0 = scmp.ne.s32.totalorder %s7924_s17, %s7371_s30  ;;  %p7380_p9 = scmp.lt.s32.totalorder %s7371_s30, %s7371_s30 }
  0x46   : > { %p7374_p2 = pnand %p7372_p0, %p7936_p8  ;;  %p7381_p4 = por %p7380_p9, %p7379_p7 }
  0x48   : > { %p7375_p5 = pneg %p7374_p2 }
  0x4a   : > { %p7382_p10 = pnand %p7381_p4, %p7375_p5 }
  0x4c   : > { %7385 = shalt.err (!%p7382_p10)
}
  0x4d   : > { %s8715_s0 = smov 256   ;;  %s8716_s25 = smov 16  }
  0x4e   : > { %7173 = dma.hbm_to_vmem [thread:$0]  (!%p7920_p6), %s8730_s3, 8192, %s7924_s17, [#allocation9], %s8715_s0, %s8715_s0, %s8716_s25  }
  0x4f   : > { %s7386_s23 = scalar_lea.hbm %s8698_s5, 32 }
  0x50   : > { %p7387_p11 = scmp.ne.s32.totalorder %s8698_s5, %s7386_s23  ;;  %p7393_p0 = scmp.lt.u32.totalorder %s7386_s23, %s8698_s5 }
  0x52   : > { %p7389_p12 = pnand %p7387_p11, %p7936_p8 }
  0x54   : > { %p7390_p13 = pneg %p7389_p12 }
  0x56   : > { %p7395_p2 = pnand %p7393_p0, %p7390_p13 }
  0x58   : > { %7398 = shalt.err (!%p7395_p2)
}
  0x59   : > { %s7399_s30 = scalar_lea.vmem %s406_s20, 32  ;;  %p7407_p4 = scmp.lt.s32.totalorder %s406_s20, %s406_s20 }
  0x5a   : > { %p7400_p5 = scmp.ne.s32.totalorder %s406_s20, %s7399_s30  ;;  %p7408_p10 = scmp.lt.s32.totalorder %s7399_s30, %s7399_s30 }
  0x5c   : > { %p7402_p7 = pnand %p7400_p5, %p7936_p8  ;;  %p7409_p1 = por %p7408_p10, %p7407_p4 }
  0x5e   : > { %p7403_p9 = pneg %p7402_p7 }
  0x60   : > { %p7410_p3 = pnand %p7409_p1, %p7403_p9 }
  0x62   : > { %7413 = shalt.err (!%p7410_p3)
}
  0x63   : > { %7179 = dma.hbm_to_vmem [thread:$0]  (!%p7920_p6), %s8698_s5, 32, %s406_s20, [#allocation12]  }
  0x64   : > { %s7795_s15 = smov [#allocation14]   ;;  %s7414_s24 = scalar_lea.hbm %s8700_s7, 65536 }
  0x65   : > { %s426_s22 = sshll.u32 %s7795_s15, 4  ;;  %p7415_p11 = scmp.ne.s32.totalorder %s8700_s7, %s7414_s24  ;;  %s427_s22 = int_to_ptr.vmem [resolvable:$true] %s426_s22 }
  0x66   : > { %p7421_p12 = scmp.lt.u32.totalorder %s7414_s24, %s8700_s7 }
  0x67   : > { %p7417_p1 = pnand %p7415_p11, %p7936_p8 }
  0x69   : > { %p7418_p3 = pneg %p7417_p1 }
  0x6b   : > { %p7423_p13 = pnand %p7421_p12, %p7418_p3 }
  0x6d   : > { %7426 = shalt.err (!%p7423_p13)
}
  0x6e   : > { %s7427_s20 = scalar_lea.vmem %s427_s22, 65536  ;;  %p7435_p7 = scmp.lt.s32.totalorder %s427_s22, %s427_s22 }
  0x6f   : > { %p7428_p0 = scmp.ne.s32.totalorder %s427_s22, %s7427_s20  ;;  %p7436_p9 = scmp.lt.s32.totalorder %s7427_s20, %s7427_s20 }
  0x71   : > { %p7430_p2 = pnand %p7428_p0, %p7936_p8  ;;  %p7437_p4 = por %p7436_p9, %p7435_p7 }
  0x73   : > { %p7431_p5 = pneg %p7430_p2 }
  0x75   : > { %p7438_p10 = pnand %p7437_p4, %p7431_p5 }
  0x77   : > { %7441 = shalt.err (!%p7438_p10)
}
  0x78   : > { %s7796_s17 = smov 2048   ;;  %s7797_s14 = smov 128  }
  0x79   : > { %7185 = dma.hbm_to_vmem [thread:$0]  (!%p7920_p6), %s8700_s7, 65536, %s427_s22, [#allocation15], %s7796_s17, %s7796_s17, %s7797_s14  }
  0x7a   : > { %s7798_s23 = smov [#allocation17]   ;;  %s7799_s29 = smov [#allocation20]  }
  0x7b   : > { %s450_s24 = sshll.u32 %s7798_s23, 4  ;;  %s475_s19 = sshll.u32 %s7799_s29, 4  ;;  %s451_s24 = int_to_ptr.vmem [resolvable:$true] %s450_s24  ;;  %s8020_s19 = int_to_ptr.vmem [resolvable:$true] %s475_s19 }
  0x7c   : > { %s7442_s20 = scalar_lea.hbm %s8702_s9, 65536 }
  0x7d   : > { %p7443_p11 = scmp.ne.s32.totalorder %s8702_s9, %s7442_s20  ;;  %p7449_p12 = scmp.lt.u32.totalorder %s7442_s20, %s8702_s9 }
  0x7f   : > { %p7445_p1 = pnand %p7443_p11, %p7936_p8 }
  0x81   : > { %p7446_p3 = pneg %p7445_p1 }
  0x83   : > { %p7451_p13 = pnand %p7449_p12, %p7446_p3 }
  0x85   : > { %7454 = shalt.err (!%p7451_p13)
}
  0x86   : > { %s7455_s17 = scalar_lea.vmem %s451_s24, 65536  ;;  %p7463_p7 = scmp.lt.s32.totalorder %s451_s24, %s451_s24 }
  0x87   : > { %p7456_p0 = scmp.ne.s32.totalorder %s451_s24, %s7455_s17  ;;  %p7464_p9 = scmp.lt.s32.totalorder %s7455_s17, %s7455_s17 }
  0x89   : > { %p7458_p2 = pnand %p7456_p0, %p7936_p8  ;;  %p7465_p4 = por %p7464_p9, %p7463_p7 }
  0x8b   : > { %p7459_p5 = pneg %p7458_p2 }
  0x8d   : > { %p7466_p10 = pnand %p7465_p4, %p7459_p5 }
  0x8f   : > { %7469 = shalt.err (!%p7466_p10)
}
  0x90   : > { %s8731_s0 = smov 16   ;;  %s8732_s25 = smov 256  }
  0x91   : > { %7191 = dma.hbm_to_vmem [thread:$0]  (!%p7920_p6), %s8702_s9, 65536, %s451_s24, [#allocation18], %s8732_s25, %s8732_s25, %s8731_s0  }
  0x92   : > { %s7470_s21 = scalar_lea.hbm %s8704_s11, 32 }
  0x93   : > { %p7471_p11 = scmp.ne.s32.totalorder %s8704_s11, %s7470_s21  ;;  %p7477_p12 = scmp.lt.u32.totalorder %s7470_s21, %s8704_s11 }
  0x95   : > { %p7473_p1 = pnand %p7471_p11, %p7936_p8 }
  0x97   : > { %p7474_p3 = pneg %p7473_p1 }
  0x99   : > { %p7479_p13 = pnand %p7477_p12, %p7474_p3 }
  0x9b   : > { %7482 = shalt.err (!%p7479_p13)
}
  0x9c   : > { %s7483_s24 = scalar_lea.vmem %s8020_s19, 32  ;;  %p7491_p7 = scmp.lt.s32.totalorder %s8020_s19, %s8020_s19 }
  0x9d   : > { %p7484_p0 = scmp.ne.s32.totalorder %s8020_s19, %s7483_s24  ;;  %p7492_p9 = scmp.lt.s32.totalorder %s7483_s24, %s7483_s24 }
  0x9f   : > { %p7486_p2 = pnand %p7484_p0, %p7936_p8  ;;  %p7493_p4 = por %p7492_p9, %p7491_p7 }
  0xa1   : > { %p7487_p5 = pneg %p7486_p2 }
  0xa3   : > { %p7494_p10 = pnand %p7493_p4, %p7487_p5 }
  0xa5   : > { %7497 = shalt.err (!%p7494_p10)
}
  0xa6   : > { %7197 = dma.hbm_to_vmem [thread:$0]  (!%p7920_p6), %s8704_s11, 32, %s8020_s19, [#allocation21]  }
  0xa7   : > { %s7800_s25 = smov [#allocation7]   ;;  %s7801_s13 = smov [#allocation10]  }
  0xa8   : > { %s370_s14 = sshll.u32 %s7800_s25, 4  ;;  %s394_s23 = sshll.u32 %s7801_s13, 4  ;;  %s371_s14 = int_to_ptr.vmem [resolvable:$true] %s370_s14  ;;  %s8066_s23 = int_to_ptr.vmem [resolvable:$true] %s394_s23 }
  0xa9   : > { %s8733_s2 = sld [smem:[#allocation37_spill]] }
  0xaf   : > { %s7498_s30 = scalar_lea.hbm %s8733_s2, 96 }
  0xb0   : > { %p7499_p11 = scmp.ne.s32.totalorder %s8733_s2, %s7498_s30  ;;  %p7505_p12 = scmp.lt.u32.totalorder %s7498_s30, %s8733_s2 }
  0xb2   : > { %p7501_p1 = pnand %p7499_p11, %p7936_p8 }
  0xb4   : > { %p7502_p3 = pneg %p7501_p1 }
  0xb6   : > { %p7507_p13 = pnand %p7505_p12, %p7502_p3 }
  0xb8   : > { %7510 = shalt.err (!%p7507_p13)
}
  0xb9   : > { %s7511_s24 = scalar_lea.vmem %s371_s14, 96  ;;  %p7519_p7 = scmp.lt.s32.totalorder %s371_s14, %s371_s14 }
  0xba   : > { %p7512_p0 = scmp.ne.s32.totalorder %s371_s14, %s7511_s24  ;;  %p7520_p9 = scmp.lt.s32.totalorder %s7511_s24, %s7511_s24 }
  0xbc   : > { %p7514_p2 = pnand %p7512_p0, %p7936_p8  ;;  %p7521_p4 = por %p7520_p9, %p7519_p7 }
  0xbe   : > { %p7515_p5 = pneg %p7514_p2 }
  0xc0   : > { %p7522_p10 = pnand %p7521_p4, %p7515_p5 }
  0xc2   : > { %7525 = shalt.err (!%p7522_p10)
}
  0xc3   : > { %7170 = dma.hbm_to_vmem [thread:$0]  (!%p7920_p6), %s8733_s2, 96, %s371_s14, [#allocation6]  }
  0xc4   : > { %s7526_s29 = scalar_lea.hbm %s8697_s4, 32 }
  0xc5   : > { %p7527_p11 = scmp.ne.s32.totalorder %s8697_s4, %s7526_s29  ;;  %p7533_p12 = scmp.lt.u32.totalorder %s7526_s29, %s8697_s4 }
  0xc7   : > { %p7529_p1 = pnand %p7527_p11, %p7936_p8 }
  0xc9   : > { %p7530_p3 = pneg %p7529_p1 }
  0xcb   : > { %p7535_p13 = pnand %p7533_p12, %p7530_p3 }
  0xcd   : > { %7538 = shalt.err (!%p7535_p13)
}
  0xce   : > { %s7539_s14 = scalar_lea.vmem %s8066_s23, 32  ;;  %p7547_p7 = scmp.lt.s32.totalorder %s8066_s23, %s8066_s23 }
  0xcf   : > { %p7540_p0 = scmp.ne.s32.totalorder %s8066_s23, %s7539_s14  ;;  %p7548_p9 = scmp.lt.s32.totalorder %s7539_s14, %s7539_s14 }
  0xd1   : > { %p7542_p2 = pnand %p7540_p0, %p7936_p8  ;;  %p7549_p4 = por %p7548_p9, %p7547_p7 }
  0xd3   : > { %p7543_p5 = pneg %p7542_p2 }
  0xd5   : > { %p7550_p10 = pnand %p7549_p4, %p7543_p5 }
  0xd7   : > { %7553 = shalt.err (!%p7550_p10)
}
  0xd8   : > { %7176 = dma.hbm_to_vmem [thread:$0]  (!%p7920_p6), %s8697_s4, 32, %s8066_s23, [#allocation9]  }
  0xd9   : > { %s7802_s24 = smov [#allocation13]   ;;  %s7803_s0 = smov [#allocation16]  }
  0xda   : > { %s416_s17 = sshll.u32 %s7802_s24, 4  ;;  %s440_s25 = sshll.u32 %s7803_s0, 4  ;;  %s417_s17 = int_to_ptr.vmem [resolvable:$true] %s416_s17  ;;  %s8109_s25 = int_to_ptr.vmem [resolvable:$true] %s440_s25 }
  0xdb   : > { %s7554_s21 = scalar_lea.hbm %s8699_s6, 32 }
  0xdc   : > { %p7555_p11 = scmp.ne.s32.totalorder %s8699_s6, %s7554_s21  ;;  %p7561_p12 = scmp.lt.u32.totalorder %s7554_s21, %s8699_s6 }
  0xde   : > { %p7557_p1 = pnand %p7555_p11, %p7936_p8 }
  0xe0   : > { %p7558_p3 = pneg %p7557_p1 }
  0xe2   : > { %p7563_p13 = pnand %p7561_p12, %p7558_p3 }
  0xe4   : > { %7566 = shalt.err (!%p7563_p13)
}
  0xe5   : > { %s7567_s14 = scalar_lea.vmem %s417_s17, 32  ;;  %p7575_p7 = scmp.lt.s32.totalorder %s417_s17, %s417_s17 }
  0xe6   : > { %p7568_p0 = scmp.ne.s32.totalorder %s417_s17, %s7567_s14  ;;  %p7576_p9 = scmp.lt.s32.totalorder %s7567_s14, %s7567_s14 }
  0xe8   : > { %p7570_p2 = pnand %p7568_p0, %p7936_p8  ;;  %p7577_p4 = por %p7576_p9, %p7575_p7 }
  0xea   : > { %p7571_p5 = pneg %p7570_p2 }
  0xec   : > { %p7578_p10 = pnand %p7577_p4, %p7571_p5 }
  0xee   : > { %7581 = shalt.err (!%p7578_p10)
}
  0xef   : > { %7182 = dma.hbm_to_vmem [thread:$0]  (!%p7920_p6), %s8699_s6, 32, %s417_s17, [#allocation12]  }
  0xf0   : > { %s7582_s13 = scalar_lea.hbm %s8701_s8, 256 }
  0xf1   : > { %p7583_p11 = scmp.ne.s32.totalorder %s8701_s8, %s7582_s13  ;;  %p7589_p12 = scmp.lt.u32.totalorder %s7582_s13, %s8701_s8 }
  0xf3   : > { %p7585_p1 = pnand %p7583_p11, %p7936_p8 }
  0xf5   : > { %p7586_p3 = pneg %p7585_p1 }
  0xf7   : > { %p7591_p13 = pnand %p7589_p12, %p7586_p3 }
  0xf9   : > { %7594 = shalt.err (!%p7591_p13)
}
  0xfa   : > { %s7595_s17 = scalar_lea.vmem %s8109_s25, 256  ;;  %p7603_p7 = scmp.lt.s32.totalorder %s8109_s25, %s8109_s25 }
  0xfb   : > { %p7596_p0 = scmp.ne.s32.totalorder %s8109_s25, %s7595_s17  ;;  %p7604_p9 = scmp.lt.s32.totalorder %s7595_s17, %s7595_s17 }
  0xfd   : > { %p7598_p2 = pnand %p7596_p0, %p7936_p8  ;;  %p7605_p4 = por %p7604_p9, %p7603_p7 }
  0xff   : > { %p7599_p5 = pneg %p7598_p2 }
 0x101   : > { %p7606_p10 = pnand %p7605_p4, %p7599_p5 }
 0x103   : > { %7609 = shalt.err (!%p7606_p10)
}
 0x104   : > { %7188 = dma.hbm_to_vmem [thread:$0]  (!%p7920_p6), %s8701_s8, 256, %s8109_s25, [#allocation15]  }
 0x105   : > { %s7804_s14 = smov [#allocation19]   ;;  %s7805_s19 = smov [#allocation22]  }
 0x106   : > { %s464_s22 = sshll.u32 %s7804_s14, 4  ;;  %s486_s24 = sshll.u32 %s7805_s19, 4  ;;  %s465_s22 = int_to_ptr.vmem [resolvable:$true] %s464_s22  ;;  %s8152_s24 = int_to_ptr.vmem [resolvable:$true] %s486_s24 }
 0x107   : > { %s7610_s29 = scalar_lea.hbm %s8703_s10, 32 }
 0x108   : > { %p7611_p11 = scmp.ne.s32.totalorder %s8703_s10, %s7610_s29  ;;  %p7617_p12 = scmp.lt.u32.totalorder %s7610_s29, %s8703_s10 }
 0x10a   : > { %p7613_p1 = pnand %p7611_p11, %p7936_p8 }
 0x10c   : > { %p7614_p3 = pneg %p7613_p1 }
 0x10e   : > { %p7619_p13 = pnand %p7617_p12, %p7614_p3 }
 0x110   : > { %7622 = shalt.err (!%p7619_p13)
}
 0x111   : > { %s7623_s17 = scalar_lea.vmem %s465_s22, 32  ;;  %p7631_p7 = scmp.lt.s32.totalorder %s465_s22, %s465_s22 }
 0x112   : > { %p7624_p0 = scmp.ne.s32.totalorder %s465_s22, %s7623_s17  ;;  %p7632_p9 = scmp.lt.s32.totalorder %s7623_s17, %s7623_s17 }
 0x114   : > { %p7626_p2 = pnand %p7624_p0, %p7936_p8  ;;  %p7633_p4 = por %p7632_p9, %p7631_p7 }
 0x116   : > { %p7627_p5 = pneg %p7626_p2 }
 0x118   : > { %p7634_p10 = pnand %p7633_p4, %p7627_p5 }
 0x11a   : > { %7637 = shalt.err (!%p7634_p10)
}
 0x11b   : > { %7194 = dma.hbm_to_vmem [thread:$0]  (!%p7920_p6), %s8703_s10, 32, %s465_s22, [#allocation18]  }
 0x11c   : > { %s7638_s0 = scalar_lea.hbm %s8705_s12, 32 }
 0x11d   : > { %p7639_p11 = scmp.ne.s32.totalorder %s8705_s12, %s7638_s0  ;;  %p7645_p12 = scmp.lt.u32.totalorder %s7638_s0, %s8705_s12 }
 0x11f   : > { %p7641_p1 = pnand %p7639_p11, %p7936_p8 }
 0x121   : > { %p7642_p3 = pneg %p7641_p1 }
 0x123   : > { %p7647_p13 = pnand %p7645_p12, %p7642_p3 }
 0x125   : > { %7650 = shalt.err (!%p7647_p13)
}
 0x126   : > { %s7651_s22 = scalar_lea.vmem %s8152_s24, 32  ;;  %p7659_p7 = scmp.lt.s32.totalorder %s8152_s24, %s8152_s24 }
 0x127   : > { %p7652_p0 = scmp.ne.s32.totalorder %s8152_s24, %s7651_s22  ;;  %p7660_p9 = scmp.lt.s32.totalorder %s7651_s22, %s7651_s22 }
 0x129   : > { %p7654_p2 = pnand %p7652_p0, %p7936_p8  ;;  %p7661_p4 = por %p7660_p9, %p7659_p7 }
 0x12b   : > { %p7655_p5 = pneg %p7654_p2 }
 0x12d   : > { %p7662_p10 = pnand %p7661_p4, %p7655_p5 }
 0x12f   : > { %7665 = shalt.err (!%p7662_p10)
}
 0x130   : > { %s8734_s16 = sld [smem:[#allocation32_spill]]  ;;  %s8735_s17 = sld [smem:[#allocation33_spill]] }
 0x131   : > { %7200 = dma.hbm_to_vmem [thread:$0]  (!%p7920_p6), %s8705_s12, 32, %s8152_s24, [#allocation21]  }
 0x132   : > { %s5618_s18 = sadd.s32 4294967294, %s7786_s28   ;;  %s8197_s15 = sadd.s32 1, %s7786_s28  }
 0x133   : > { %s39_s23 = ssub.s32 %s7786_s28, %s8197_s15  ;;  %s42_s14 = sadd.s32 1, %s7782_s27 }
 0x134   : > { %p40_p8 = scmp.eq.s32.totalorder %s39_s23, 0  ;;  %p49_p11 = scmp.ne.s32.totalorder %s7782_s27, %s7778_s26 }
 0x135   : > { %p50_p1 = scmp.eq.s32.totalorder %s7786_s28, 0  ;;  %p337_p2 = scmp.eq.s32.totalorder %s5618_s18, 1 }
 0x136   : > { %p55_p3 = scmp.ne.s32.totalorder %s7778_s26, %s8734_s16  ;;  %p8737_p13 = scmp.eq.s32.totalorder %s8735_s17, 0 }
 0x137   : > { %s8208_s19 = scalar_select %p40_p8, %s7782_s27, %s42_s14  }
 0x138   : > { %p8210_p12 = por %p50_p1, %p49_p11  ;;  %p8216_p6 = por %p8737_p13, %p55_p3 }
 0x139   : > { %p331_p0 = scmp.eq.s32.totalorder %s8735_s17, 1  ;;  %p7221_p5 = scmp.lt.s32.totalorder %s7786_s28, 2 }
 0x13a   : > { %s497_s13 = sand.u32 1, %s7782_s27   ;;  %p8227_p9 = por %p337_p2, %p55_p3 }
 0x13b   : > { %p8223_p7 = por %p331_p0, %p49_p11  ;;  %s5633_s30 = sshll.u32 %s497_s13, 4 }
 0x13c   : > { %s8740_s21 = scalar_select %p8227_p9, 1, 0 }
 0x13d   : > { %s8739_s29 = scalar_select %p8223_p7, 1, 0 }
 0x13e   : > { %s5688_s22 = sshll.u32 %s7786_s28, 8  ;;  %s8741_s16 = sld [smem:[#allocation35_spill]] }
 0x13f   : > { %s501_s17 = scalar_lea.vmem [#allocation2], %s5633_s30  ;;  %p8241_p4 = pnand %p7221_p5, %p8210_p12 }
 0x140   : > { %s509_s18 = sshll.u32 %s501_s17, 4  ;;  %s498_s1 = scalar_lea.sflag [#allocation3], %s497_s13  ;;  %s8237_s18 = int_to_ptr.vmem [resolvable:$true] %s509_s18 }
 0x141   : > { %p7668_p8 = pneg %p8241_p4 }
 0x144   : > { %s8235_s23 = scalar_lea.hbm %s8741_s16, %s5688_s22  ;;  %s7671_s20 = scalar_lea.hbm %s8741_s16, 512 }
 0x145   : > { %s7666_s2 = scalar_lea.hbm %s8235_s23, 256  ;;  %p7672_p3 = scmp.lt.u32.totalorder %s8235_s23, %s8741_s16 }
 0x146   : > { %p7667_p10 = scmp.ne.s32.totalorder %s8235_s23, %s7666_s2  ;;  %p7673_p12 = scmp.lt.u32.totalorder %s7671_s20, %s7666_s2 }
 0x147   : > { %p7675_p0 = scmp.lt.u32.totalorder %s7666_s2, %s8235_s23 }
 0x148   : > { %p7669_p11 = pnand %p7668_p8, %p7667_p10  ;;  %p7674_p13 = por %p7673_p12, %p7672_p3 }
 0x14a   : > { %p7670_p1 = pneg %p7669_p11  ;;  %p7676_p2 = por %p7675_p0, %p7674_p13 }
 0x14c   : > { %p7677_p5 = pnand %p7676_p2, %p7670_p1 }
 0x14e   : > { %7680 = shalt.err (!%p7677_p5)
}
 0x14f   : > { %s7681_s13 = scalar_lea.vmem %s8237_s18, 256  ;;  %s7806_s17 = smov [#allocation2]  }
 0x150   : > { %p7682_p10 = scmp.ne.s32.totalorder %s8237_s18, %s7681_s13  ;;  %s7686_s30 = sshll.u32 %s7806_s17, 4  ;;  %s7687_s30 = int_to_ptr.vmem [resolvable:$false] %s7686_s30 }
 0x151   : > { %s7688_s22 = scalar_lea.vmem %s7687_s30, 512  ;;  %p7689_p7 = scmp.lt.s32.totalorder %s8237_s18, %s7687_s30 }
 0x152   : > { %p7684_p11 = pnand %p7682_p10, %p7668_p8  ;;  %p7690_p3 = scmp.lt.s32.totalorder %s7688_s22, %s7681_s13 }
 0x154   : > { %p7685_p9 = pneg %p7684_p11  ;;  %p7691_p12 = por %p7690_p3, %p7689_p7 }
 0x156   : > { %p7692_p13 = pnand %p7691_p12, %p7685_p9 }
 0x158   : > { %7695 = shalt.err (!%p7692_p13)
}
 0x159   : > { %7204 = dma.hbm_to_vmem [thread:$0]  (!%p8241_p4), %s8235_s23, 256, %s8237_s18, %s498_s1  }
 0x15a   : > { %s8743_s2 = sld [smem:[#allocation34_spill]] }
 0x160   : > { %p8744_p1 = scmp.ne.s32.totalorder %s8743_s2, 0 }
 0x161   : > { %s8273_s20 = sand.u32 (!%p8744_p1), 1, %s7778_s26  }
 0x162   : > { %518 = sbr.rel (%p8744_p1) target bundleno = 5557 (0x15b5), region = 72  ;;  %s5637_s0 = sshll.u32 (!%p8744_p1), %s8273_s20, 4 }
 0x163   : > { %s521_s25 = scalar_lea.sflag (!%p8744_p1), [#allocation3], %s8273_s20  ;;  %s8279_s13 = scalar_lea.vmem (!%p8744_p1), [#allocation2], %s5637_s0 }
 0x169   : > { %7741 = dma.done.wait (%p8216_p6), %s521_s25, 256  }
 0x16a   : > { %7743 = vsyncadd (%p8216_p6), %s521_s25, 4294967040  ;;  %s8745_s1 = sld [smem:[#allocation33_spill]] }
 0x170   : > { %p8746_p7 = scmp.eq.s32.totalorder %s8745_s1, 0 }
 0x172   : > { %7745 = dma.done.wait (%p8746_p7), [#allocation6], 24672   ;;  %p8747_p9 = pmov %p8746_p7 }
 0x173   : > { %p8748_p4 = pmov %p8746_p7 }
 0x174   : > { %7747 = vsyncadd (%p8747_p9), [#allocation6], 4294942624 }
 0x175   : > { %7749 = dma.done.wait (%p8748_p4), [#allocation9], 8224   ;;  %p8749_p8 = pmov %p8748_p4 }
 0x176   : > { %p8750_p0 = pmov %p8748_p4 }
 0x177   : > { %7751 = vsyncadd (%p8749_p8), [#allocation9], 4294959072 }
 0x178   : > { %7753 = dma.done.wait (%p8750_p0), [#allocation12], 64   ;;  %p8751_p2 = pmov %p8750_p0 }
 0x179   : > { %p8752_p6 = pmov %p8750_p0 }
 0x17a   : > { %7755 = vsyncadd (%p8751_p2), [#allocation12], 4294967232 }
 0x17b   : > { %7757 = dma.done.wait (%p8752_p6), [#allocation15], 65792   ;;  %p8753_p5 = pmov %p8750_p0 }
 0x17c   : > { %p8754_p10 = pmov %p8750_p0 }
 0x17d   : > { %7759 = vsyncadd (%p8753_p5), [#allocation15], 4294901504 }
 0x17e   : > { %7761 = dma.done.wait (%p8754_p10), [#allocation18], 65568   ;;  %p8755_p11 = pmov %p8750_p0 }
 0x17f   : > { %p8756_p3 = pmov %p8750_p0 }
 0x180   : > { %7763 = vsyncadd (%p8755_p11), [#allocation18], 4294901728 }
 0x181   : > { %7765 = dma.done.wait (%p8756_p3), [#allocation21], 64   ;;  %p8757_p12 = pmov %p8750_p0 }
 0x182   : > { %v618_v0 = vld [vmem:[#allocation5 + $0x8] sm:$0xff]  ;;  %v624_v1 = vld [vmem:[#allocation5 + $0x38] sm:$0xff]  ;;  %v617_v2 = vld [vmem:[#allocation5] sm:$0xff]  ;;  %vm7808_vm0 = vmmov 0   ;;  %vm1055_vm1 = vcmask 261120   ;;  %s7809_s24 = smov 96  }
 0x183   : > { %7767 = vsyncadd (%p8757_p12), [#allocation21], 4294967232  ;;  %v5802_v3 = vpack.c.bf16 %v624_v1, %v618_v0  ;;  %v623_v4 = vld [vmem:[#allocation5 + $0x30] sm:$0xff]  ;;  %v630_v5 = vld [vmem:[#allocation5 + $0x68] sm:$0xff]  ;;  %vm1132_vm2 = vcmask 64512   ;;  %s7810_s23 = smov 64  }
 0x184   : > { %v636_v6 = vld [vmem:[#allocation5 + $0x98] sm:$0xff]  ;;  %v5804_v7 = vpack.c.bf16 %v623_v4, %v617_v2  ;;  %v629_v9 = vld [vmem:[#allocation5 + $0x60] sm:$0xff]  ;;  %v635_v10 = vld [vmem:[#allocation5 + $0x90] sm:$0xff]  ;;  %s7811_s18 = smov 32   ;;  %s5689_s14 = sshll.u32 %s8745_s1, 8 }
 0x185   : > { %v5806_v8 = vpack.c.bf16 %v636_v6, %v630_v5  ;;  %v642_v11 = vld [vmem:[#allocation5 + $0xc8] sm:$0xff]  ;;  %5803 = vmatprep.subr.bf16.mxu1 %v5802_v3  ;;  %v648_v12 = vld [vmem:[#allocation5 + $0xf8] sm:$0xff]  ;;  %v5808_v13 = vpack.c.bf16 %v635_v10, %v629_v9  ;;  %v641_v15 = vld [vmem:[#allocation5 + $0xc0] sm:$0xff]  ;;  %s614_s17 = scalar_lea.vmem [#allocation23], %s5637_s0  ;;  %s8758_s25 = sld [smem:[#allocation39_spill]] }
 0x186   : > { %5805 = vmatpush1.bf16.msra.mxu1 %v5804_v7  ;;  %v5810_v14 = vpack.c.bf16 %v648_v12, %v642_v11  ;;  %v647_v16 = vld [vmem:[#allocation5 + $0xf0] sm:$0xff]  ;;  %v654_v17 = vld [vmem:[#allocation5 + $0x128] sm:$0xff]  ;;  %v660_v18 = vld [vmem:[#allocation5 + $0x158] sm:$0xff]  ;;  %s5434_s30 = sshll.u32 %s614_s17, 4  ;;  %s5420_s1 = scalar_lea.sflag [#allocation4], %s8273_s20  ;;  %s8651_s30 = int_to_ptr.vmem [resolvable:$true] %s5434_s30 }
 0x187   : > { %5807 = vmatprep.subr.bf16.mxu1 %v5806_v8  ;;  %v5812_v19 = vpack.c.bf16 %v647_v16, %v641_v15  ;;  %v5814_v20 = vpack.c.bf16 %v660_v18, %v654_v17  ;;  %v653_v21 = vld [vmem:[#allocation5 + $0x120] sm:$0xff]  ;;  %v659_v22 = vld [vmem:[#allocation5 + $0x150] sm:$0xff]  ;;  %v666_v23 = vld [vmem:[#allocation5 + $0x188] sm:$0xff]  ;;  %p8760_p1 = scmp.ne.s32.totalorder %s8739_s29, 0  ;;  %s7812_s0 = smov [#allocation23]  }
 0x188   : > { %v672_v24 = vld [vmem:[#allocation5 + $0x1b8] sm:$0xff]  ;;  %v5816_v25 = vpack.c.bf16 %v659_v22, %v653_v21  ;;  %v665_v27 = vld [vmem:[#allocation5 + $0x180] sm:$0xff]  ;;  %v671_v28 = vld [vmem:[#allocation5 + $0x1b0] sm:$0xff] }
 0x189   : > { %v5818_v26 = vpack.c.bf16 %v672_v24, %v666_v23  ;;  %v678_v29 = vld [vmem:[#allocation5 + $0x1e8] sm:$0xff]  ;;  %v684_v30 = vld [vmem:[#allocation5 + $0x218] sm:$0xff]  ;;  %v5820_v31 = vpack.c.bf16 %v671_v28, %v665_v27  ;;  %v677_v33 = vld [vmem:[#allocation5 + $0x1e0] sm:$0xff] }
 0x18a   : > { %5809 = vmatpush1.bf16.msra.mxu1 %v5808_v13  ;;  %v5822_v32 = vpack.c.bf16 %v684_v30, %v678_v29  ;;  %v683_v34 = vld [vmem:[#allocation5 + $0x210] sm:$0xff]  ;;  %v690_v35 = vld [vmem:[#allocation5 + $0x248] sm:$0xff]  ;;  %v696_v36 = vld [vmem:[#allocation5 + $0x278] sm:$0xff] }
 0x18b   : > { %5811 = vmatprep.subr.bf16.mxu1 %v5810_v14  ;;  %v5824_v37 = vpack.c.bf16 %v683_v34, %v677_v33  ;;  %v5826_v38 = vpack.c.bf16 %v696_v36, %v690_v35  ;;  %v689_v39 = vld [vmem:[#allocation5 + $0x240] sm:$0xff]  ;;  %v695_v40 = vld [vmem:[#allocation5 + $0x270] sm:$0xff]  ;;  %v8310_v41 = vld [vmem:[%s8279_s13 + $0x8] sm:$0xff] }
 0x18c   : > { %v702_v42 = vld [vmem:[#allocation5 + $0x2a8] sm:$0xff]  ;;  %v708_v43 = vld [vmem:[#allocation5 + $0x2d8] sm:$0xff]  ;;  %905 = vmatprep.mubr.f32.mxu1 %v8310_v41  ;;  %v5828_v44 = vpack.c.bf16 %v695_v40, %v689_v39  ;;  %v701_v46 = vld [vmem:[#allocation5 + $0x2a0] sm:$0xff] }
 0x18d   : > { %v5830_v45 = vpack.c.bf16 %v708_v43, %v702_v42  ;;  %v707_v47 = vld [vmem:[#allocation5 + $0x2d0] sm:$0xff]  ;;  %v714_v48 = vld [vmem:[#allocation5 + $0x308] sm:$0xff]  ;;  %v720_v49 = vld [vmem:[#allocation5 + $0x338] sm:$0xff] }
 0x18e   : > { %5813 = vmatpush1.bf16.msra.mxu1 %v5812_v19  ;;  %v5832_v50 = vpack.c.bf16 %v707_v47, %v701_v46  ;;  %v5834_v51 = vpack.c.bf16 %v720_v49, %v714_v48  ;;  %v713_v52 = vld [vmem:[#allocation5 + $0x300] sm:$0xff]  ;;  %v719_v53 = vld [vmem:[#allocation5 + $0x330] sm:$0xff]  ;;  %v726_v54 = vld [vmem:[#allocation5 + $0x368] sm:$0xff] }
 0x18f   : > { %5815 = vmatprep.subr.bf16.mxu1 %v5814_v20  ;;  %v732_v55 = vld [vmem:[#allocation5 + $0x398] sm:$0xff]  ;;  %v5836_v56 = vpack.c.bf16 %v719_v53, %v713_v52  ;;  %v725_v58 = vld [vmem:[#allocation5 + $0x360] sm:$0xff]  ;;  %v731_v59 = vld [vmem:[#allocation5 + $0x390] sm:$0xff] }
 0x190   : > { %v5838_v57 = vpack.c.bf16 %v732_v55, %v726_v54  ;;  %v738_v60 = vld [vmem:[#allocation5 + $0x3c8] sm:$0xff]  ;;  %v744_v61 = vld [vmem:[#allocation5 + $0x3f8] sm:$0xff]  ;;  %v5840_v62 = vpack.c.bf16 %v731_v59, %v725_v58  ;;  %v737_v0 = vld [vmem:[#allocation5 + $0x3c0] sm:$0xff] }
 0x191   : > { %v5842_v63 = vpack.c.bf16 %v744_v61, %v738_v60  ;;  %v743_v1 = vld [vmem:[#allocation5 + $0x3f0] sm:$0xff]  ;;  %v750_v2 = vld [vmem:[#allocation5 + $0x428] sm:$0xff]  ;;  %v756_v3 = vld [vmem:[#allocation5 + $0x458] sm:$0xff] }
 0x192   : > { %5817 = vmatpush1.bf16.msra.mxu1 %v5816_v25  ;;  %v5844_v4 = vpack.c.bf16 %v743_v1, %v737_v0  ;;  %v5846_v5 = vpack.c.bf16 %v756_v3, %v750_v2  ;;  %v749_v6 = vld [vmem:[#allocation5 + $0x420] sm:$0xff]  ;;  %v755_v7 = vld [vmem:[#allocation5 + $0x450] sm:$0xff]  ;;  %v762_v8 = vld [vmem:[#allocation5 + $0x488] sm:$0xff] }
 0x193   : > { %5819 = vmatprep.subr.bf16.mxu1 %v5818_v26  ;;  %v768_v9 = vld [vmem:[#allocation5 + $0x4b8] sm:$0xff]  ;;  %v5848_v10 = vpack.c.bf16 %v755_v7, %v749_v6  ;;  %v761_v12 = vld [vmem:[#allocation5 + $0x480] sm:$0xff]  ;;  %v767_v13 = vld [vmem:[#allocation5 + $0x4b0] sm:$0xff] }
 0x194   : > { %v5850_v11 = vpack.c.bf16 %v768_v9, %v762_v8  ;;  %v774_v14 = vld [vmem:[#allocation5 + $0x4e8] sm:$0xff]  ;;  %v780_v15 = vld [vmem:[#allocation5 + $0x518] sm:$0xff]  ;;  %v5852_v16 = vpack.c.bf16 %v767_v13, %v761_v12  ;;  %v773_v18 = vld [vmem:[#allocation5 + $0x4e0] sm:$0xff] }
 0x195   : > { %v5854_v17 = vpack.c.bf16 %v780_v15, %v774_v14  ;;  %v779_v19 = vld [vmem:[#allocation5 + $0x510] sm:$0xff]  ;;  %v786_v20 = vld [vmem:[#allocation5 + $0x548] sm:$0xff]  ;;  %v792_v21 = vld [vmem:[#allocation5 + $0x578] sm:$0xff] }
 0x196   : > { %5821 = vmatpush1.bf16.msra.mxu1 %v5820_v31  ;;  %v5856_v22 = vpack.c.bf16 %v779_v19, %v773_v18  ;;  %v5858_v23 = vpack.c.bf16 %v792_v21, %v786_v20  ;;  %v785_v24 = vld [vmem:[#allocation5 + $0x540] sm:$0xff]  ;;  %v791_v25 = vld [vmem:[#allocation5 + $0x570] sm:$0xff]  ;;  %v798_v26 = vld [vmem:[#allocation5 + $0x5a8] sm:$0xff] }
 0x197   : > { %5823 = vmatprep.subr.bf16.mxu1 %v5822_v32  ;;  %v804_v27 = vld [vmem:[#allocation5 + $0x5d8] sm:$0xff]  ;;  %v5860_v28 = vpack.c.bf16 %v791_v25, %v785_v24  ;;  %v797_v30 = vld [vmem:[#allocation5 + $0x5a0] sm:$0xff]  ;;  %v803_v31 = vld [vmem:[#allocation5 + $0x5d0] sm:$0xff] }
 0x198   : > { %v5862_v29 = vpack.c.bf16 %v804_v27, %v798_v26  ;;  %v620_v32 = vld [vmem:[#allocation5 + $0x18] sm:$0xff]  ;;  %v626_v33 = vld [vmem:[#allocation5 + $0x48] sm:$0xff]  ;;  %v5864_v34 = vpack.c.bf16 %v803_v31, %v797_v30  ;;  %v619_v36 = vld [vmem:[#allocation5 + $0x10] sm:$0xff] }
 0x199   : > { %v5866_v35 = vpack.c.bf16 %v626_v33, %v620_v32  ;;  %v638_v39 = vld [vmem:[#allocation5 + $0xa8] sm:$0xff]  ;;  %v8314_v40 = vld [vmem:[%s8279_s13] sm:$0xff]  ;;  %v644_v46 = vld [vmem:[#allocation5 + $0xd8] sm:$0xff] }
 0x19a   : > { %5825 = vmatpush1.bf16.msra.mxu1 %v5824_v37  ;;  %v625_v37 = vld [vmem:[#allocation5 + $0x40] sm:$0xff]  ;;  %v650_v47 = vld [vmem:[#allocation5 + $0x108] sm:$0xff]  ;;  %v656_v52 = vld [vmem:[#allocation5 + $0x138] sm:$0xff] }
 0x19b   : > { %5827 = vmatprep.subr.bf16.mxu1 %v5826_v38  ;;  %v632_v38 = vld [vmem:[#allocation5 + $0x78] sm:$0xff]  ;;  %v5868_v42 = vpack.c.bf16 %v625_v37, %v619_v36  ;;  %v5874_v49 = vpack.c.bf16 %v650_v47, %v644_v46  ;;  %v662_v53 = vld [vmem:[#allocation5 + $0x168] sm:$0xff] }
 0x19c   : > { %v5870_v43 = vpack.c.bf16 %v638_v39, %v632_v38  ;;  %v5878_v55 = vpack.c.bf16 %v662_v53, %v656_v52  ;;  %v668_v58 = vld [vmem:[#allocation5 + $0x198] sm:$0xff]  ;;  %v674_v59 = vld [vmem:[#allocation5 + $0x1c8] sm:$0xff] }
 0x19d   : > { %v5882_v61 = vpack.c.bf16 %v674_v59, %v668_v58  ;;  %v680_v0 = vld [vmem:[#allocation5 + $0x1f8] sm:$0xff]  ;;  %v686_v1 = vld [vmem:[#allocation5 + $0x228] sm:$0xff] }
 0x19e   : > { %5829 = vmatpush1.bf16.msra.mxu1 %v5828_v44  ;;  %v631_v44 = vld [vmem:[#allocation5 + $0x70] sm:$0xff]  ;;  %v5886_v3 = vpack.c.bf16 %v686_v1, %v680_v0  ;;  %v692_v6 = vld [vmem:[#allocation5 + $0x258] sm:$0xff]  ;;  %v698_v7 = vld [vmem:[#allocation5 + $0x288] sm:$0xff] }
 0x19f   : > { %5831 = vmatprep.subr.bf16.mxu1 %v5830_v45  ;;  %v637_v45 = vld [vmem:[#allocation5 + $0xa0] sm:$0xff]  ;;  %v5890_v9 = vpack.c.bf16 %v698_v7, %v692_v6  ;;  %v704_v12 = vld [vmem:[#allocation5 + $0x2b8] sm:$0xff]  ;;  %v710_v13 = vld [vmem:[#allocation5 + $0x2e8] sm:$0xff] }
 0x1a0   : > { %v5872_v48 = vpack.c.bf16 %v637_v45, %v631_v44  ;;  %v5894_v15 = vpack.c.bf16 %v710_v13, %v704_v12  ;;  %v716_v18 = vld [vmem:[#allocation5 + $0x318] sm:$0xff]  ;;  %v722_v19 = vld [vmem:[#allocation5 + $0x348] sm:$0xff] }
 0x1a1   : > { %v5898_v21 = vpack.c.bf16 %v722_v19, %v716_v18  ;;  %v728_v24 = vld [vmem:[#allocation5 + $0x378] sm:$0xff]  ;;  %v734_v25 = vld [vmem:[#allocation5 + $0x3a8] sm:$0xff] }
 0x1a2   : > { %5833 = vmatpush1.bf16.msra.mxu1 %v5832_v50  ;;  %v643_v50 = vld [vmem:[#allocation5 + $0xd0] sm:$0xff]  ;;  %v5902_v27 = vpack.c.bf16 %v734_v25, %v728_v24  ;;  %v740_v30 = vld [vmem:[#allocation5 + $0x3d8] sm:$0xff]  ;;  %v746_v31 = vld [vmem:[#allocation5 + $0x408] sm:$0xff] }
 0x1a3   : > { %5835 = vmatprep.subr.bf16.mxu1 %v5834_v51  ;;  %v649_v51 = vld [vmem:[#allocation5 + $0x100] sm:$0xff]  ;;  %v5906_v33 = vpack.c.bf16 %v746_v31, %v740_v30  ;;  %v752_v36 = vld [vmem:[#allocation5 + $0x438] sm:$0xff]  ;;  %v758_v37 = vld [vmem:[#allocation5 + $0x468] sm:$0xff] }
 0x1a4   : > { %v5876_v54 = vpack.c.bf16 %v649_v51, %v643_v50  ;;  %v5910_v39 = vpack.c.bf16 %v758_v37, %v752_v36  ;;  %v764_v44 = vld [vmem:[#allocation5 + $0x498] sm:$0xff]  ;;  %v770_v45 = vld [vmem:[#allocation5 + $0x4c8] sm:$0xff]  ;;  %v627_v30 = vld [vmem:[#allocation5 + $0x50] sm:$0xff] }
 0x1a5   : > { %v5914_v47 = vpack.c.bf16 %v770_v45, %v764_v44  ;;  %v776_v50 = vld [vmem:[#allocation5 + $0x4f8] sm:$0xff]  ;;  %v782_v51 = vld [vmem:[#allocation5 + $0x528] sm:$0xff]  ;;  %v639_v36 = vld [vmem:[#allocation5 + $0xb0] sm:$0xff] }
 0x1a6   : > { %5837 = vmatpush1.bf16.msra.mxu1 %v5836_v56  ;;  %v655_v56 = vld [vmem:[#allocation5 + $0x130] sm:$0xff]  ;;  %v5918_v53 = vpack.c.bf16 %v782_v51, %v776_v50  ;;  %v634_v31 = vld [vmem:[#allocation5 + $0x88] sm:$0xff] }
 0x1a7   : > { %5839 = vmatprep.subr.bf16.mxu1 %v5838_v57  ;;  %v661_v57 = vld [vmem:[#allocation5 + $0x160] sm:$0xff]  ;;  %v646_v37 = vld [vmem:[#allocation5 + $0xe8] sm:$0xff]  ;;  %v651_v44 = vld [vmem:[#allocation5 + $0x110] sm:$0xff] }
 0x1a8   : > { %v5880_v60 = vpack.c.bf16 %v661_v57, %v655_v56  ;;  %v788_v56 = vld [vmem:[#allocation5 + $0x558] sm:$0xff]  ;;  %v794_v57 = vld [vmem:[#allocation5 + $0x588] sm:$0xff]  ;;  %v663_v50 = vld [vmem:[#allocation5 + $0x170] sm:$0xff] }
 0x1a9   : > { %v5922_v59 = vpack.c.bf16 %v794_v57, %v788_v56  ;;  %v658_v45 = vld [vmem:[#allocation5 + $0x148] sm:$0xff]  ;;  %v675_v56 = vld [vmem:[#allocation5 + $0x1d0] sm:$0xff] }
 0x1aa   : > { %5841 = vmatpush1.bf16.msra.mxu1 %v5840_v62  ;;  %v667_v62 = vld [vmem:[#allocation5 + $0x190] sm:$0xff]  ;;  %v670_v51 = vld [vmem:[#allocation5 + $0x1a8] sm:$0xff] }
 0x1ab   : > { %5843 = vmatprep.subr.bf16.mxu1 %v5842_v63  ;;  %v673_v63 = vld [vmem:[#allocation5 + $0x1c0] sm:$0xff]  ;;  %v682_v57 = vld [vmem:[#allocation5 + $0x208] sm:$0xff] }
 0x1ac   : > { %v5884_v2 = vpack.c.bf16 %v673_v63, %v667_v62  ;;  %v800_v62 = vld [vmem:[#allocation5 + $0x5b8] sm:$0xff]  ;;  %v806_v63 = vld [vmem:[#allocation5 + $0x5e8] sm:$0xff] }
 0x1ad   : > { %v5926_v1 = vpack.c.bf16 %v806_v63, %v800_v62  ;;  %v687_v62 = vld [vmem:[#allocation5 + $0x230] sm:$0xff]  ;;  %v694_v63 = vld [vmem:[#allocation5 + $0x268] sm:$0xff] }
 0x1ae   : > { %5845 = vmatpush1.bf16.msra.mxu1 %v5844_v4  ;;  %v679_v4 = vld [vmem:[#allocation5 + $0x1f0] sm:$0xff] }
 0x1af   : > { %5847 = vmatprep.subr.bf16.mxu1 %v5846_v5  ;;  %v685_v5 = vld [vmem:[#allocation5 + $0x220] sm:$0xff] }
 0x1b0   : > { %v5888_v8 = vpack.c.bf16 %v685_v5, %v679_v4  ;;  %v7807_v5 = vmov 0.0  }
 0x1b1   : > { %5722 = vmatprep.subr.mxu0 %v7807_v5  ;;  %5724 = vmatprep.mubr.msk.f32.mxu0 %vm7808_vm0, %v7807_v5 }
 0x1b2   : > { %5849 = vmatpush1.bf16.msra.mxu1 %v5848_v10  ;;  %v691_v10 = vld [vmem:[#allocation5 + $0x250] sm:$0xff] }
 0x1b3   : > { %5851 = vmatprep.subr.bf16.mxu1 %v5850_v11  ;;  %v697_v11 = vld [vmem:[#allocation5 + $0x280] sm:$0xff] }
 0x1b4   : > { %v5892_v14 = vpack.c.bf16 %v697_v11, %v691_v10  ;;  %v8328_v11 = vld [vmem:[#allocation7] sm:$0x3f] }
 0x1b6   : > { %5853 = vmatpush1.bf16.msra.mxu1 %v5852_v16  ;;  %v703_v16 = vld [vmem:[#allocation5 + $0x2b0] sm:$0xff] }
 0x1b7   : > { %5855 = vmatprep.subr.bf16.mxu1 %v5854_v17  ;;  %v709_v17 = vld [vmem:[#allocation5 + $0x2e0] sm:$0xff] }
 0x1b8   : > { %v5896_v20 = vpack.c.bf16 %v709_v17, %v703_v16 }
 0x1ba   : > { %5857 = vmatpush1.bf16.msra.mxu1 %v5856_v22  ;;  %v715_v22 = vld [vmem:[#allocation5 + $0x310] sm:$0xff] }
 0x1bb   : > { %5859 = vmatprep.subr.bf16.mxu1 %v5858_v23  ;;  %v721_v23 = vld [vmem:[#allocation5 + $0x340] sm:$0xff] }
 0x1bc   : > { %v5900_v26 = vpack.c.bf16 %v721_v23, %v715_v22 }
 0x1be   : > { %5861 = vmatpush1.bf16.msra.mxu1 %v5860_v28  ;;  %v727_v28 = vld [vmem:[#allocation5 + $0x370] sm:$0xff] }
 0x1bf   : > { %5863 = vmatprep.subr.bf16.mxu1 %v5862_v29  ;;  %v733_v29 = vld [vmem:[#allocation5 + $0x3a0] sm:$0xff] }
 0x1c0   : > { %v5904_v32 = vpack.c.bf16 %v733_v29, %v727_v28  ;;  %v621_v28 = vld [vmem:[#allocation5 + $0x20] sm:$0xff] }
 0x1c2   : > { %5865 = vmatpush1.bf16.msra.mxu1 %v5864_v34  ;;  %v739_v34 = vld [vmem:[#allocation5 + $0x3d0] sm:$0xff] }
 0x1c3   : > { %5867 = vmatprep.subr.bf16.mxu1 %v5866_v35  ;;  %v745_v35 = vld [vmem:[#allocation5 + $0x400] sm:$0xff] }
 0x1c4   : > { %v5908_v38 = vpack.c.bf16 %v745_v35, %v739_v34  ;;  %v633_v35 = vld [vmem:[#allocation5 + $0x80] sm:$0xff] }
 0x1c5   : > { %906 = vmatmul.mubr.f32.vlgmr.msra.gmra.mrb[0].mxu1 %v8314_v40 }
 0x1c6   : > { %5869 = vmatpush1.bf16.msra.mxu1 %v5868_v42  ;;  %976 = vmatprep.mubr.f32.mxu1 %v8310_v41  ;;  %v751_v42 = vld [vmem:[#allocation5 + $0x430] sm:$0xff] }
 0x1c7   : > { %5871 = vmatprep.subr.bf16.mxu1 %v5870_v43  ;;  %v757_v43 = vld [vmem:[#allocation5 + $0x460] sm:$0xff] }
 0x1c8   : > { %v5912_v46 = vpack.c.bf16 %v757_v43, %v751_v42  ;;  %v645_v43 = vld [vmem:[#allocation5 + $0xe0] sm:$0xff] }
 0x1ca   : > { %5873 = vmatpush1.bf16.msra.mxu1 %v5872_v48  ;;  %v763_v48 = vld [vmem:[#allocation5 + $0x490] sm:$0xff] }
 0x1cb   : > { %5875 = vmatprep.subr.bf16.mxu1 %v5874_v49  ;;  %v769_v49 = vld [vmem:[#allocation5 + $0x4c0] sm:$0xff] }
 0x1cc   : > { %v5916_v52 = vpack.c.bf16 %v769_v49, %v763_v48  ;;  %v657_v49 = vld [vmem:[#allocation5 + $0x140] sm:$0xff] }
 0x1ce   : > { %5877 = vmatpush1.bf16.msra.mxu1 %v5876_v54  ;;  %v775_v54 = vld [vmem:[#allocation5 + $0x4f0] sm:$0xff] }
 0x1cf   : > { %5879 = vmatprep.subr.bf16.mxu1 %v5878_v55  ;;  %v781_v55 = vld [vmem:[#allocation5 + $0x520] sm:$0xff] }
 0x1d0   : > { %v5920_v58 = vpack.c.bf16 %v781_v55, %v775_v54  ;;  %v669_v55 = vld [vmem:[#allocation5 + $0x1a0] sm:$0xff] }
 0x1d2   : > { %5881 = vmatpush1.bf16.msra.mxu1 %v5880_v60  ;;  %v787_v60 = vld [vmem:[#allocation5 + $0x550] sm:$0xff] }
 0x1d3   : > { %5883 = vmatprep.subr.bf16.mxu1 %v5882_v61  ;;  %v793_v61 = vld [vmem:[#allocation5 + $0x580] sm:$0xff] }
 0x1d4   : > { %v5924_v0 = vpack.c.bf16 %v793_v61, %v787_v60  ;;  %v681_v61 = vld [vmem:[#allocation5 + $0x200] sm:$0xff] }
 0x1d6   : > { %5885 = vmatpush1.bf16.msra.mxu1 %v5884_v2  ;;  %v799_v2 = vld [vmem:[#allocation5 + $0x5b0] sm:$0xff] }
 0x1d7   : > { %5887 = vmatprep.subr.bf16.mxu1 %v5886_v3  ;;  %v805_v3 = vld [vmem:[#allocation5 + $0x5e0] sm:$0xff] }
 0x1d8   : > { %v5928_v4 = vpack.c.bf16 %v805_v3, %v799_v2  ;;  %v693_v3 = vld [vmem:[#allocation5 + $0x260] sm:$0xff] }
 0x1da   : > { %5889 = vmatpush1.bf16.msra.mxu1 %v5888_v8  ;;  %v811_v8 = vlaneseq }
 0x1db   : > { %5891 = vmatprep.subr.bf16.mxu1 %v5890_v9 }
 0x1dc   : > { %v8323_v9 = vshrl.u32 %v811_v8, 7 }
 0x1de   : > { %5893 = vmatpush1.bf16.msra.mxu1 %v5892_v14  ;;  %v8326_v10 = vsub.s32 0, %v8323_v9  ;;  %v8331_v12 = vsub.s32 2, %v8323_v9  ;;  %v8336_v13 = vsub.s32 1, %v8323_v9 }
 0x1df   : > { %5895 = vmatprep.subr.bf16.mxu1 %v5894_v15  ;;  %v8341_v15 = vsub.s32 3, %v8323_v9 }
 0x1e0   : > { %v822_v14 = vrot.slane %v8328_v11, %v8331_v12  ;;  %v818_v17 = vrot.slane %v8328_v11, %v8336_v13 }
 0x1e2   : > { %5897 = vmatpush1.bf16.msra.mxu1 %v5896_v20  ;;  %v826_v20 = vrot.slane %v8328_v11, %v8341_v15 }
 0x1e3   : > { %5899 = vmatprep.subr.bf16.mxu1 %v5898_v21 }
 0x1e6   : > { %5901 = vmatpush1.bf16.msra.mxu1 %v5900_v26  ;;  %v622_v26 = vld [vmem:[#allocation5 + $0x28] sm:$0xff] }
 0x1e7   : > { %5903 = vmatprep.subr.bf16.mxu1 %v5902_v27  ;;  %v628_v27 = vld [vmem:[#allocation5 + $0x58] sm:$0xff] }
 0x1e8   : > { %v5930_v29 = vpack.c.bf16 %v628_v27, %v622_v26  ;;  %v723_v26 = vld [vmem:[#allocation5 + $0x350] sm:$0xff]  ;;  %v730_v27 = vld [vmem:[#allocation5 + $0x388] sm:$0xff] }
 0x1ea   : > { %5905 = vmatpush1.bf16.msra.mxu1 %v5904_v32  ;;  %v640_v32 = vld [vmem:[#allocation5 + $0xb8] sm:$0xff] }
 0x1eb   : > { %5907 = vmatprep.subr.bf16.mxu1 %v5906_v33  ;;  %v5932_v33 = vpack.c.bf16 %v627_v30, %v621_v28  ;;  %v5934_v34 = vpack.c.bf16 %v640_v32, %v634_v31  ;;  %v736_v28 = vld [vmem:[#allocation5 + $0x3b8] sm:$0xff]  ;;  %v729_v31 = vld [vmem:[#allocation5 + $0x380] sm:$0xff]  ;;  %v735_v32 = vld [vmem:[#allocation5 + $0x3b0] sm:$0xff] }
 0x1ec   : > { %v5966_v30 = vpack.c.bf16 %v736_v28, %v730_v27 }
 0x1ee   : > { %5909 = vmatpush1.bf16.msra.mxu1 %v5908_v38  ;;  %v652_v38 = vld [vmem:[#allocation5 + $0x118] sm:$0xff] }
 0x1ef   : > { %5911 = vmatprep.subr.bf16.mxu1 %v5910_v39  ;;  %v5936_v39 = vpack.c.bf16 %v639_v36, %v633_v35  ;;  %v5938_v42 = vpack.c.bf16 %v652_v38, %v646_v37  ;;  %v5968_v35 = vpack.c.bf16 %v735_v32, %v729_v31  ;;  %v741_v37 = vld [vmem:[#allocation5 + $0x3e0] sm:$0xff]  ;;  %v747_v38 = vld [vmem:[#allocation5 + $0x410] sm:$0xff] }
 0x1f2   : > { %5913 = vmatpush1.bf16.msra.mxu1 %v5912_v46  ;;  %v664_v46 = vld [vmem:[#allocation5 + $0x178] sm:$0xff] }
 0x1f3   : > { %5915 = vmatprep.subr.bf16.mxu1 %v5914_v47  ;;  %v5940_v47 = vpack.c.bf16 %v651_v44, %v645_v43  ;;  %v5942_v48 = vpack.c.bf16 %v664_v46, %v658_v45  ;;  %v5972_v43 = vpack.c.bf16 %v747_v38, %v741_v37  ;;  %v753_v45 = vld [vmem:[#allocation5 + $0x440] sm:$0xff]  ;;  %v759_v46 = vld [vmem:[#allocation5 + $0x470] sm:$0xff] }
 0x1f6   : > { %5917 = vmatpush1.bf16.msra.mxu1 %v5916_v52  ;;  %v676_v52 = vld [vmem:[#allocation5 + $0x1d8] sm:$0xff] }
 0x1f7   : > { %5919 = vmatprep.subr.bf16.mxu1 %v5918_v53  ;;  %v5944_v53 = vpack.c.bf16 %v663_v50, %v657_v49  ;;  %v5946_v54 = vpack.c.bf16 %v676_v52, %v670_v51  ;;  %v5976_v49 = vpack.c.bf16 %v759_v46, %v753_v45  ;;  %v765_v51 = vld [vmem:[#allocation5 + $0x4a0] sm:$0xff]  ;;  %v771_v52 = vld [vmem:[#allocation5 + $0x4d0] sm:$0xff] }
 0x1fa   : > { %5921 = vmatpush1.bf16.msra.mxu1 %v5920_v58  ;;  %v688_v58 = vld [vmem:[#allocation5 + $0x238] sm:$0xff] }
 0x1fb   : > { %5923 = vmatprep.subr.bf16.mxu1 %v5922_v59  ;;  %v5948_v59 = vpack.c.bf16 %v675_v56, %v669_v55  ;;  %v5950_v60 = vpack.c.bf16 %v688_v58, %v682_v57  ;;  %v5980_v55 = vpack.c.bf16 %v771_v52, %v765_v51  ;;  %v777_v57 = vld [vmem:[#allocation5 + $0x500] sm:$0xff]  ;;  %v783_v58 = vld [vmem:[#allocation5 + $0x530] sm:$0xff] }
 0x1fe   : > { %5925 = vmatpush1.bf16.msra.mxu1 %v5924_v0  ;;  %v700_v0 = vld [vmem:[#allocation5 + $0x298] sm:$0xff] }
 0x1ff   : > { %5927 = vmatprep.subr.bf16.mxu1 %v5926_v1  ;;  %v5952_v1 = vpack.c.bf16 %v687_v62, %v681_v61  ;;  %v5954_v2 = vpack.c.bf16 %v700_v0, %v694_v63  ;;  %v5984_v61 = vpack.c.bf16 %v783_v58, %v777_v57  ;;  %v789_v63 = vld [vmem:[#allocation5 + $0x560] sm:$0xff]  ;;  %v795_v0 = vld [vmem:[#allocation5 + $0x590] sm:$0xff] }
 0x200   : > { %v1392_v57 = vld [vmem:[#allocation8 + $0x48] sm:$0xff]  ;;  %v1394_v58 = vld [vmem:[#allocation8 + $0x58] sm:$0xff] }
 0x202   : > { %5929 = vmatpush1.bf16.msra.mxu1 %v5928_v4  ;;  %v699_v4 = vld [vmem:[#allocation5 + $0x290] sm:$0xff] }
 0x203   : > { %5931 = vmatprep.subr.bf16.mxu1 %v5930_v29  ;;  %v5956_v8 = vpack.c.bf16 %v699_v4, %v693_v3  ;;  %v5988_v3 = vpack.c.bf16 %v795_v0, %v789_v63  ;;  %v1396_v63 = vld [vmem:[#allocation8 + $0x68] sm:$0xff]  ;;  %v1398_v0 = vld [vmem:[#allocation8 + $0x78] sm:$0xff] }
 0x205   : > { %977 = vmatmul.mubr.f32.vlgmr.msra.gmra.mrb[2].mxu1 %v8314_v40 }
 0x206   : > { %1047 = vmatprep.mubr.f32.mxu1 %v8310_v41  ;;  %v814_v41 = vrot.slane %v8328_v11, %v8326_v10  ;;  %5933 = vmatpush1.bf16.msra.mxu1 %v5932_v33  ;;  %v742_v33 = vld [vmem:[#allocation5 + $0x3e8] sm:$0xff] }
 0x207   : > { %5935 = vmatprep.subr.bf16.mxu1 %v5934_v34  ;;  %v748_v34 = vld [vmem:[#allocation5 + $0x418] sm:$0xff] }
 0x208   : > { %v5970_v36 = vpack.c.bf16 %v748_v34, %v742_v33 }
 0x20a   : > { %5937 = vmatpush1.bf16.msra.mxu1 %v5936_v39  ;;  %v754_v39 = vld [vmem:[#allocation5 + $0x448] sm:$0xff] }
 0x20b   : > { %5939 = vmatprep.subr.bf16.mxu1 %v5938_v42  ;;  %v760_v42 = vld [vmem:[#allocation5 + $0x478] sm:$0xff] }
 0x20c   : > { %v5974_v44 = vpack.c.bf16 %v760_v42, %v754_v39 }
 0x20e   : > { %5941 = vmatpush1.bf16.msra.mxu1 %v5940_v47  ;;  %v766_v47 = vld [vmem:[#allocation5 + $0x4a8] sm:$0xff] }
 0x20f   : > { %5943 = vmatprep.subr.bf16.mxu1 %v5942_v48  ;;  %v772_v48 = vld [vmem:[#allocation5 + $0x4d8] sm:$0xff] }
 0x210   : > { %v5978_v50 = vpack.c.bf16 %v772_v48, %v766_v47 }
 0x212   : > { %5945 = vmatpush1.bf16.msra.mxu1 %v5944_v53  ;;  %v778_v53 = vld [vmem:[#allocation5 + $0x508] sm:$0xff] }
 0x213   : > { %5947 = vmatprep.subr.bf16.mxu1 %v5946_v54  ;;  %v784_v54 = vld [vmem:[#allocation5 + $0x538] sm:$0xff] }
 0x214   : > { %v5982_v56 = vpack.c.bf16 %v784_v54, %v778_v53 }
 0x216   : > { %5949 = vmatpush1.bf16.msra.mxu1 %v5948_v59  ;;  %v790_v59 = vld [vmem:[#allocation5 + $0x568] sm:$0xff] }
 0x217   : > { %5951 = vmatprep.subr.bf16.mxu1 %v5950_v60  ;;  %v796_v60 = vld [vmem:[#allocation5 + $0x598] sm:$0xff] }
 0x218   : > { %v5986_v62 = vpack.c.bf16 %v796_v60, %v790_v59  ;;  %v5994_v59 = vpack.c.bf16 %v1394_v58, %v1392_v57  ;;  %v1391_v60 = vld [vmem:[#allocation8 + $0x40] sm:$0xff]  ;;  %v1713_v57 = vld [vmem:[#allocation8 + $0x88] sm:$0xff]  ;;  %v1715_v58 = vld [vmem:[#allocation8 + $0x98] sm:$0xff] }
 0x21a   : > { %5953 = vmatpush1.bf16.msra.mxu1 %v5952_v1  ;;  %v802_v1 = vld [vmem:[#allocation5 + $0x5c8] sm:$0xff] }
 0x21b   : > { %5955 = vmatprep.subr.bf16.mxu1 %v5954_v2  ;;  %v808_v2 = vld [vmem:[#allocation5 + $0x5f8] sm:$0xff] }
 0x21c   : > { %v5990_v4 = vpack.c.bf16 %v808_v2, %v802_v1  ;;  %v1395_v1 = vld [vmem:[#allocation8 + $0x60] sm:$0xff]  ;;  %v5998_v2 = vpack.c.bf16 %v1398_v0, %v1396_v63  ;;  %v1714_v0 = vld [vmem:[#allocation8 + $0x90] sm:$0xff] }
 0x21d   : > { %v1712_v63 = vld [vmem:[#allocation8 + $0x80] sm:$0xff] }
 0x21e   : > { %5957 = vmatpush1.bf16.msra.mxu1 %v5956_v8 }
 0x298   : > { %v907_v6 = vpop.f32.mrb[0].mxu1 }
 0x299   : > { %v909_v7 = vpop.f32.mrb[1].mxu1  ;;  %v908_v16 = vadd.f32 %v907_v6, %v814_v41  ;;  %v706_v6 = vld [vmem:[#allocation5 + $0x2c8] sm:$0xff] }
 0x29a   : > { %v910_v23 = vadd.f32 %v909_v7, %v818_v17  ;;  %v712_v7 = vld [vmem:[#allocation5 + $0x2f8] sm:$0xff]  ;;  %v718_v17 = vld [vmem:[#allocation5 + $0x328] sm:$0xff] }
 0x29b   : > { %v8353_v22 = vmul.f32 0.17677669, %v908_v16  ;;  %v5958_v41 = vpack.c.bf16 %v712_v7, %v706_v6  ;;  %v711_v16 = vld [vmem:[#allocation5 + $0x2f0] sm:$0xff]  ;;  %v801_v6 = vld [vmem:[#allocation5 + $0x5c0] sm:$0xff] }
 0x29c   : > { %v8364_v25 = vmul.f32 0.17677669, %v910_v23  ;;  %v717_v23 = vld [vmem:[#allocation5 + $0x320] sm:$0xff]  ;;  %v807_v7 = vld [vmem:[#allocation5 + $0x5f0] sm:$0xff] }
 0x29d   : > { %5959 = vmatprep.subr.bf16.mxu1 %v5958_v41  ;;  %v5964_v29 = vpack.c.bf16 %v723_v26, %v717_v23  ;;  %v5992_v8 = vpack.c.bf16 %v807_v7, %v801_v6  ;;  %v1218_v6 = vld [vmem:[#allocation8 + $0x8] sm:$0xff]  ;;  %v1220_v7 = vld [vmem:[#allocation8 + $0x18] sm:$0xff] }
 0x2d8   : > { %v978_v18 = vpop.f32.mrb[2].mxu1 }
 0x2d9   : > { %v8345_v19 = vadd.f32 %v978_v18, %v822_v14  ;;  %v980_v21 = vpop.f32.mrb[3].mxu1  ;;  %v705_v14 = vld [vmem:[#allocation5 + $0x2c0] sm:$0xff]  ;;  %v724_v18 = vld [vmem:[#allocation5 + $0x358] sm:$0xff] }
 0x2da   : > { %v8356_v24 = vadd.f32 %v980_v21, %v826_v20  ;;  %v5960_v20 = vpack.c.bf16 %v711_v16, %v705_v14  ;;  %v5962_v21 = vpack.c.bf16 %v724_v18, %v718_v17 }
 0x2db   : > { %1227 = vrot.lane.b32.xlu1 %v8345_v19, %s7809_s24  ;;  %5723 = vmatpush3.xpose.msk.msra.mxu0 %vm1055_vm1, %v8345_v19 }
 0x2dc   : > { %5762 = vmatprep.subr.mxu0 %v7807_v5  ;;  %5961 = vmatpush1.bf16.msra.mxu1 %v5960_v20 }
 0x2dd   : > { %5963 = vmatprep.subr.bf16.mxu1 %v5962_v21 }
 0x2de   : > { %5725 = vmatmul.mubr.msk.f32.vlgmr.msra.gmra.mrb[0].mxu0 %vm1055_vm1, %v8353_v22 }
 0x2df   : > { %1225 = vrot.lane.b32.xlu1 %v8353_v22, %s7809_s24  ;;  %5763 = vmatpush3.xpose.msk.msra.mxu0 %vm1055_vm1, %v8356_v24 }
 0x2e0   : > { %5764 = vmatprep.mubr.msk.f32.mxu0 %vm7808_vm0, %v7807_v5  ;;  %5772 = vmatprep.subr.mxu0 %v7807_v5 }
 0x2e1   : > { %5965 = vmatpush1.bf16.msra.mxu1 %v5964_v29 }
 0x2e2   : > { %5765 = vmatmul.mubr.msk.f32.vlgmr.msra.gmra.mrb[2].mxu0 %vm1055_vm1, %v8364_v25  ;;  %5967 = vmatprep.subr.bf16.mxu1 %v5966_v30 }
 0x2e3   : > { %5774 = vmatprep.mubr.msk.f32.mxu0 %vm7808_vm0, %v7807_v5 }
 0x2e5   : > { %5969 = vmatpush1.bf16.msra.mxu1 %v5968_v35 }
 0x2e6   : > { %5971 = vmatprep.subr.bf16.mxu1 %v5970_v36 }
 0x2e9   : > { %5973 = vmatpush1.bf16.msra.mxu1 %v5972_v43 }
 0x2ea   : > { %5975 = vmatprep.subr.bf16.mxu1 %v5974_v44 }
 0x2ed   : > { %5977 = vmatpush1.bf16.msra.mxu1 %v5976_v49 }
 0x2ee   : > { %5979 = vmatprep.subr.bf16.mxu1 %v5978_v50 }
 0x2f1   : > { %5981 = vmatpush1.bf16.msra.mxu1 %v5980_v55 }
 0x2f2   : > { %5983 = vmatprep.subr.bf16.mxu1 %v5982_v56 }
 0x2f5   : > { %5985 = vmatpush1.bf16.msra.mxu1 %v5984_v61  ;;  %v1393_v61 = vld [vmem:[#allocation8 + $0x50] sm:$0xff] }
 0x2f6   : > { %5987 = vmatprep.subr.bf16.mxu1 %v5986_v62  ;;  %v5996_v62 = vpack.c.bf16 %v1393_v61, %v1391_v60  ;;  %v6010_v60 = vpack.c.bf16 %v1715_v58, %v1713_v57 }
 0x2f9   : > { %5989 = vmatpush1.bf16.msra.mxu1 %v5988_v3  ;;  %v1397_v3 = vld [vmem:[#allocation8 + $0x70] sm:$0xff] }
 0x2fa   : > { %5991 = vmatprep.subr.bf16.mxu1 %v5990_v4  ;;  %v6000_v4 = vpack.c.bf16 %v1397_v3, %v1395_v1  ;;  %v1719_v1 = vld [vmem:[#allocation8 + $0xb8] sm:$0xff] }
 0x2fd   : > { %5993 = vmatpush1.bf16.msra.mxu1 %v5992_v8  ;;  %v6002_v8 = vpack.c.bf16 %v1220_v7, %v1218_v6  ;;  %v1716_v7 = vld [vmem:[#allocation8 + $0xa0] sm:$0xff] }
 0x2fe   : > { %5727 = vmatprep.subr.mxu1 %v7807_v5 }
 0x300   : > { %1048 = vmatmul.mubr.f32.vlgmr.msra.gmra.mrb[4].mxu1 %v8314_v40  ;;  %v8382_v40 = vsub.s32 4, %v8323_v9 }
 0x301   : > { %5729 = vmatprep.mubr.msk.f32.mxu1 %vm7808_vm0, %v7807_v5 }
 0x302   : > { %v830_v28 = vrot.slane %v8328_v11, %v8382_v40 }
 0x34d   : > { %v1228_v34 = vpop.permute.xlu1 %1227 }
 0x351   : > { %v1226_v36 = vpop.permute.xlu1 %1225 }
 0x3b1   : > { %v1128_v41 = vpop.f32.mrb[0].mxu0 }
 0x3b2   : > { %v5726_v14 = vpop.f32.mrb[1].mxu0  ;;  %v1133_v16 = vsel %vm1132_vm2, %v1128_v41, -inf }
 0x3b3   : > { %1134 = vmax.xlane.f32.xlu0 %v1133_v16 }
 0x3b5   : > { %v8378_v17 = vpop.f32.mrb[2].mxu0 }
 0x3b6   : > { %v5766_v18 = vpop.f32.mrb[3].mxu0 }
 0x3b7   : > { %v1217_v18 = vld [vmem:[#allocation8] sm:$0xff] }
 0x3d3   : > { %v1049_v29 = vpop.f32.mrb[4].mxu1 }
 0x3d4   : > { %v8386_v30 = vadd.f32 %v1049_v29, %v830_v28  ;;  %v8388_v31 = vpop.f32.mrb[5].mxu1  ;;  %v1221_v28 = vld [vmem:[#allocation8 + $0x20] sm:$0xff]  ;;  %v1223_v29 = vld [vmem:[#allocation8 + $0x30] sm:$0xff] }
 0x3d6   : > { %5728 = vmatpush3.msra.mxu1 %v8386_v30 }
 0x3d7   : > { %5732 = vmatprep.subr.mxu1 %v7807_v5 }
 0x440   : > { %v1135_v20 = vpop.xlane.xlu0 %1134 }
 0x441   : > { %v1136_v21 = vsub.f32 %v1128_v41, %v1135_v20  ;;  %v1219_v20 = vld [vmem:[#allocation8 + $0x10] sm:$0xff] }
 0x443   : > { %v1137_v23 = vmul.f32 1.442695, %v1136_v21  ;;  %v1222_v21 = vld [vmem:[#allocation8 + $0x28] sm:$0xff] }
 0x445   : > { %7290 = vpow2.f32 %v1137_v23  ;;  %v1224_v23 = vld [vmem:[#allocation8 + $0x38] sm:$0xff] }
 0x44f   : > { %v7291_v26 = vpop.eup %7290 }
 0x450   : > { %v1139_v27 = vsel %vm1132_vm2, %v7291_v26, 0.0 }
 0x451   : > { %1140 = vadd.xlane.f32.xlu0 %v1139_v27  ;;  %v6006_v27 = vpack.c.bf16 %v1224_v23, %v1222_v21 }
 0x4de   : > { %v1141_v32 = vpop.xlane.xlu0 %1140 }
 0x4df   : > { %7292 = vrcp.f32 %v1141_v32 }
 0x4e9   : > { %v7293_v33 = vpop.eup %7292 }
 0x4ea   : > { %v1143_v35 = vmul.f32 %v7293_v33, %v7291_v26  ;;  %v6004_v26 = vpack.c.bf16 %v1219_v20, %v1217_v18 }
 0x4ec   : > { %5730 = vmatmul.mubr.msk.f32.vlgmr.msra.gmra.mrb[6].mxu1 %vm1132_vm2, %v1143_v35 }
 0x4ed   : > { %5733 = vmatpush3.xpose.msk.msra.mxu1 %vm1055_vm1, %v1228_v34  ;;  %5734 = vmatprep.mubr.msk.f32.mxu1 %vm7808_vm0, %v7807_v5  ;;  %v6008_v34 = vpack.c.bf16 %v1223_v29, %v1221_v28 }
 0x4ee   : > { %5737 = vmatprep.subr.mxu1 %v7807_v5 }
 0x4f0   : > { %5735 = vmatmul.mubr.msk.f32.vlgmr.msra.gmra.mrb[8].mxu1 %vm1055_vm1, %v1226_v36 }
 0x4f1   : > { %5739 = vmatprep.mubr.msk.f32.mxu1 %vm7808_vm0, %v7807_v5 }
 0x5bf   : > { %v8400_v37 = vpop.f32.mrb[6].mxu1 }
 0x5c0   : > { %v5731_v38 = vpop.f32.mrb[7].mxu1 }
 0x5c3   : > { %v1299_v39 = vpop.f32.mrb[8].mxu1 }
 0x5c4   : > { %v5736_v42 = vpop.f32.mrb[9].mxu1  ;;  %v1303_v43 = vsel %vm1132_vm2, %v1299_v39, -inf }
 0x5c5   : > { %1304 = vmax.xlane.f32.xlu0 %v1303_v43 }
 0x5db   : > { %1315 = vrot.lane.b32.xlu0 %v8386_v30, %s7809_s24 }
 0x5df   : > { %1549 = vrot.lane.b32.xlu0 %v8345_v19, %s7810_s23 }
 0x5e3   : > { %1547 = vrot.lane.b32.xlu0 %v8353_v22, %s7810_s23 }
 0x5e7   : > { %2292 = vrot.lane.b32.xlu0 %v8356_v24, %s7809_s24 }
 0x652   : > { %v1305_v44 = vpop.xlane.xlu0 %1304 }
 0x653   : > { %v1306_v45 = vsub.f32 %v1299_v39, %v1305_v44 }
 0x655   : > { %v1307_v46 = vmul.f32 1.442695, %v1306_v45 }
 0x656   : > { %v1316_v47 = vpop.permute.xlu0 %1315 }
 0x657   : > { %7294 = vpow2.f32 %v1307_v46  ;;  %5738 = vmatpush3.msra.mxu1 %v1316_v47 }
 0x658   : > { %5995 = vmatprep.subr.bf16.mxu1 %v5994_v59 }
 0x65a   : > { %v1550_v48 = vpop.permute.xlu0 %1549 }
 0x65e   : > { %v1548_v49 = vpop.permute.xlu0 %1547 }
 0x661   : > { %v7295_v50 = vpop.eup %7294 }
 0x662   : > { %v2293_v51 = vpop.permute.xlu0 %2292  ;;  %v1309_v52 = vsel %vm1132_vm2, %v7295_v50, 0.0 }
 0x663   : > { %1310 = vadd.xlane.f32.xlu1 %v1309_v52  ;;  %5773 = vmatpush3.xpose.msk.msra.mxu0 %vm1055_vm1, %v2293_v51 }
 0x664   : > { %5777 = vmatprep.subr.mxu0 %v7807_v5 }
 0x674   : > { %2290 = vrot.lane.b32.xlu1 %v8364_v25, %s7809_s24 }
 0x6f0   : > { %v1311_v53 = vpop.xlane.xlu1 %1310 }
 0x6f1   : > { %7296 = vrcp.f32 %v1311_v53 }
 0x6f4   : > { %v2291_v54 = vpop.permute.xlu1 %2290 }
 0x6f5   : > { %5775 = vmatmul.mubr.msk.f32.vlgmr.msra.gmra.mrb[4].mxu0 %vm1055_vm1, %v2291_v54 }
 0x6f6   : > { %5779 = vmatprep.mubr.msk.f32.mxu0 %vm7808_vm0, %v7807_v5 }
 0x6fb   : > { %v7297_v55 = vpop.eup %7296 }
 0x6fc   : > { %v1313_v56 = vmul.f32 %v7297_v55, %v7295_v50 }
 0x6fe   : > { %5740 = vmatmul.mubr.msk.f32.vlgmr.msra.gmra.mrb[10].mxu1 %vm1132_vm2, %v1313_v56 }
 0x6ff   : > { %1466 = vmatprep.mubr.f32.mxu1 %v7807_v5  ;;  %5997 = vmatpush1.bf16.msra.mxu1 %v5996_v62 }
 0x700   : > { %5999 = vmatprep.subr.bf16.mxu1 %v5998_v2  ;;  %v6012_v2 = vpack.c.bf16 %v1714_v0, %v1712_v63  ;;  %v1964_v0 = vld [vmem:[#allocation8 + $0xd8] sm:$0xff] }
 0x703   : > { %6001 = vmatpush1.bf16.msra.mxu1 %v6000_v4 }
 0x704   : > { %6003 = vmatprep.subr.bf16.mxu1 %v6002_v8  ;;  %v1718_v8 = vld [vmem:[#allocation8 + $0xb0] sm:$0xff] }
 0x7c8   : > { %v2364_v41 = vpop.f32.mrb[4].mxu0 }
 0x7c9   : > { %v5776_v14 = vpop.f32.mrb[5].mxu0  ;;  %v2368_v16 = vsel %vm1132_vm2, %v2364_v41, -inf }
 0x7ca   : > { %2369 = vmax.xlane.f32.xlu1 %v2368_v16 }
 0x7d1   : > { %v1387_v32 = vpop.f32.mrb[10].mxu1 }
 0x7d2   : > { %v5741_v33 = vpop.f32.mrb[11].mxu1  ;;  %5657 = vmatmul.mubr.msk.f32.vlgmr.msra.gmra.mrb[12].mxu1 %vm1055_vm1, %v1387_v32 }
 0x7d3   : > { %6005 = vmatpush1.bf16.msra.mxu1 %v6004_v26  ;;  %1540 = vmatprep.mubr.f32.mxu1 %v7807_v5 }
 0x7d4   : > { %6007 = vmatprep.subr.bf16.mxu1 %v6006_v27 }
 0x7d7   : > { %6009 = vmatpush1.bf16.msra.mxu1 %v6008_v34 }
 0x7d8   : > { %5742 = vmatprep.subr.mxu1 %v7807_v5 }
 0x7da   : > { %5658 = vmatmul.mubr.msk.f32.vlgmr.msra.gmra.mrb[12].mxu1 %vm1055_vm1, %v8400_v37  ;;  %v8436_v37 = vsub.s32 5, %v8323_v9 }
 0x7db   : > { %5744 = vmatprep.mubr.msk.f32.mxu1 %vm7808_vm0, %v7807_v5 }
 0x7dc   : > { %v834_v43 = vrot.slane %v8328_v11, %v8436_v37 }
 0x7de   : > { %v8441_v44 = vadd.f32 %v8388_v31, %v834_v43 }
 0x7e0   : > { %5743 = vmatpush3.xpose.msk.msra.mxu1 %vm1055_vm1, %v1550_v48 }
 0x7e1   : > { %5747 = vmatprep.subr.mxu1 %v7807_v5 }
 0x7e3   : > { %5745 = vmatmul.mubr.msk.f32.vlgmr.msra.gmra.mrb[14].mxu1 %vm1055_vm1, %v1548_v49 }
 0x7e4   : > { %5749 = vmatprep.mubr.msk.f32.mxu1 %vm7808_vm0, %v7807_v5 }
 0x857   : > { %v2370_v35 = vpop.xlane.xlu1 %2369 }
 0x858   : > { %v2371_v36 = vsub.f32 %v2364_v41, %v2370_v35  ;;  %v6016_v41 = vpack.c.bf16 %v1718_v8, %v1716_v7  ;;  %v1965_v7 = vld [vmem:[#allocation8 + $0xe0] sm:$0xff]  ;;  %v1967_v8 = vld [vmem:[#allocation8 + $0xf0] sm:$0xff] }
 0x85a   : > { %v2372_v38 = vmul.f32 1.442695, %v2371_v36 }
 0x85c   : > { %7298 = vpow2.f32 %v2372_v38 }
 0x866   : > { %v7299_v39 = vpop.eup %7298 }
 0x867   : > { %v2374_v42 = vsel %vm1132_vm2, %v7299_v39, 0.0 }
 0x868   : > { %2375 = vadd.xlane.f32.xlu1 %v2374_v42 }
 0x879   : > { %2380 = vrot.lane.b32.xlu1 %v8441_v44, %s7809_s24  ;;  %s8649_s24 = scalar_lea.hbm %s8758_s25, %s5689_s14 }
 0x8b6   : > { %v1621_v45 = vpop.f32.mrb[14].mxu1 }
 0x8b7   : > { %v5746_v46 = vpop.f32.mrb[15].mxu1  ;;  %v1625_v47 = vsel %vm1132_vm2, %v1621_v45, -inf }
 0x8b8   : > { %1626 = vmax.xlane.f32.xlu0 %v1625_v47 }
 0x8f5   : > { %v2376_v48 = vpop.xlane.xlu1 %2375 }
 0x8f6   : > { %7300 = vrcp.f32 %v2376_v48 }
 0x8f9   : > { %v2381_v49 = vpop.permute.xlu1 %2380 }
 0x8fa   : > { %5778 = vmatpush3.msra.mxu0 %v2381_v49 }
 0x8fb   : > { %5782 = vmatprep.subr.mxu0 %v7807_v5 }
 0x900   : > { %v7301_v50 = vpop.eup %7300 }
 0x901   : > { %v2378_v51 = vmul.f32 %v7301_v50, %v7299_v39 }
 0x903   : > { %5780 = vmatmul.mubr.msk.f32.vlgmr.msra.gmra.mrb[6].mxu0 %vm1132_vm2, %v2378_v51  ;;  %v2122_v51 = vsel %vm1132_vm2, %v8378_v17, -inf }
 0x904   : > { %5784 = vmatprep.mubr.msk.f32.mxu0 %vm7808_vm0, %v7807_v5 }
 0x945   : > { %v1627_v11 = vpop.xlane.xlu0 %1626 }
 0x946   : > { %v1628_v31 = vsub.f32 %v1621_v45, %v1627_v11 }
 0x948   : > { %v1629_v52 = vmul.f32 1.442695, %v1628_v31 }
 0x94a   : > { %7302 = vpow2.f32 %v1629_v52 }
 0x954   : > { %v7303_v53 = vpop.eup %7302 }
 0x955   : > { %v1631_v54 = vsel %vm1132_vm2, %v7303_v53, 0.0 }
 0x956   : > { %1632 = vadd.xlane.f32.xlu0 %v1631_v54 }
 0x96c   : > { %1636 = vrot.lane.b32.xlu0 %v8386_v30, %s7810_s23 }
 0x970   : > { %2542 = vrot.lane.b32.xlu0 %v8356_v24, %s7810_s23 }
 0x974   : > { %2540 = vrot.lane.b32.xlu0 %v8364_v25, %s7810_s23 }
 0x978   : > { %1798 = vrot.lane.b32.xlu0 %v8345_v19, %s7811_s18  ;;  %v1717_v19 = vld [vmem:[#allocation8 + $0xa8] sm:$0xff] }
 0x979   : > { %v6014_v6 = vpack.c.bf16 %v1719_v1, %v1717_v19  ;;  %v1961_v19 = vld [vmem:[#allocation8 + $0xc0] sm:$0xff] }
 0x97c   : > { %1796 = vrot.lane.b32.xlu0 %v8353_v22, %s7811_s18 }
 0x9d6   : > { %v8461_v55 = vpop.f32.mrb[6].mxu0 }
 0x9d7   : > { %v5781_v56 = vpop.f32.mrb[7].mxu0 }
 0x9e3   : > { %v1633_v59 = vpop.xlane.xlu0 %1632 }
 0x9e4   : > { %7304 = vrcp.f32 %v1633_v59 }
 0x9e7   : > { %v1637_v61 = vpop.permute.xlu0 %1636 }
 0x9e8   : > { %5748 = vmatpush3.msra.mxu1 %v1637_v61 }
 0x9e9   : > { %6011 = vmatprep.subr.bf16.mxu1 %v6010_v60 }
 0x9eb   : > { %v2543_v62 = vpop.permute.xlu0 %2542 }
 0x9ec   : > { %5783 = vmatpush3.xpose.msk.msra.mxu0 %vm1055_vm1, %v2543_v62 }
 0x9ed   : > { %5787 = vmatprep.subr.mxu0 %v7807_v5 }
 0x9ee   : > { %v7305_v22 = vpop.eup %7304 }
 0x9ef   : > { %v1635_v3 = vmul.f32 %v7305_v22, %v7303_v53  ;;  %v2541_v4 = vpop.permute.xlu0 %2540  ;;  %v1963_v22 = vld [vmem:[#allocation8 + $0xd0] sm:$0xff] }
 0x9f0   : > { %5785 = vmatmul.mubr.msk.f32.vlgmr.msra.gmra.mrb[8].mxu0 %vm1055_vm1, %v2541_v4  ;;  %v6020_v4 = vpack.c.bf16 %v1963_v22, %v1961_v19  ;;  %v2710_v19 = vld [vmem:[#allocation8 + $0x1a8] sm:$0xff] }
 0x9f1   : > { %5750 = vmatmul.mubr.msk.f32.vlgmr.msra.gmra.mrb[16].mxu1 %vm1132_vm2, %v1635_v3  ;;  %5789 = vmatprep.mubr.msk.f32.mxu0 %vm7808_vm0, %v7807_v5  ;;  %v1968_v3 = vld [vmem:[#allocation8 + $0xf8] sm:$0xff] }
 0x9f2   : > { %6013 = vmatpush1.bf16.msra.mxu1 %v6012_v2  ;;  %1787 = vmatprep.mubr.f32.mxu1 %v7807_v5  ;;  %v1966_v2 = vld [vmem:[#allocation8 + $0xe8] sm:$0xff] }
 0x9f3   : > { %6015 = vmatprep.subr.bf16.mxu1 %v6014_v6  ;;  %v1799_v14 = vpop.permute.xlu0 %1798  ;;  %v6022_v6 = vpack.c.bf16 %v1968_v3, %v1966_v2  ;;  %v2709_v3 = vld [vmem:[#allocation8 + $0x1a0] sm:$0xff] }
 0x9f6   : > { %6017 = vmatpush1.bf16.msra.mxu1 %v6016_v41  ;;  %v6024_v41 = vpack.c.bf16 %v1967_v8, %v1965_v7  ;;  %v2957_v7 = vld [vmem:[#allocation8 + $0x1d8] sm:$0xff] }
 0x9f7   : > { %5752 = vmatprep.subr.mxu1 %v7807_v5  ;;  %v1797_v26 = vpop.permute.xlu0 %1796 }
 0xac3   : > { %v2614_v16 = vpop.f32.mrb[8].mxu0 }
 0xac4   : > { %v1708_v18 = vpop.f32.mrb[16].mxu1  ;;  %v5786_v20 = vpop.f32.mrb[9].mxu0  ;;  %v2618_v21 = vsel %vm1132_vm2, %v2614_v16, -inf }
 0xac5   : > { %v5751_v23 = vpop.f32.mrb[17].mxu1  ;;  %5662 = vmatmul.mubr.msk.f32.vlgmr.msra.gmra.mrb[12].mxu1 %vm1055_vm1, %v1708_v18  ;;  %2619 = vmax.xlane.f32.xlu1 %v2618_v21 }
 0xac6   : > { %5753 = vmatpush3.xpose.msk.msra.mxu1 %vm1055_vm1, %v1799_v14  ;;  %5754 = vmatprep.mubr.msk.f32.mxu1 %vm7808_vm0, %v7807_v5 }
 0xac7   : > { %5757 = vmatprep.subr.mxu1 %v7807_v5 }
 0xac9   : > { %5755 = vmatmul.mubr.msk.f32.vlgmr.msra.gmra.mrb[18].mxu1 %vm1055_vm1, %v1797_v26  ;;  %v2207_v26 = vld [vmem:[#allocation8 + $0x108] sm:$0xff] }
 0xaca   : > { %5759 = vmatprep.mubr.msk.f32.mxu1 %vm7808_vm0, %v7807_v5 }
 0xad6   : > { %2791 = vrot.lane.b32.xlu1 %v8356_v24, %s7811_s18 }
 0xada   : > { %2789 = vrot.lane.b32.xlu1 %v8364_v25, %s7811_s18 }
 0xb52   : > { %v2620_v27 = vpop.xlane.xlu1 %2619 }
 0xb53   : > { %v2621_v28 = vsub.f32 %v2614_v16, %v2620_v27  ;;  %v2209_v27 = vld [vmem:[#allocation8 + $0x118] sm:$0xff] }
 0xb55   : > { %v2622_v29 = vmul.f32 1.442695, %v2621_v28  ;;  %v6026_v28 = vpack.c.bf16 %v2209_v27, %v2207_v26  ;;  %v2958_v26 = vld [vmem:[#allocation8 + $0x1e0] sm:$0xff]  ;;  %v2960_v27 = vld [vmem:[#allocation8 + $0x1f0] sm:$0xff] }
 0xb56   : > { %v2792_v39 = vpop.permute.xlu1 %2791 }
 0xb57   : > { %7306 = vpow2.f32 %v2622_v29  ;;  %v2206_v29 = vld [vmem:[#allocation8 + $0x100] sm:$0xff] }
 0xb61   : > { %v7307_v32 = vpop.eup %7306 }
 0xb62   : > { %v2624_v33 = vsel %vm1132_vm2, %v7307_v32, 0.0 }
 0xb63   : > { %2625 = vadd.xlane.f32.xlu0 %v2624_v33 }
 0xb79   : > { %2629 = vrot.lane.b32.xlu0 %v8441_v44, %s7810_s23  ;;  %s7696_s23 = scalar_lea.vmem %s8651_s30, 256 }
 0xb7a   : > { %p7697_p13 = scmp.ne.s32.totalorder %s8651_s30, %s7696_s23 }
 0xb7c   : > { %p7698_p7 = pnand %p7697_p13, %p8760_p1 }
 0xb7e   : > { %p7699_p9 = pneg %p7698_p7 }
 0xb9c   : > { %v1870_v34 = vpop.f32.mrb[18].mxu1 }
 0xb9d   : > { %v5756_v35 = vpop.f32.mrb[19].mxu1  ;;  %v1874_v36 = vsel %vm1132_vm2, %v1870_v34, -inf }
 0xb9e   : > { %1875 = vmax.xlane.f32.xlu0 %v1874_v36  ;;  %v2211_v35 = vld [vmem:[#allocation8 + $0x128] sm:$0xff]  ;;  %v2213_v36 = vld [vmem:[#allocation8 + $0x138] sm:$0xff] }
 0xbb4   : > { %1885 = vrot.lane.b32.xlu0 %v8386_v30, %s7811_s18  ;;  %v2790_v30 = vpop.permute.xlu1 %2789 }
 0xbb8   : > { %2878 = vrot.lane.b32.xlu0 %v8441_v44, %s7811_s18  ;;  %s7700_s18 = sshll.u32 %s7812_s0, 4  ;;  %s7701_s18 = int_to_ptr.vmem [resolvable:$false] %s7700_s18 }
 0xbb9   : > { %s7702_s3 = scalar_lea.vmem %s7701_s18, 512  ;;  %p7703_p4 = scmp.lt.s32.totalorder %s8651_s30, %s7701_s18 }
 0xbba   : > { %p7704_p8 = scmp.lt.s32.totalorder %s7702_s3, %s7696_s23 }
 0xbbc   : > { %p7705_p0 = por %p7704_p8, %p7703_p4 }
 0xbbe   : > { %p7706_p2 = pnand %p7705_p0, %p7699_p9 }
 0xbf0   : > { %v2626_v24 = vpop.xlane.xlu0 %2625 }
 0xbf1   : > { %7308 = vrcp.f32 %v2626_v24 }
 0xbf4   : > { %v2630_v25 = vpop.permute.xlu0 %2629 }
 0xbf5   : > { %5788 = vmatpush3.msra.mxu0 %v2630_v25 }
 0xbf6   : > { %5792 = vmatprep.subr.mxu0 %v7807_v5 }
 0xbfb   : > { %v7309_v38 = vpop.eup %7308 }
 0xbfc   : > { %v2628_v42 = vmul.f32 %v7309_v38, %v7307_v32  ;;  %v2208_v32 = vld [vmem:[#allocation8 + $0x110] sm:$0xff] }
 0xbfd   : > { %v6028_v25 = vpack.c.bf16 %v2208_v32, %v2206_v29  ;;  %v3040_v32 = vld [vmem:[#allocation10] sm:$0x3] }
 0xbfe   : > { %5790 = vmatmul.mubr.msk.f32.vlgmr.msra.gmra.mrb[10].mxu0 %vm1132_vm2, %v2628_v42  ;;  %v2210_v42 = vld [vmem:[#allocation8 + $0x120] sm:$0xff] }
 0xbff   : > { %5793 = vmatpush3.xpose.msk.msra.mxu0 %vm1055_vm1, %v2792_v39  ;;  %5794 = vmatprep.mubr.msk.f32.mxu0 %vm7808_vm0, %v7807_v5  ;;  %v6030_v39 = vpack.c.bf16 %v2213_v36, %v2211_v35  ;;  %v3049_v35 = vrot.slane %v3040_v32, %v8336_v13  ;;  %v7326_v36 = vld [vmem:[%s8279_s13] sm:$0xff] }
 0xc00   : > { %5797 = vmatprep.subr.mxu0 %v7807_v5 }
 0xc02   : > { %5795 = vmatmul.mubr.msk.f32.vlgmr.msra.gmra.mrb[12].mxu0 %vm1055_vm1, %v2790_v30  ;;  %v2212_v30 = vld [vmem:[#allocation8 + $0x130] sm:$0xff] }
 0xc03   : > { %5799 = vmatprep.mubr.msk.f32.mxu0 %vm7808_vm0, %v7807_v5 }
 0xc2b   : > { %v1876_v43 = vpop.xlane.xlu0 %1875 }
 0xc2c   : > { %v1877_v45 = vsub.f32 %v1870_v34, %v1876_v43  ;;  %v6032_v43 = vpack.c.bf16 %v2212_v30, %v2210_v42  ;;  %v3100_v30 = vld [vmem:[#allocation14 + $0x8] sm:$0xff] }
 0xc2e   : > { %v1878_v46 = vmul.f32 1.442695, %v1877_v45  ;;  %v2457_v45 = vld [vmem:[#allocation8 + $0x148] sm:$0xff] }
 0xc2f   : > { %v1886_v47 = vpop.permute.xlu0 %1885 }
 0xc30   : > { %7310 = vpow2.f32 %v1878_v46  ;;  %5758 = vmatpush3.msra.mxu1 %v1886_v47  ;;  %v2459_v46 = vld [vmem:[#allocation8 + $0x158] sm:$0xff] }
 0xc31   : > { %v6034_v47 = vpack.c.bf16 %v2459_v46, %v2457_v45  ;;  %v3108_v45 = vld [vmem:[#allocation14 + $0x48] sm:$0xff] }
 0xc33   : > { %v2879_v48 = vpop.permute.xlu0 %2878 }
 0xc34   : > { %5798 = vmatpush3.msra.mxu0 %v2879_v48 }
 0xc3a   : > { %v7311_v49 = vpop.eup %7310 }
 0xc3b   : > { %v1880_v50 = vsel %vm1132_vm2, %v7311_v49, 0.0 }
 0xc3c   : > { %1881 = vadd.xlane.f32.xlu1 %v1880_v50  ;;  %v2456_v50 = vld [vmem:[#allocation8 + $0x140] sm:$0xff] }
 0xc40   : > { %2123 = vmax.xlane.f32.xlu1 %v2122_v51  ;;  %v2458_v51 = vld [vmem:[#allocation8 + $0x150] sm:$0xff] }
 0xcc9   : > { %v1882_v11 = vpop.xlane.xlu1 %1881 }
 0xcca   : > { %7312 = vrcp.f32 %v1882_v11  ;;  %v2461_v11 = vld [vmem:[#allocation8 + $0x168] sm:$0xff] }
 0xccd   : > { %v2124_v31 = vpop.xlane.xlu1 %2123 }
 0xcce   : > { %v2125_v52 = vsub.f32 %v8378_v17, %v2124_v31  ;;  %v1962_v17 = vld [vmem:[#allocation8 + $0xc8] sm:$0xff]  ;;  %v2463_v31 = vld [vmem:[#allocation8 + $0x178] sm:$0xff] }
 0xccf   : > { %v6018_v1 = vpack.c.bf16 %v1964_v0, %v1962_v17  ;;  %v2705_v17 = vld [vmem:[#allocation8 + $0x180] sm:$0xff]  ;;  %v2707_v0 = vld [vmem:[#allocation8 + $0x190] sm:$0xff] }
 0xcd0   : > { %v2126_v53 = vmul.f32 1.442695, %v2125_v52  ;;  %v6036_v52 = vpack.c.bf16 %v2458_v51, %v2456_v50  ;;  %v6044_v22 = vpack.c.bf16 %v2707_v0, %v2705_v17  ;;  %v3107_v51 = vld [vmem:[#allocation14 + $0x40] sm:$0xff]  ;;  %v3164_v0 = vld [vmem:[#allocation14 + $0x208] sm:$0xff] }
 0xcd1   : > { %v8505_v54 = vpop.f32.mrb[10].mxu0  ;;  %6019 = vmatprep.subr.bf16.mxu1 %v6018_v1  ;;  %v2712_v1 = vld [vmem:[#allocation8 + $0x1b8] sm:$0xff]  ;;  %v3155_v17 = vld [vmem:[#allocation14 + $0x1c0] sm:$0xff] }
 0xcd2   : > { %7314 = vpow2.f32 %v2126_v53  ;;  %v5791_v56 = vpop.f32.mrb[11].mxu0  ;;  %v6038_v53 = vpack.c.bf16 %v2463_v31, %v2461_v11  ;;  %v6046_v2 = vpack.c.bf16 %v2712_v1, %v2710_v19  ;;  %v3123_v11 = vld [vmem:[#allocation14 + $0xc0] sm:$0xff]  ;;  %v3132_v31 = vld [vmem:[#allocation14 + $0x108] sm:$0xff] }
 0xcd3   : > { %v2460_v56 = vld [vmem:[#allocation8 + $0x160] sm:$0xff]  ;;  %v3180_v19 = vld [vmem:[#allocation14 + $0x288] sm:$0xff] }
 0xcd4   : > { %v7313_v57 = vpop.eup %7312 }
 0xcd5   : > { %v1884_v58 = vmul.f32 %v7313_v57, %v7311_v49  ;;  %v2863_v59 = vpop.f32.mrb[12].mxu0  ;;  %v2462_v57 = vld [vmem:[#allocation8 + $0x170] sm:$0xff] }
 0xcd6   : > { %v5796_v60 = vpop.f32.mrb[13].mxu0  ;;  %v2867_v61 = vsel %vm1132_vm2, %v2863_v59, -inf }
 0xcd7   : > { %5760 = vmatmul.mubr.msk.f32.vlgmr.msra.gmra.mrb[20].mxu1 %vm1132_vm2, %v1884_v58  ;;  %2868 = vmax.xlane.f32.xlu1 %v2867_v61  ;;  %v2708_v60 = vld [vmem:[#allocation8 + $0x198] sm:$0xff] }
 0xcd8   : > { %2036 = vmatprep.mubr.f32.mxu1 %v7807_v5  ;;  %6021 = vmatpush1.bf16.msra.mxu1 %v6020_v4  ;;  %v2711_v4 = vld [vmem:[#allocation8 + $0x1b0] sm:$0xff] }
 0xcd9   : > { %6023 = vmatprep.subr.bf16.mxu1 %v6022_v6  ;;  %v2955_v6 = vld [vmem:[#allocation8 + $0x1c8] sm:$0xff]  ;;  %v6048_v8 = vpack.c.bf16 %v2711_v4, %v2709_v3 }
 0xcda   : > { %v3188_v3 = vld [vmem:[#allocation14 + $0x2c8] sm:$0xff]  ;;  %v3163_v4 = vld [vmem:[#allocation14 + $0x200] sm:$0xff] }
 0xcdc   : > { %v7315_v62 = vpop.eup %7314  ;;  %6025 = vmatpush1.bf16.msra.mxu1 %v6024_v41  ;;  %v6050_v41 = vpack.c.bf16 %v2957_v7, %v2955_v6  ;;  %v3179_v7 = vld [vmem:[#allocation14 + $0x280] sm:$0xff] }
 0xcdd   : > { %v2128_v63 = vsel %vm1132_vm2, %v7315_v62, 0.0  ;;  %5767 = vmatprep.subr.mxu1 %v7807_v5 }
 0xcde   : > { %2129 = vadd.xlane.f32.xlu1 %v2128_v63 }
 0xd64   : > { %v2869_v14 = vpop.xlane.xlu1 %2868 }
 0xd65   : > { %v2870_v16 = vsub.f32 %v2863_v59, %v2869_v14  ;;  %v2706_v59 = vld [vmem:[#allocation8 + $0x188] sm:$0xff]  ;;  %v2954_v14 = vld [vmem:[#allocation8 + $0x1c0] sm:$0xff] }
 0xd66   : > { %v6042_v63 = vpack.c.bf16 %v2708_v60, %v2706_v59  ;;  %v3131_v60 = vld [vmem:[#allocation14 + $0x100] sm:$0xff] }
 0xd67   : > { %v2871_v18 = vmul.f32 1.442695, %v2870_v16  ;;  %v2956_v16 = vld [vmem:[#allocation8 + $0x1d0] sm:$0xff] }
 0xd69   : > { %7316 = vpow2.f32 %v2871_v18  ;;  %v2959_v18 = vld [vmem:[#allocation8 + $0x1e8] sm:$0xff] }
 0xd6b   : > { %v2130_v23 = vpop.xlane.xlu1 %2129 }
 0xd6c   : > { %7318 = vrcp.f32 %v2130_v23 }
 0xd73   : > { %v7317_v20 = vpop.eup %7316 }
 0xd74   : > { %v2873_v21 = vsel %vm1132_vm2, %v7317_v20, 0.0 }
 0xd75   : > { %2874 = vadd.xlane.f32.xlu1 %v2873_v21  ;;  %v6052_v21 = vpack.c.bf16 %v2956_v16, %v2954_v14  ;;  %v6068_v14 = vpack.c.bf16 %v3179_v7, %v3163_v4  ;;  %v3196_v16 = vld [vmem:[#allocation14 + $0x308] sm:$0xff] }
 0xd76   : > { %v7319_v33 = vpop.eup %7318  ;;  %v3332_v4 = vld [vmem:[#allocation14 + $0x748] sm:$0xff] }
 0xd77   : > { %v2132_v38 = vmul.f32 %v7319_v33, %v7315_v62  ;;  %v6040_v62 = vpack.c.bf16 %v2462_v57, %v2460_v56  ;;  %v3045_v33 = vrot.slane %v3040_v32, %v8326_v10  ;;  %v3140_v56 = vld [vmem:[#allocation14 + $0x148] sm:$0xff]  ;;  %v3219_v32 = vld [vmem:[#allocation14 + $0x3c0] sm:$0xff] }
 0xd78   : > { %v3156_v57 = vld [vmem:[#allocation14 + $0x1c8] sm:$0xff] }
 0xd79   : > { %v6318_v59 = vpack.c.bf16 %v3156_v57, %v3140_v56  ;;  %v3283_v56 = vld [vmem:[#allocation14 + $0x5c0] sm:$0xff]  ;;  %v3292_v57 = vld [vmem:[#allocation14 + $0x608] sm:$0xff] }
 0xdaa   : > { %v1957_v34 = vpop.f32.mrb[20].mxu1 }
 0xdab   : > { %v5761_v24 = vpop.f32.mrb[21].mxu1  ;;  %5666 = vmatmul.mubr.msk.f32.vlgmr.msra.gmra.mrb[12].mxu1 %vm1055_vm1, %v1957_v34 }
 0xdac   : > { %5768 = vmatpush3.msra.mxu1 %v8441_v44  ;;  %5769 = vmatprep.mubr.msk.f32.mxu1 %vm7808_vm0, %v7807_v5 }
 0xdad   : > { %6027 = vmatprep.subr.bf16.mxu1 %v6026_v28 }
 0xdaf   : > { %5770 = vmatmul.mubr.msk.f32.vlgmr.msra.gmra.mrb[22].mxu1 %vm1132_vm2, %v2132_v38 }
 0xdb0   : > { %6029 = vmatpush1.bf16.msra.mxu1 %v6028_v25  ;;  %2281 = vmatprep.mubr.f32.mxu1 %v7807_v5  ;;  %v7327_v25 = vld [vmem:[%s8279_s13 + $0x8] sm:$0xff]  ;;  %s8759_s13 = smov %s8758_s25 }
 0xdb1   : > { %6031 = vmatprep.subr.bf16.mxu1 %v6030_v39 }
 0xdb4   : > { %6033 = vmatpush1.bf16.msra.mxu1 %v6032_v43  ;;  %v3116_v43 = vld [vmem:[#allocation14 + $0x88] sm:$0xff] }
 0xdb5   : > { %6035 = vmatprep.subr.bf16.mxu1 %v6034_v47  ;;  %v6058_v46 = vpack.c.bf16 %v3116_v43, %v3100_v30  ;;  %v3099_v47 = vld [vmem:[#allocation14] sm:$0xff] }
 0xdb6   : > { %v3235_v30 = vld [vmem:[#allocation14 + $0x440] sm:$0xff] }
 0xe02   : > { %v2875_v44 = vpop.xlane.xlu1 %2874 }
 0xe03   : > { %7320 = vrcp.f32 %v2875_v44  ;;  %v3124_v44 = vld [vmem:[#allocation14 + $0xc8] sm:$0xff] }
 0xe0d   : > { %v7321_v48 = vpop.eup %7320 }
 0xe0e   : > { %v2877_v49 = vmul.f32 %v7321_v48, %v7317_v20  ;;  %v2961_v20 = vld [vmem:[#allocation8 + $0x1f8] sm:$0xff]  ;;  %v3115_v48 = vld [vmem:[#allocation14 + $0x80] sm:$0xff] }
 0xe0f   : > { %v6054_v23 = vpack.c.bf16 %v2961_v20, %v2959_v18  ;;  %v6060_v50 = vpack.c.bf16 %v3115_v48, %v3099_v47  ;;  %v3212_v18 = vld [vmem:[#allocation14 + $0x388] sm:$0xff] }
 0xe10   : > { %5800 = vmatmul.mubr.msk.f32.vlgmr.msra.gmra.mrb[14].mxu0 %vm1132_vm2, %v2877_v49  ;;  %v6314_v49 = vpack.c.bf16 %v3124_v44, %v3108_v45  ;;  %v3204_v20 = vld [vmem:[#allocation14 + $0x348] sm:$0xff]  ;;  %v3251_v45 = vld [vmem:[#allocation14 + $0x4c0] sm:$0xff] }
 0xe11   : > { %v3276_v44 = vld [vmem:[#allocation14 + $0x588] sm:$0xff] }
 0xe12   : > { %6315 = vmatprep.subr.bf16.mxu0 %v6314_v49  ;;  %v3268_v47 = vld [vmem:[#allocation14 + $0x548] sm:$0xff] }
 0xe13   : > { %v3284_v48 = vld [vmem:[#allocation14 + $0x5c8] sm:$0xff] }
 0xe82   : > { %v2202_v58 = vpop.f32.mrb[22].mxu1 }
 0xe83   : > { %v5771_v61 = vpop.f32.mrb[23].mxu1  ;;  %5670 = vmatmul.mubr.msk.f32.vlgmr.msra.gmra.mrb[12].mxu1 %vm1055_vm1, %v2202_v58 }
 0xe84   : > { %6037 = vmatpush1.bf16.msra.mxu1 %v6036_v52  ;;  %2531 = vmatprep.mubr.f32.mxu1 %v7807_v5  ;;  %v6316_v52 = vpack.c.bf16 %v3123_v11, %v3107_v51  ;;  %v3147_v61 = vld [vmem:[#allocation14 + $0x180] sm:$0xff] }
 0xe85   : > { %6039 = vmatprep.subr.bf16.mxu1 %v6038_v53  ;;  %v3148_v53 = vld [vmem:[#allocation14 + $0x188] sm:$0xff]  ;;  %v3259_v11 = vld [vmem:[#allocation14 + $0x500] sm:$0xff] }
 0xe86   : > { %v6062_v58 = vpack.c.bf16 %v3148_v53, %v3132_v31  ;;  %6317 = vmatpush1.bf16.msra.mxu0 %v6316_v52  ;;  %v3275_v31 = vld [vmem:[#allocation14 + $0x580] sm:$0xff]  ;;  %v6334_v53 = vpack.c.bf16 %v3284_v48, %v3268_v47 }
 0xe87   : > { %6319 = vmatprep.subr.bf16.mxu0 %v6318_v59  ;;  %v3267_v52 = vld [vmem:[#allocation14 + $0x540] sm:$0xff]  ;;  %v3300_v59 = vld [vmem:[#allocation14 + $0x648] sm:$0xff] }
 0xe88   : > { %6041 = vmatpush1.bf16.msra.mxu1 %v6040_v62  ;;  %v3139_v62 = vld [vmem:[#allocation14 + $0x140] sm:$0xff] }
 0xe89   : > { %6043 = vmatprep.subr.bf16.mxu1 %v6042_v63  ;;  %v6064_v63 = vpack.c.bf16 %v3147_v61, %v3131_v60  ;;  %v6320_v1 = vpack.c.bf16 %v3155_v17, %v3139_v62  ;;  %v3316_v60 = vld [vmem:[#allocation14 + $0x6c8] sm:$0xff]  ;;  %v6080_v61 = vpack.c.bf16 %v3275_v31, %v3259_v11  ;;  %v6336_v62 = vpack.c.bf16 %v3283_v56, %v3267_v52  ;;  %v3291_v17 = vld [vmem:[#allocation14 + $0x600] sm:$0xff] }
 0xe8a   : > { %v3395_v47 = vld [vmem:[#allocation14 + $0x940] sm:$0xff]  ;;  %v3428_v11 = vld [vmem:[#allocation14 + $0xa48] sm:$0xff] }
 0xe8b   : > { %5674 = vmatmul.mubr.msk.f32.vlgmr.msra.gmra.mrb[12].mxu1 %vm1055_vm1, %v8461_v55  ;;  %v6056_v55 = vpack.c.bf16 %v2960_v27, %v2958_v26  ;;  %6321 = vmatpush1.bf16.msra.mxu0 %v6320_v1  ;;  %v3220_v26 = vld [vmem:[#allocation14 + $0x3c8] sm:$0xff]  ;;  %v3195_v27 = vld [vmem:[#allocation14 + $0x300] sm:$0xff]  ;;  %v6338_v1 = vpack.c.bf16 %v3316_v60, %v3300_v59 }
 0xe8c   : > { %6045 = vmatpush1.bf16.msra.mxu1 %v6044_v22  ;;  %2780 = vmatprep.mubr.f32.mxu1 %v7807_v5  ;;  %v6066_v22 = vpack.c.bf16 %v3180_v19, %v3164_v0  ;;  %v3307_v0 = vld [vmem:[#allocation14 + $0x680] sm:$0xff]  ;;  %v3444_v31 = vld [vmem:[#allocation14 + $0xac8] sm:$0xff] }
 0xe8d   : > { %6047 = vmatprep.subr.bf16.mxu1 %v6046_v2  ;;  %v3172_v2 = vld [vmem:[#allocation14 + $0x248] sm:$0xff]  ;;  %v3299_v19 = vld [vmem:[#allocation14 + $0x640] sm:$0xff]  ;;  %v6084_v7 = vpack.c.bf16 %v3307_v0, %v3291_v17  ;;  %v6354_v59 = vpack.c.bf16 %v3444_v31, %v3428_v11 }
 0xe8e   : > { %v6322_v6 = vpack.c.bf16 %v3188_v3, %v3172_v2  ;;  %v3324_v2 = vld [vmem:[#allocation14 + $0x708] sm:$0xff]  ;;  %v3427_v60 = vld [vmem:[#allocation14 + $0xa40] sm:$0xff] }
 0xe8f   : > { %v3340_v3 = vld [vmem:[#allocation14 + $0x788] sm:$0xff] }
 0xe90   : > { %6049 = vmatpush1.bf16.msra.mxu1 %v6048_v8  ;;  %v3171_v8 = vld [vmem:[#allocation14 + $0x240] sm:$0xff]  ;;  %6323 = vmatprep.subr.bf16.mxu0 %v6322_v6  ;;  %v3348_v6 = vld [vmem:[#allocation14 + $0x7c8] sm:$0xff] }
 0xe91   : > { %6051 = vmatprep.subr.bf16.mxu1 %v6050_v41  ;;  %v3187_v41 = vld [vmem:[#allocation14 + $0x2c0] sm:$0xff]  ;;  %v3556_v11 = vld [vmem:[#allocation14 + $0xe48] sm:$0xff] }
 0xe93   : > { %5678 = vmatmul.mubr.msk.f32.vlgmr.msra.gmra.mrb[12].mxu1 %vm1055_vm1, %v8505_v54 }
 0xe94   : > { %6053 = vmatpush1.bf16.msra.mxu1 %v6052_v21  ;;  %3029 = vmatprep.mubr.f32.mxu1 %v7807_v5  ;;  %v6324_v21 = vpack.c.bf16 %v3187_v41, %v3171_v8  ;;  %v6086_v41 = vpack.c.bf16 %v3340_v3, %v3324_v2 }
 0xe95   : > { %6055 = vmatprep.subr.bf16.mxu1 %v6054_v23  ;;  %v6070_v23 = vpack.c.bf16 %v3212_v18, %v3196_v16  ;;  %v3339_v16 = vld [vmem:[#allocation14 + $0x780] sm:$0xff] }
 0xe96   : > { %6325 = vmatpush1.bf16.msra.mxu0 %v6324_v21  ;;  %v3331_v18 = vld [vmem:[#allocation14 + $0x740] sm:$0xff] }
 0xe97   : > { %v3347_v21 = vld [vmem:[#allocation14 + $0x7c0] sm:$0xff] }
 0xe98   : > { %6057 = vmatpush1.bf16.msra.mxu1 %v6056_v55  ;;  %v3211_v55 = vld [vmem:[#allocation14 + $0x380] sm:$0xff] }
 0xe99   : > { %6059 = vmatprep.subr.bf16.mxu1 %v6058_v46  ;;  %v3260_v46 = vld [vmem:[#allocation14 + $0x508] sm:$0xff] }
 0xe9a   : > { %v6078_v51 = vpack.c.bf16 %v3276_v44, %v3260_v46  ;;  %v3387_v46 = vld [vmem:[#allocation14 + $0x900] sm:$0xff] }
 0xe9b   : > { %v3403_v44 = vld [vmem:[#allocation14 + $0x980] sm:$0xff] }
 0xe9c   : > { %v6096_v52 = vpack.c.bf16 %v3403_v44, %v3387_v46 }
 0xee3   : > { %v2950_v28 = vpop.f32.mrb[14].mxu0 }
 0xee4   : > { %v5801_v29 = vpop.f32.mrb[15].mxu0  ;;  %5682 = vmatmul.mubr.msk.f32.vlgmr.msra.gmra.mrb[12].mxu1 %vm1055_vm1, %v2950_v28  ;;  %v6326_v28 = vpack.c.bf16 %v3220_v26, %v3204_v20  ;;  %v6342_v20 = vpack.c.bf16 %v3348_v6, %v3332_v4  ;;  %v3372_v26 = vld [vmem:[#allocation14 + $0x888] sm:$0xff] }
 0xee5   : > { %6061 = vmatpush1.bf16.msra.mxu1 %v6060_v50  ;;  %v3203_v29 = vld [vmem:[#allocation14 + $0x340] sm:$0xff]  ;;  %v6332_v50 = vpack.c.bf16 %v3251_v45, %v3235_v30  ;;  %v3452_v4 = vld [vmem:[#allocation14 + $0xb08] sm:$0xff] }
 0xee6   : > { %6063 = vmatprep.subr.bf16.mxu1 %v6062_v58  ;;  %6327 = vmatprep.subr.bf16.mxu0 %v6326_v28  ;;  %v3308_v58 = vld [vmem:[#allocation14 + $0x688] sm:$0xff] }
 0xee7   : > { %v3468_v6 = vld [vmem:[#allocation14 + $0xb88] sm:$0xff] }
 0xee9   : > { %6065 = vmatpush1.bf16.msra.mxu1 %v6064_v63  ;;  %v6082_v63 = vpack.c.bf16 %v3308_v58, %v3292_v57  ;;  %v3419_v57 = vld [vmem:[#allocation14 + $0xa00] sm:$0xff] }
 0xeea   : > { %6067 = vmatprep.subr.bf16.mxu1 %v6066_v22  ;;  %v3315_v22 = vld [vmem:[#allocation14 + $0x6c0] sm:$0xff] }
 0xeeb   : > { %v6340_v8 = vpack.c.bf16 %v3315_v22, %v3299_v19  ;;  %v3435_v58 = vld [vmem:[#allocation14 + $0xa80] sm:$0xff] }
 0xeed   : > { %6069 = vmatpush1.bf16.msra.mxu1 %v6068_v14  ;;  %v3323_v14 = vld [vmem:[#allocation14 + $0x700] sm:$0xff] }
 0xeee   : > { %6071 = vmatprep.subr.bf16.mxu1 %v6070_v23  ;;  %v3356_v23 = vld [vmem:[#allocation14 + $0x808] sm:$0xff]  ;;  %v6088_v28 = vpack.c.bf16 %v3339_v16, %v3323_v14  ;;  %v3451_v14 = vld [vmem:[#allocation14 + $0xb00] sm:$0xff] }
 0xeef   : > { %v3467_v16 = vld [vmem:[#allocation14 + $0xb80] sm:$0xff] }
 0xfb7   : > { %v3031_v34 = vpop.f32.mrb[12].mxu1 }
 0xfb8   : > { %v3038_v24 = vadd.f32 %v7326_v36, %v3031_v34  ;;  %v3033_v54 = vpop.f32.mrb[13].mxu1  ;;  %v3244_v34 = vld [vmem:[#allocation14 + $0x488] sm:$0xff] }
 0xfb9   : > { %v3039_v38 = vadd.f32 %v7327_v25, %v3033_v54  ;;  %v3252_v36 = vld [vmem:[#allocation14 + $0x4c8] sm:$0xff]  ;;  %v6328_v54 = vpack.c.bf16 %v3219_v32, %v3203_v29  ;;  %v6344_v29 = vpack.c.bf16 %v3347_v21, %v3331_v18  ;;  %v6090_v32 = vpack.c.bf16 %v3372_v26, %v3356_v23 }
 0xfba   : > { %v8533_v39 = vadd.f32 %v3045_v33, %v3038_v24  ;;  %v3228_v33 = vld [vmem:[#allocation14 + $0x408] sm:$0xff]  ;;  %v6072_v24 = vpack.c.bf16 %v3211_v55, %v3195_v27  ;;  %v6104_v18 = vpack.c.bf16 %v3467_v16, %v3451_v14  ;;  %v3102_v14 = vld [vmem:[#allocation14 + $0x18] sm:$0xff] }
 0xfbb   : > { %v8535_v5 = vadd.f32 %v3049_v35, %v3039_v38  ;;  %v3236_v35 = vld [vmem:[#allocation14 + $0x448] sm:$0xff]  ;;  %v6074_v25 = vpack.c.bf16 %v3244_v34, %v3228_v33  ;;  %v3227_v38 = vld [vmem:[#allocation14 + $0x400] sm:$0xff]  ;;  %6329 = vmatpush1.bf16.msra.mxu0 %v6328_v54  ;;  %v3118_v16 = vld [vmem:[#allocation14 + $0x98] sm:$0xff] }
 0xfbc   : > { %v6330_v43 = vpack.c.bf16 %v3252_v36, %v3236_v35  ;;  %6073 = vmatpush1.bf16.msra.mxu1 %v6072_v24  ;;  %v3364_v27 = vld [vmem:[#allocation14 + $0x848] sm:$0xff]  ;;  %v3355_v33 = vld [vmem:[#allocation14 + $0x800] sm:$0xff] }
 0xfbd   : > { %v3054_v42 = vadd.f32 %v8535_v5, %v8533_v39  ;;  %6075 = vmatprep.subr.bf16.mxu1 %v6074_v25  ;;  %v3380_v55 = vld [vmem:[#allocation14 + $0x8c8] sm:$0xff]  ;;  %v3371_v34 = vld [vmem:[#allocation14 + $0x880] sm:$0xff] }
 0xfbe   : > { %6331 = vmatprep.subr.bf16.mxu0 %v6330_v43  ;;  %v3363_v35 = vld [vmem:[#allocation14 + $0x840] sm:$0xff]  ;;  %v6346_v36 = vpack.c.bf16 %v3380_v55, %v3364_v27  ;;  %v3388_v54 = vld [vmem:[#allocation14 + $0x908] sm:$0xff]  ;;  %v6092_v30 = vpack.c.bf16 %v3371_v34, %v3355_v33 }
 0xfbf   : > { %3055 = vadd.xlane.f32.xlu1 %v3054_v42  ;;  %v3243_v42 = vld [vmem:[#allocation14 + $0x480] sm:$0xff]  ;;  %6333 = vmatpush1.bf16.msra.mxu0 %v6332_v50  ;;  %v3404_v25 = vld [vmem:[#allocation14 + $0x988] sm:$0xff] }
 0xfc0   : > { %v6076_v49 = vpack.c.bf16 %v3243_v42, %v3227_v38  ;;  %6335 = vmatprep.subr.bf16.mxu0 %v6334_v53  ;;  %v3379_v24 = vld [vmem:[#allocation14 + $0x8c0] sm:$0xff]  ;;  %v3396_v38 = vld [vmem:[#allocation14 + $0x948] sm:$0xff]  ;;  %v6094_v45 = vpack.c.bf16 %v3404_v25, %v3388_v54 }
 0xfc1   : > { %v3412_v42 = vld [vmem:[#allocation14 + $0x9c8] sm:$0xff]  ;;  %v6348_v43 = vpack.c.bf16 %v3379_v24, %v3363_v35  ;;  %v3491_v35 = vld [vmem:[#allocation14 + $0xc40] sm:$0xff] }
 0xfc2   : > { %6077 = vmatpush1.bf16.msra.mxu1 %v6076_v49  ;;  %v6350_v48 = vpack.c.bf16 %v3412_v42, %v3396_v38  ;;  %v3411_v49 = vld [vmem:[#allocation14 + $0x9c0] sm:$0xff]  ;;  %v3420_v50 = vld [vmem:[#allocation14 + $0xa08] sm:$0xff] }
 0xfc3   : > { %6079 = vmatprep.subr.bf16.mxu1 %v6078_v51  ;;  %6337 = vmatpush1.bf16.msra.mxu0 %v6336_v62  ;;  %v3436_v51 = vld [vmem:[#allocation14 + $0xa88] sm:$0xff]  ;;  %v6352_v53 = vpack.c.bf16 %v3411_v49, %v3395_v47  ;;  %v6100_v62 = vpack.c.bf16 %v3435_v58, %v3419_v57  ;;  %v3523_v47 = vld [vmem:[#allocation14 + $0xd40] sm:$0xff] }
 0xfc4   : > { %6339 = vmatprep.subr.bf16.mxu0 %v6338_v1  ;;  %v6098_v56 = vpack.c.bf16 %v3436_v51, %v3420_v50  ;;  %v3484_v23 = vld [vmem:[#allocation14 + $0xc08] sm:$0xff] }
 0xfc5   : > { %v3500_v26 = vld [vmem:[#allocation14 + $0xc88] sm:$0xff] }
 0xfc6   : > { %6081 = vmatpush1.bf16.msra.mxu1 %v6080_v61  ;;  %v3443_v61 = vld [vmem:[#allocation14 + $0xac0] sm:$0xff]  ;;  %v3492_v27 = vld [vmem:[#allocation14 + $0xc48] sm:$0xff]  ;;  %v6106_v55 = vpack.c.bf16 %v3500_v26, %v3484_v23 }
 0xfc7   : > { %6083 = vmatprep.subr.bf16.mxu1 %v6082_v63  ;;  %6341 = vmatpush1.bf16.msra.mxu0 %v6340_v8  ;;  %v6356_v63 = vpack.c.bf16 %v3443_v61, %v3427_v60  ;;  %v6102_v8 = vpack.c.bf16 %v3468_v6, %v3452_v4  ;;  %v3516_v54 = vld [vmem:[#allocation14 + $0xd08] sm:$0xff]  ;;  %v3571_v60 = vld [vmem:[#allocation14 + $0xec0] sm:$0xff] }
 0xfc8   : > { %6343 = vmatprep.subr.bf16.mxu0 %v6342_v20  ;;  %v3459_v20 = vld [vmem:[#allocation14 + $0xb40] sm:$0xff]  ;;  %v3532_v25 = vld [vmem:[#allocation14 + $0xd88] sm:$0xff] }
 0xfc9   : > { %v3524_v38 = vld [vmem:[#allocation14 + $0xd48] sm:$0xff]  ;;  %v6110_v42 = vpack.c.bf16 %v3532_v25, %v3516_v54  ;;  %v3117_v54 = vld [vmem:[#allocation14 + $0x90] sm:$0xff]  ;;  %v3111_v25 = vld [vmem:[#allocation14 + $0x60] sm:$0xff] }
 0xfca   : > { %6085 = vmatpush1.bf16.msra.mxu1 %v6084_v7  ;;  %v3460_v7 = vld [vmem:[#allocation14 + $0xb48] sm:$0xff] }
 0xfcb   : > { %6087 = vmatprep.subr.bf16.mxu1 %v6086_v41  ;;  %6345 = vmatpush1.bf16.msra.mxu0 %v6344_v29  ;;  %v3476_v41 = vld [vmem:[#allocation14 + $0xbc8] sm:$0xff]  ;;  %v3483_v29 = vld [vmem:[#allocation14 + $0xc00] sm:$0xff] }
 0xfcc   : > { %6347 = vmatprep.subr.bf16.mxu0 %v6346_v36  ;;  %v3507_v36 = vld [vmem:[#allocation14 + $0xcc0] sm:$0xff]  ;;  %v3548_v50 = vld [vmem:[#allocation14 + $0xe08] sm:$0xff] }
 0xfcd   : > { %v6364_v24 = vpack.c.bf16 %v3507_v36, %v3491_v35  ;;  %v3564_v51 = vld [vmem:[#allocation14 + $0xe88] sm:$0xff] }
 0xfce   : > { %6089 = vmatpush1.bf16.msra.mxu1 %v6088_v28  ;;  %v3508_v28 = vld [vmem:[#allocation14 + $0xcc8] sm:$0xff]  ;;  %v6114_v31 = vpack.c.bf16 %v3564_v51, %v3548_v50  ;;  %v3133_v51 = vld [vmem:[#allocation14 + $0x110] sm:$0xff] }
 0xfcf   : > { %6091 = vmatprep.subr.bf16.mxu1 %v6090_v32  ;;  %6349 = vmatpush1.bf16.msra.mxu0 %v6348_v43  ;;  %v3499_v32 = vld [vmem:[#allocation14 + $0xc80] sm:$0xff]  ;;  %v6362_v33 = vpack.c.bf16 %v3508_v28, %v3492_v27  ;;  %v3071_v27 = vld [vmem:[#allocation11] sm:$0x3] }
 0xfd0   : > { %6351 = vmatprep.subr.bf16.mxu0 %v6350_v48  ;;  %v6108_v34 = vpack.c.bf16 %v3499_v32, %v3483_v29  ;;  %v3515_v43 = vld [vmem:[#allocation14 + $0xd00] sm:$0xff]  ;;  %v3076_v28 = vrot.slane %v3071_v27, %v8326_v10  ;;  %v3080_v29 = vrot.slane %v3071_v27, %v8336_v13 }
 0xfd1   : > { %v3539_v48 = vld [vmem:[#allocation14 + $0xdc0] sm:$0xff] }
 0xfd2   : > { %6093 = vmatpush1.bf16.msra.mxu1 %v6092_v30  ;;  %v3540_v30 = vld [vmem:[#allocation14 + $0xdc8] sm:$0xff]  ;;  %v6368_v49 = vpack.c.bf16 %v3539_v48, %v3523_v47 }
 0xfd3   : > { %6095 = vmatprep.subr.bf16.mxu1 %v6094_v45  ;;  %6353 = vmatpush1.bf16.msra.mxu0 %v6352_v53  ;;  %v3531_v45 = vld [vmem:[#allocation14 + $0xd80] sm:$0xff]  ;;  %v6366_v46 = vpack.c.bf16 %v3540_v30, %v3524_v38 }
 0xfd4   : > { %6355 = vmatprep.subr.bf16.mxu0 %v6354_v59  ;;  %v6112_v44 = vpack.c.bf16 %v3531_v45, %v3515_v43  ;;  %v3547_v53 = vld [vmem:[#allocation14 + $0xe00] sm:$0xff]  ;;  %v3134_v43 = vld [vmem:[#allocation14 + $0x118] sm:$0xff] }
 0xfd5   : > { %v3555_v59 = vld [vmem:[#allocation14 + $0xe40] sm:$0xff]  ;;  %v3150_v45 = vld [vmem:[#allocation14 + $0x198] sm:$0xff] }
 0xfd6   : > { %6097 = vmatpush1.bf16.msra.mxu1 %v6096_v52  ;;  %v3572_v52 = vld [vmem:[#allocation14 + $0xec8] sm:$0xff]  ;;  %v6372_v61 = vpack.c.bf16 %v3571_v60, %v3555_v59  ;;  %v3127_v38 = vld [vmem:[#allocation14 + $0xe0] sm:$0xff] }
 0xfd7   : > { %6099 = vmatprep.subr.bf16.mxu1 %v6098_v56  ;;  %6357 = vmatpush1.bf16.msra.mxu0 %v6356_v63  ;;  %v3563_v56 = vld [vmem:[#allocation14 + $0xe80] sm:$0xff]  ;;  %v6370_v57 = vpack.c.bf16 %v3572_v52, %v3556_v11  ;;  %v3596_v63 = vld [vmem:[#allocation14 + $0xf88] sm:$0xff]  ;;  %v6444_v50 = vpack.c.bf16 %v3127_v38, %v3111_v25  ;;  %v6126_v52 = vpack.c.bf16 %v3150_v45, %v3134_v43  ;;  %v3277_v43 = vld [vmem:[#allocation14 + $0x590] sm:$0xff] }
 0xfd8   : > { %v6116_v58 = vpack.c.bf16 %v3563_v56, %v3547_v53  ;;  %v3143_v11 = vld [vmem:[#allocation14 + $0x160] sm:$0xff]  ;;  %v3182_v56 = vld [vmem:[#allocation14 + $0x298] sm:$0xff]  ;;  %v3288_v25 = vld [vmem:[#allocation14 + $0x5e8] sm:$0xff] }
 0xfda   : > { %6101 = vmatpush1.bf16.msra.mxu1 %v6100_v62  ;;  %v3580_v62 = vld [vmem:[#allocation14 + $0xf08] sm:$0xff] }
 0xfdb   : > { %6103 = vmatprep.subr.bf16.mxu1 %v6102_v8  ;;  %v3603_v8 = vld [vmem:[#allocation14 + $0xfc0] sm:$0xff] }
 0xfde   : > { %6105 = vmatpush1.bf16.msra.mxu1 %v6104_v18  ;;  %v6122_v18 = vpack.c.bf16 %v3118_v16, %v3102_v14  ;;  %v3213_v14 = vld [vmem:[#allocation14 + $0x390] sm:$0xff] }
 0xfdf   : > { %6107 = vmatprep.subr.bf16.mxu1 %v6106_v55  ;;  %v3085_v55 = vld [vmem:[#allocation13] sm:$0x3] }
 0xfe2   : > { %6109 = vmatpush1.bf16.msra.mxu1 %v6108_v34  ;;  %v3094_v34 = vrot.slane %v3085_v55, %v8336_v13 }
 0xfe3   : > { %6111 = vmatprep.subr.bf16.mxu1 %v6110_v42 }
 0xfe6   : > { %6113 = vmatpush1.bf16.msra.mxu1 %v6112_v44  ;;  %v3160_v44 = vld [vmem:[#allocation14 + $0x1e8] sm:$0xff] }
 0xfe7   : > { %6115 = vmatprep.subr.bf16.mxu1 %v6114_v31  ;;  %v3166_v31 = vld [vmem:[#allocation14 + $0x218] sm:$0xff] }
 0xfea   : > { %6117 = vmatpush1.bf16.msra.mxu1 %v6116_v58  ;;  %v3192_v58 = vld [vmem:[#allocation14 + $0x2e8] sm:$0xff] }
0x104c   : > { %v3056_v17 = vpop.xlane.xlu1 %3055 }
0x104d   : > { %v3058_v0 = vmul.f32 0.00390625, %v3056_v17  ;;  %v3588_v17 = vld [vmem:[#allocation14 + $0xf48] sm:$0xff] }
0x104f   : > { %v8540_v19 = vsub.f32 %v8533_v39, %v3058_v0  ;;  %v8543_v1 = vsub.f32 %v8535_v5, %v3058_v0  ;;  %v6358_v39 = vpack.c.bf16 %v3476_v41, %v3460_v7  ;;  %v3475_v5 = vld [vmem:[#allocation14 + $0xbc0] sm:$0xff]  ;;  %v6118_v0 = vpack.c.bf16 %v3596_v63, %v3580_v62  ;;  %v3181_v62 = vld [vmem:[#allocation14 + $0x290] sm:$0xff] }
0x1050   : > { %v6360_v21 = vpack.c.bf16 %v3475_v5, %v3459_v20  ;;  %v3587_v7 = vld [vmem:[#allocation14 + $0xf40] sm:$0xff]  ;;  %v3128_v20 = vld [vmem:[#allocation14 + $0xe8] sm:$0xff]  ;;  %v6130_v63 = vpack.c.bf16 %v3182_v56, %v3166_v31 }
0x1051   : > { %v3061_v22 = vmul.f32 %v8540_v19, %v8540_v19  ;;  %v3062_v2 = vmul.f32 %v8543_v1, %v8543_v1  ;;  %6359 = vmatprep.subr.bf16.mxu0 %v6358_v39  ;;  %6119 = vmatprep.subr.bf16.mxu1 %v6118_v0  ;;  %v6376_v41 = vpack.c.bf16 %v3603_v8, %v3587_v7  ;;  %v3112_v39 = vld [vmem:[#allocation14 + $0x68] sm:$0xff]  ;;  %v3175_v0 = vld [vmem:[#allocation14 + $0x260] sm:$0xff] }
0x1052   : > { %6361 = vmatpush1.bf16.msra.mxu0 %v6360_v21  ;;  %v6442_v5 = vpack.c.bf16 %v3128_v20, %v3112_v39  ;;  %v3223_v20 = vld [vmem:[#allocation14 + $0x3e0] sm:$0xff] }
0x1053   : > { %v3063_v3 = vadd.f32 %v3062_v2, %v3061_v22  ;;  %6363 = vmatprep.subr.bf16.mxu0 %v6362_v33  ;;  %v3604_v22 = vld [vmem:[#allocation14 + $0xfc8] sm:$0xff]  ;;  %v3579_v2 = vld [vmem:[#allocation14 + $0xf00] sm:$0xff]  ;;  %v3090_v33 = vrot.slane %v3085_v55, %v8326_v10 }
0x1054   : > { %v6374_v4 = vpack.c.bf16 %v3604_v22, %v3588_v17  ;;  %v3191_v22 = vld [vmem:[#allocation14 + $0x2e0] sm:$0xff] }
0x1055   : > { %3064 = vadd.xlane.f32.xlu0 %v3063_v3  ;;  %v3595_v3 = vld [vmem:[#allocation14 + $0xf80] sm:$0xff]  ;;  %v6452_v8 = vpack.c.bf16 %v3191_v22, %v3175_v0  ;;  %v3325_v22 = vld [vmem:[#allocation14 + $0x710] sm:$0xff] }
0x1056   : > { %6365 = vmatpush1.bf16.msra.mxu0 %v6364_v24  ;;  %v6120_v6 = vpack.c.bf16 %v3595_v3, %v3579_v2  ;;  %v3101_v24 = vld [vmem:[#allocation14 + $0x10] sm:$0xff]  ;;  %v3198_v2 = vld [vmem:[#allocation14 + $0x318] sm:$0xff] }
0x1057   : > { %6367 = vmatprep.subr.bf16.mxu0 %v6366_v46  ;;  %v3144_v46 = vld [vmem:[#allocation14 + $0x168] sm:$0xff]  ;;  %v3214_v3 = vld [vmem:[#allocation14 + $0x398] sm:$0xff] }
0x1058   : > { %6121 = vmatpush1.bf16.msra.mxu1 %v6120_v6  ;;  %v6446_v53 = vpack.c.bf16 %v3160_v44, %v3144_v46  ;;  %v3224_v6 = vld [vmem:[#allocation14 + $0x3e8] sm:$0xff]  ;;  %v6134_v16 = vpack.c.bf16 %v3214_v3, %v3198_v2  ;;  %v3271_v44 = vld [vmem:[#allocation14 + $0x560] sm:$0xff]  ;;  %v3341_v2 = vld [vmem:[#allocation14 + $0x790] sm:$0xff] }
0x1059   : > { %6123 = vmatprep.subr.bf16.mxu1 %v6122_v18  ;;  %v3207_v18 = vld [vmem:[#allocation14 + $0x360] sm:$0xff] }
0x105a   : > { %6369 = vmatpush1.bf16.msra.mxu0 %v6368_v49  ;;  %v6124_v49 = vpack.c.bf16 %v3117_v54, %v3101_v24  ;;  %v6456_v55 = vpack.c.bf16 %v3223_v20, %v3207_v18  ;;  %v3278_v24 = vld [vmem:[#allocation14 + $0x598] sm:$0xff]  ;;  %v3272_v54 = vld [vmem:[#allocation14 + $0x568] sm:$0xff]  ;;  %v3357_v20 = vld [vmem:[#allocation14 + $0x810] sm:$0xff] }
0x105b   : > { %6371 = vmatprep.subr.bf16.mxu0 %v6370_v57  ;;  %v3176_v57 = vld [vmem:[#allocation14 + $0x268] sm:$0xff]  ;;  %v6462_v46 = vpack.c.bf16 %v3288_v25, %v3272_v54  ;;  %v3399_v25 = vld [vmem:[#allocation14 + $0x960] sm:$0xff] }
0x105c   : > { %v6450_v17 = vpack.c.bf16 %v3192_v58, %v3176_v57  ;;  %v3303_v58 = vld [vmem:[#allocation14 + $0x660] sm:$0xff] }
0x105e   : > { %6373 = vmatpush1.bf16.msra.mxu0 %v6372_v61  ;;  %v3165_v61 = vld [vmem:[#allocation14 + $0x210] sm:$0xff] }
0x105f   : > { %6375 = vmatprep.subr.bf16.mxu0 %v6374_v4  ;;  %v3208_v4 = vld [vmem:[#allocation14 + $0x368] sm:$0xff]  ;;  %v6132_v7 = vpack.c.bf16 %v3181_v62, %v3165_v61  ;;  %v3342_v61 = vld [vmem:[#allocation14 + $0x798] sm:$0xff] }
0x1060   : > { %v6454_v39 = vpack.c.bf16 %v3224_v6, %v3208_v4  ;;  %v3336_v62 = vld [vmem:[#allocation14 + $0x768] sm:$0xff]  ;;  %v3335_v6 = vld [vmem:[#allocation14 + $0x760] sm:$0xff] }
0x1062   : > { %6377 = vmatpush1.bf16.msra.mxu0 %v6376_v41  ;;  %v3197_v41 = vld [vmem:[#allocation14 + $0x310] sm:$0xff] }
0x1063   : > { %6443 = vmatprep.subr.bf16.mxu0 %v6442_v5  ;;  %v3230_v5 = vld [vmem:[#allocation14 + $0x418] sm:$0xff]  ;;  %v6136_v27 = vpack.c.bf16 %v3213_v14, %v3197_v41  ;;  %v3368_v14 = vld [vmem:[#allocation14 + $0x868] sm:$0xff] }
0x1064   : > { %v3374_v41 = vld [vmem:[#allocation14 + $0x898] sm:$0xff] }
0x10e2   : > { %v3065_v21 = vpop.xlane.xlu0 %3064 }
0x10e3   : > { %v3066_v23 = vmul.f32 0.00390625, %v3065_v21  ;;  %v3246_v21 = vld [vmem:[#allocation14 + $0x498] sm:$0xff] }
0x10e5   : > { %v3067_v26 = vadd.f32 1e-05, %v3066_v23  ;;  %v3240_v23 = vld [vmem:[#allocation14 + $0x468] sm:$0xff] }
0x10e7   : > { %7322 = vrsqrt.f32 %v3067_v26  ;;  %v3256_v26 = vld [vmem:[#allocation14 + $0x4e8] sm:$0xff] }
0x10f1   : > { %v7323_v32 = vpop.eup %7322 }
0x10f2   : > { %v3069_v35 = vmul.f32 %v7323_v32, %v8540_v19  ;;  %v3070_v36 = vmul.f32 %v7323_v32, %v8543_v1  ;;  %v3149_v19 = vld [vmem:[#allocation14 + $0x190] sm:$0xff]  ;;  %v3159_v1 = vld [vmem:[#allocation14 + $0x1e0] sm:$0xff]  ;;  %v6138_v32 = vpack.c.bf16 %v3246_v21, %v3230_v5 }
0x10f3   : > { %v6128_v59 = vpack.c.bf16 %v3149_v19, %v3133_v51  ;;  %v6448_v60 = vpack.c.bf16 %v3159_v1, %v3143_v11  ;;  %v3310_v51 = vld [vmem:[#allocation14 + $0x698] sm:$0xff]  ;;  %v3304_v19 = vld [vmem:[#allocation14 + $0x668] sm:$0xff]  ;;  %v3373_v5 = vld [vmem:[#allocation14 + $0x890] sm:$0xff] }
0x10f4   : > { %v3083_v42 = vmul.f32 %v3076_v28, %v3069_v35  ;;  %v3084_v30 = vmul.f32 %v3080_v29, %v3070_v36  ;;  %v3229_v28 = vld [vmem:[#allocation14 + $0x410] sm:$0xff]  ;;  %v3255_v35 = vld [vmem:[#allocation14 + $0x4e0] sm:$0xff]  ;;  %v3262_v36 = vld [vmem:[#allocation14 + $0x518] sm:$0xff] }
0x10f5   : > { %v3245_v29 = vld [vmem:[#allocation14 + $0x490] sm:$0xff]  ;;  %v6142_v45 = vpack.c.bf16 %v3278_v24, %v3262_v36  ;;  %v3320_v11 = vld [vmem:[#allocation14 + $0x6e8] sm:$0xff] }
0x10f6   : > { %v8555_v47 = vadd.f32 %v3090_v33, %v3083_v42  ;;  %v8557_v48 = vadd.f32 %v3094_v34, %v3084_v30  ;;  %v6458_v33 = vpack.c.bf16 %v3256_v26, %v3240_v23  ;;  %v3239_v34 = vld [vmem:[#allocation14 + $0x460] sm:$0xff]  ;;  %v6140_v38 = vpack.c.bf16 %v3245_v29, %v3229_v28  ;;  %v3261_v30 = vld [vmem:[#allocation14 + $0x510] sm:$0xff]  ;;  %v3406_v28 = vld [vmem:[#allocation14 + $0x998] sm:$0xff] }
0x10f7   : > { %v6460_v42 = vpack.c.bf16 %v3255_v35, %v3239_v34  ;;  %v6144_v1 = vpack.c.bf16 %v3277_v43, %v3261_v30  ;;  %v6466_v57 = vpack.c.bf16 %v3320_v11, %v3304_v19  ;;  %v3367_v26 = vld [vmem:[#allocation14 + $0x860] sm:$0xff]  ;;  %v3400_v29 = vld [vmem:[#allocation14 + $0x968] sm:$0xff]  ;;  %v3389_v35 = vld [vmem:[#allocation14 + $0x910] sm:$0xff] }
0x10f8   : > { %3759 = vmatprep.mubr.f32.mxu1 %v8557_v48  ;;  %4043 = vmatprep.mubr.f32.mxu0 %v8557_v48  ;;  %v3405_v36 = vld [vmem:[#allocation14 + $0x990] sm:$0xff]  ;;  %v3438_v30 = vld [vmem:[#allocation14 + $0xa98] sm:$0xff]  ;;  %v3432_v43 = vld [vmem:[#allocation14 + $0xa68] sm:$0xff] }
0x10f9   : > { %3760 = vmatmul.mubr.f32.vlgmr.msra.gmra.mrb[24].mxu1 %v8555_v47  ;;  %4044 = vmatmul.mubr.f32.vlgmr.msra.gmra.mrb[16].mxu0 %v8555_v47  ;;  %v3431_v11 = vld [vmem:[#allocation14 + $0xa60] sm:$0xff] }
0x10fa   : > { %6125 = vmatpush1.bf16.msra.mxu1 %v6124_v49  ;;  %6445 = vmatpush1.bf16.msra.mxu0 %v6444_v50  ;;  %v3287_v49 = vld [vmem:[#allocation14 + $0x5e0] sm:$0xff]  ;;  %v3294_v50 = vld [vmem:[#allocation14 + $0x618] sm:$0xff] }
0x10fb   : > { %3830 = vmatprep.mubr.f32.mxu1 %v8557_v48  ;;  %4185 = vmatprep.mubr.f32.mxu0 %v8557_v48  ;;  %v6464_v31 = vpack.c.bf16 %v3287_v49, %v3271_v44  ;;  %v6146_v56 = vpack.c.bf16 %v3310_v51, %v3294_v50  ;;  %v3421_v49 = vld [vmem:[#allocation14 + $0xa10] sm:$0xff] }
0x10fc   : > { %6127 = vmatprep.subr.bf16.mxu1 %v6126_v52  ;;  %6447 = vmatprep.subr.bf16.mxu0 %v6446_v53  ;;  %v3293_v52 = vld [vmem:[#allocation14 + $0x610] sm:$0xff] }
0x10fd   : > { %v3309_v53 = vld [vmem:[#allocation14 + $0x690] sm:$0xff] }
0x10fe   : > { %6129 = vmatpush1.bf16.msra.mxu1 %v6128_v59  ;;  %6449 = vmatpush1.bf16.msra.mxu0 %v6448_v60  ;;  %v3319_v59 = vld [vmem:[#allocation14 + $0x6e0] sm:$0xff]  ;;  %v3326_v60 = vld [vmem:[#allocation14 + $0x718] sm:$0xff]  ;;  %v3437_v50 = vld [vmem:[#allocation14 + $0xa90] sm:$0xff] }
0x10ff   : > { %6131 = vmatprep.subr.bf16.mxu1 %v6130_v63  ;;  %6451 = vmatprep.subr.bf16.mxu0 %v6450_v17  ;;  %v3352_v63 = vld [vmem:[#allocation14 + $0x7e8] sm:$0xff]  ;;  %v6148_v17 = vpack.c.bf16 %v3309_v53, %v3293_v52  ;;  %v6468_v0 = vpack.c.bf16 %v3319_v59, %v3303_v58  ;;  %v6150_v3 = vpack.c.bf16 %v3342_v61, %v3326_v60  ;;  %v3470_v52 = vld [vmem:[#allocation14 + $0xb98] sm:$0xff]  ;;  %v3453_v59 = vld [vmem:[#allocation14 + $0xb10] sm:$0xff] }
0x1100   : > { %v6470_v4 = vpack.c.bf16 %v3352_v63, %v3336_v62  ;;  %v3464_v53 = vld [vmem:[#allocation14 + $0xb68] sm:$0xff]  ;;  %v3469_v60 = vld [vmem:[#allocation14 + $0xb90] sm:$0xff]  ;;  %v3463_v63 = vld [vmem:[#allocation14 + $0xb60] sm:$0xff] }
0x1102   : > { %6133 = vmatpush1.bf16.msra.mxu1 %v6132_v7  ;;  %6453 = vmatpush1.bf16.msra.mxu0 %v6452_v8  ;;  %v3351_v7 = vld [vmem:[#allocation14 + $0x7e0] sm:$0xff]  ;;  %v3358_v8 = vld [vmem:[#allocation14 + $0x818] sm:$0xff] }
0x1103   : > { %6135 = vmatprep.subr.bf16.mxu1 %v6134_v16  ;;  %6455 = vmatprep.subr.bf16.mxu0 %v6454_v39  ;;  %v3384_v16 = vld [vmem:[#allocation14 + $0x8e8] sm:$0xff]  ;;  %v6152_v39 = vpack.c.bf16 %v3341_v2, %v3325_v22  ;;  %v6472_v18 = vpack.c.bf16 %v3351_v7, %v3335_v6  ;;  %v6154_v21 = vpack.c.bf16 %v3374_v41, %v3358_v8  ;;  %v3502_v22 = vld [vmem:[#allocation14 + $0xc98] sm:$0xff]  ;;  %v3485_v7 = vld [vmem:[#allocation14 + $0xc10] sm:$0xff] }
0x1104   : > { %v6474_v23 = vpack.c.bf16 %v3384_v16, %v3368_v14  ;;  %v3496_v2 = vld [vmem:[#allocation14 + $0xc68] sm:$0xff]  ;;  %v3501_v8 = vld [vmem:[#allocation14 + $0xc90] sm:$0xff]  ;;  %v3495_v16 = vld [vmem:[#allocation14 + $0xc60] sm:$0xff] }
0x1106   : > { %6137 = vmatpush1.bf16.msra.mxu1 %v6136_v27  ;;  %6457 = vmatpush1.bf16.msra.mxu0 %v6456_v55  ;;  %v3383_v27 = vld [vmem:[#allocation14 + $0x8e0] sm:$0xff]  ;;  %v3390_v55 = vld [vmem:[#allocation14 + $0x918] sm:$0xff] }
0x1107   : > { %6139 = vmatprep.subr.bf16.mxu1 %v6138_v32  ;;  %6459 = vmatprep.subr.bf16.mxu0 %v6458_v33  ;;  %v3416_v32 = vld [vmem:[#allocation14 + $0x9e8] sm:$0xff]  ;;  %v6156_v33 = vpack.c.bf16 %v3373_v5, %v3357_v20  ;;  %v6476_v34 = vpack.c.bf16 %v3383_v27, %v3367_v26  ;;  %v6158_v24 = vpack.c.bf16 %v3406_v28, %v3390_v55  ;;  %v3534_v20 = vld [vmem:[#allocation14 + $0xd98] sm:$0xff]  ;;  %v3517_v27 = vld [vmem:[#allocation14 + $0xd10] sm:$0xff] }
0x1108   : > { %v6478_v54 = vpack.c.bf16 %v3416_v32, %v3400_v29  ;;  %v3528_v5 = vld [vmem:[#allocation14 + $0xd68] sm:$0xff]  ;;  %v3533_v55 = vld [vmem:[#allocation14 + $0xd90] sm:$0xff]  ;;  %v3527_v32 = vld [vmem:[#allocation14 + $0xd60] sm:$0xff] }
0x110a   : > { %6141 = vmatpush1.bf16.msra.mxu1 %v6140_v38  ;;  %6461 = vmatpush1.bf16.msra.mxu0 %v6460_v42  ;;  %v3415_v38 = vld [vmem:[#allocation14 + $0x9e0] sm:$0xff]  ;;  %v3422_v42 = vld [vmem:[#allocation14 + $0xa18] sm:$0xff] }
0x110b   : > { %6143 = vmatprep.subr.bf16.mxu1 %v6142_v45  ;;  %6463 = vmatprep.subr.bf16.mxu0 %v6462_v46  ;;  %v3448_v45 = vld [vmem:[#allocation14 + $0xae8] sm:$0xff]  ;;  %v6160_v46 = vpack.c.bf16 %v3405_v36, %v3389_v35  ;;  %v6480_v44 = vpack.c.bf16 %v3415_v38, %v3399_v25  ;;  %v6162_v51 = vpack.c.bf16 %v3438_v30, %v3422_v42  ;;  %v3566_v35 = vld [vmem:[#allocation14 + $0xe98] sm:$0xff]  ;;  %v3549_v38 = vld [vmem:[#allocation14 + $0xe10] sm:$0xff] }
0x110c   : > { %v6482_v19 = vpack.c.bf16 %v3448_v45, %v3432_v43  ;;  %v3560_v36 = vld [vmem:[#allocation14 + $0xe68] sm:$0xff]  ;;  %v3565_v42 = vld [vmem:[#allocation14 + $0xe90] sm:$0xff]  ;;  %v3559_v45 = vld [vmem:[#allocation14 + $0xe60] sm:$0xff] }
0x110e   : > { %6145 = vmatpush1.bf16.msra.mxu1 %v6144_v1  ;;  %6465 = vmatpush1.bf16.msra.mxu0 %v6464_v31  ;;  %v3447_v1 = vld [vmem:[#allocation14 + $0xae0] sm:$0xff]  ;;  %v3454_v31 = vld [vmem:[#allocation14 + $0xb18] sm:$0xff] }
0x110f   : > { %6147 = vmatprep.subr.bf16.mxu1 %v6146_v56  ;;  %6467 = vmatprep.subr.bf16.mxu0 %v6466_v57  ;;  %v3480_v56 = vld [vmem:[#allocation14 + $0xbe8] sm:$0xff]  ;;  %v6164_v57 = vpack.c.bf16 %v3437_v50, %v3421_v49  ;;  %v6484_v58 = vpack.c.bf16 %v3447_v1, %v3431_v11  ;;  %v6166_v61 = vpack.c.bf16 %v3470_v52, %v3454_v31  ;;  %v3598_v49 = vld [vmem:[#allocation14 + $0xf98] sm:$0xff]  ;;  %v3581_v1 = vld [vmem:[#allocation14 + $0xf10] sm:$0xff] }
0x1110   : > { %v6486_v62 = vpack.c.bf16 %v3480_v56, %v3464_v53  ;;  %v3592_v50 = vld [vmem:[#allocation14 + $0xf68] sm:$0xff]  ;;  %v3597_v31 = vld [vmem:[#allocation14 + $0xf90] sm:$0xff]  ;;  %v3591_v56 = vld [vmem:[#allocation14 + $0xf60] sm:$0xff] }
0x1112   : > { %6149 = vmatpush1.bf16.msra.mxu1 %v6148_v17  ;;  %6469 = vmatpush1.bf16.msra.mxu0 %v6468_v0  ;;  %v3479_v17 = vld [vmem:[#allocation14 + $0xbe0] sm:$0xff]  ;;  %v3486_v0 = vld [vmem:[#allocation14 + $0xc18] sm:$0xff] }
0x1113   : > { %6151 = vmatprep.subr.bf16.mxu1 %v6150_v3  ;;  %6471 = vmatprep.subr.bf16.mxu0 %v6470_v4  ;;  %v3512_v3 = vld [vmem:[#allocation14 + $0xce8] sm:$0xff]  ;;  %v6168_v4 = vpack.c.bf16 %v3469_v60, %v3453_v59  ;;  %v6488_v6 = vpack.c.bf16 %v3479_v17, %v3463_v63  ;;  %v6170_v41 = vpack.c.bf16 %v3502_v22, %v3486_v0  ;;  %v4280_v60 = vld [vmem:[#allocation17 + $0x8] sm:$0xff]  ;;  %v3103_v0 = vld [vmem:[#allocation14 + $0x20] sm:$0xff] }
0x1114   : > { %v6490_v14 = vpack.c.bf16 %v3512_v3, %v3496_v2  ;;  %v3120_v59 = vld [vmem:[#allocation14 + $0xa8] sm:$0xff]  ;;  %v3119_v22 = vld [vmem:[#allocation14 + $0xa0] sm:$0xff] }
0x1115   : > { %v3136_v2 = vld [vmem:[#allocation14 + $0x128] sm:$0xff] }
0x1116   : > { %6153 = vmatpush1.bf16.msra.mxu1 %v6152_v39  ;;  %6473 = vmatpush1.bf16.msra.mxu0 %v6472_v18  ;;  %v3511_v39 = vld [vmem:[#allocation14 + $0xce0] sm:$0xff]  ;;  %v3518_v18 = vld [vmem:[#allocation14 + $0xd18] sm:$0xff] }
0x1117   : > { %6155 = vmatprep.subr.bf16.mxu1 %v6154_v21  ;;  %6475 = vmatprep.subr.bf16.mxu0 %v6474_v23  ;;  %v3544_v21 = vld [vmem:[#allocation14 + $0xde8] sm:$0xff]  ;;  %v6172_v23 = vpack.c.bf16 %v3501_v8, %v3485_v7  ;;  %v6492_v26 = vpack.c.bf16 %v3511_v39, %v3495_v16  ;;  %v6174_v28 = vpack.c.bf16 %v3534_v20, %v3518_v18  ;;  %v4281_v7 = vld [vmem:[#allocation17 + $0x10] sm:$0xff]  ;;  %v4284_v8 = vld [vmem:[#allocation17 + $0x28] sm:$0xff] }
0x1118   : > { %v6494_v29 = vpack.c.bf16 %v3544_v21, %v3528_v5  ;;  %v3135_v39 = vld [vmem:[#allocation14 + $0x120] sm:$0xff]  ;;  %v3168_v20 = vld [vmem:[#allocation14 + $0x228] sm:$0xff] }
0x1119   : > { %v3151_v18 = vld [vmem:[#allocation14 + $0x1a0] sm:$0xff]  ;;  %v3184_v21 = vld [vmem:[#allocation14 + $0x2a8] sm:$0xff] }
0x111a   : > { %6157 = vmatpush1.bf16.msra.mxu1 %v6156_v33  ;;  %6477 = vmatpush1.bf16.msra.mxu0 %v6476_v34  ;;  %v3543_v33 = vld [vmem:[#allocation14 + $0xde0] sm:$0xff]  ;;  %v3550_v34 = vld [vmem:[#allocation14 + $0xe18] sm:$0xff] }
0x111b   : > { %6159 = vmatprep.subr.bf16.mxu1 %v6158_v24  ;;  %6479 = vmatprep.subr.bf16.mxu0 %v6478_v54  ;;  %v3576_v24 = vld [vmem:[#allocation14 + $0xee8] sm:$0xff]  ;;  %v6176_v54 = vpack.c.bf16 %v3533_v55, %v3517_v27  ;;  %v6496_v25 = vpack.c.bf16 %v3543_v33, %v3527_v32  ;;  %v6178_v30 = vpack.c.bf16 %v3566_v35, %v3550_v34  ;;  %v4285_v27 = vld [vmem:[#allocation17 + $0x30] sm:$0xff]  ;;  %v4288_v55 = vld [vmem:[#allocation17 + $0x48] sm:$0xff] }
0x111c   : > { %v6498_v43 = vpack.c.bf16 %v3576_v24, %v3560_v36  ;;  %v6194_v32 = vpack.c.bf16 %v3184_v21, %v3168_v20  ;;  %v3167_v33 = vld [vmem:[#allocation14 + $0x220] sm:$0xff]  ;;  %v3200_v35 = vld [vmem:[#allocation14 + $0x328] sm:$0xff] }
0x111d   : > { %v3183_v34 = vld [vmem:[#allocation14 + $0x2a0] sm:$0xff]  ;;  %v3216_v24 = vld [vmem:[#allocation14 + $0x3a8] sm:$0xff] }
0x111e   : > { %6161 = vmatpush1.bf16.msra.mxu1 %v6160_v46  ;;  %6481 = vmatpush1.bf16.msra.mxu0 %v6480_v44  ;;  %v3575_v46 = vld [vmem:[#allocation14 + $0xee0] sm:$0xff]  ;;  %v3582_v44 = vld [vmem:[#allocation14 + $0xf18] sm:$0xff]  ;;  %v4306_v20 = vld [vmem:[#allocation17 + $0xd8] sm:$0xff] }
0x111f   : > { %6163 = vmatprep.subr.bf16.mxu1 %v6162_v51  ;;  %6483 = vmatprep.subr.bf16.mxu0 %v6482_v19  ;;  %v3608_v51 = vld [vmem:[#allocation14 + $0xfe8] sm:$0xff]  ;;  %v6180_v19 = vpack.c.bf16 %v3565_v42, %v3549_v38  ;;  %v6500_v11 = vpack.c.bf16 %v3575_v46, %v3559_v45  ;;  %v6182_v52 = vpack.c.bf16 %v3598_v49, %v3582_v44  ;;  %v4289_v38 = vld [vmem:[#allocation17 + $0x50] sm:$0xff]  ;;  %v4292_v42 = vld [vmem:[#allocation17 + $0x68] sm:$0xff] }
0x1120   : > { %v6502_v53 = vpack.c.bf16 %v3608_v51, %v3592_v50  ;;  %v6198_v45 = vpack.c.bf16 %v3216_v24, %v3200_v35  ;;  %v3199_v46 = vld [vmem:[#allocation14 + $0x320] sm:$0xff]  ;;  %v3232_v49 = vld [vmem:[#allocation14 + $0x428] sm:$0xff] }
0x1121   : > { %v3215_v44 = vld [vmem:[#allocation14 + $0x3a0] sm:$0xff]  ;;  %v3248_v51 = vld [vmem:[#allocation14 + $0x4a8] sm:$0xff] }
0x1122   : > { %6165 = vmatpush1.bf16.msra.mxu1 %v6164_v57  ;;  %6485 = vmatpush1.bf16.msra.mxu0 %v6484_v58  ;;  %v3607_v57 = vld [vmem:[#allocation14 + $0xfe0] sm:$0xff]  ;;  %v3104_v58 = vld [vmem:[#allocation14 + $0x28] sm:$0xff] }
0x1123   : > { %6167 = vmatprep.subr.bf16.mxu1 %v6166_v61  ;;  %6487 = vmatprep.subr.bf16.mxu0 %v6486_v62  ;;  %v4282_v61 = vld [vmem:[#allocation17 + $0x18] sm:$0xff]  ;;  %v6184_v62 = vpack.c.bf16 %v3597_v31, %v3581_v1  ;;  %v6504_v63 = vpack.c.bf16 %v3607_v57, %v3591_v56  ;;  %v6186_v17 = vpack.c.bf16 %v3120_v59, %v3104_v58  ;;  %v4293_v1 = vld [vmem:[#allocation17 + $0x70] sm:$0xff]  ;;  %v4296_v31 = vld [vmem:[#allocation17 + $0x88] sm:$0xff] }
0x1124   : > { %v6570_v3 = vpack.c.bf16 %v4282_v61, %v4280_v60  ;;  %v6202_v56 = vpack.c.bf16 %v3248_v51, %v3232_v49  ;;  %v3231_v57 = vld [vmem:[#allocation14 + $0x420] sm:$0xff]  ;;  %v3264_v59 = vld [vmem:[#allocation14 + $0x528] sm:$0xff] }
0x1125   : > { %v3247_v58 = vld [vmem:[#allocation14 + $0x4a0] sm:$0xff]  ;;  %v3280_v61 = vld [vmem:[#allocation14 + $0x5a8] sm:$0xff] }
0x1126   : > { %6169 = vmatpush1.bf16.msra.mxu1 %v6168_v4  ;;  %6489 = vmatpush1.bf16.msra.mxu0 %v6488_v6  ;;  %v3152_v4 = vld [vmem:[#allocation14 + $0x1a8] sm:$0xff]  ;;  %v4279_v6 = vld [vmem:[#allocation17] sm:$0xff] }
0x1127   : > { %6171 = vmatprep.subr.bf16.mxu1 %v6170_v41  ;;  %6491 = vmatprep.subr.bf16.mxu0 %v6490_v14  ;;  %v4286_v41 = vld [vmem:[#allocation17 + $0x38] sm:$0xff]  ;;  %v6188_v14 = vpack.c.bf16 %v3119_v22, %v3103_v0  ;;  %v6190_v16 = vpack.c.bf16 %v3152_v4, %v3136_v2  ;;  %v6572_v5 = vpack.c.bf16 %v4281_v7, %v4279_v6  ;;  %v4300_v0 = vld [vmem:[#allocation17 + $0xa8] sm:$0xff]  ;;  %v3263_v4 = vld [vmem:[#allocation14 + $0x520] sm:$0xff] }
0x1128   : > { %v4302_v22 = vld [vmem:[#allocation17 + $0xb8] sm:$0xff]  ;;  %v6204_v2 = vpack.c.bf16 %v3247_v58, %v3231_v57  ;;  %v3279_v6 = vld [vmem:[#allocation14 + $0x5a0] sm:$0xff]  ;;  %v4316_v58 = vld [vmem:[#allocation17 + $0x128] sm:$0xff] }
0x1129   : > { %v3296_v7 = vld [vmem:[#allocation14 + $0x628] sm:$0xff]  ;;  %v4313_v57 = vld [vmem:[#allocation17 + $0x110] sm:$0xff] }
0x112a   : > { %6173 = vmatpush1.bf16.msra.mxu1 %v6172_v23  ;;  %6493 = vmatpush1.bf16.msra.mxu0 %v6492_v26  ;;  %v6574_v23 = vpack.c.bf16 %v4286_v41, %v4284_v8  ;;  %v4283_v26 = vld [vmem:[#allocation17 + $0x20] sm:$0xff]  ;;  %v3312_v41 = vld [vmem:[#allocation14 + $0x6a8] sm:$0xff] }
0x112b   : > { %6175 = vmatprep.subr.bf16.mxu1 %v6174_v28  ;;  %6495 = vmatprep.subr.bf16.mxu0 %v6494_v29  ;;  %v4290_v28 = vld [vmem:[#allocation17 + $0x58] sm:$0xff]  ;;  %v6192_v29 = vpack.c.bf16 %v3151_v18, %v3135_v39  ;;  %v6576_v36 = vpack.c.bf16 %v4285_v27, %v4283_v26  ;;  %v4301_v39 = vld [vmem:[#allocation17 + $0xb0] sm:$0xff]  ;;  %v4304_v18 = vld [vmem:[#allocation17 + $0xc8] sm:$0xff]  ;;  %v6210_v21 = vpack.c.bf16 %v3312_v41, %v3296_v7 }
0x112c   : > { %v3311_v26 = vld [vmem:[#allocation14 + $0x6a0] sm:$0xff]  ;;  %v3328_v27 = vld [vmem:[#allocation14 + $0x728] sm:$0xff] }
0x112d   : > { %v4310_v35 = vld [vmem:[#allocation17 + $0xf8] sm:$0xff] }
0x112e   : > { %6177 = vmatpush1.bf16.msra.mxu1 %v6176_v54  ;;  %6497 = vmatpush1.bf16.msra.mxu0 %v6496_v25  ;;  %v6578_v54 = vpack.c.bf16 %v4290_v28, %v4288_v55  ;;  %v4287_v25 = vld [vmem:[#allocation17 + $0x40] sm:$0xff]  ;;  %v3344_v28 = vld [vmem:[#allocation14 + $0x7a8] sm:$0xff] }
0x112f   : > { %6179 = vmatprep.subr.bf16.mxu1 %v6178_v30  ;;  %6499 = vmatprep.subr.bf16.mxu0 %v6498_v43  ;;  %v4294_v30 = vld [vmem:[#allocation17 + $0x78] sm:$0xff]  ;;  %v6196_v43 = vpack.c.bf16 %v3183_v34, %v3167_v33  ;;  %v6580_v50 = vpack.c.bf16 %v4289_v38, %v4287_v25  ;;  %v4305_v33 = vld [vmem:[#allocation17 + $0xd0] sm:$0xff]  ;;  %v4308_v34 = vld [vmem:[#allocation17 + $0xe8] sm:$0xff]  ;;  %v6214_v24 = vpack.c.bf16 %v3344_v28, %v3328_v27 }
0x1130   : > { %v3343_v25 = vld [vmem:[#allocation14 + $0x7a0] sm:$0xff]  ;;  %v3360_v38 = vld [vmem:[#allocation14 + $0x828] sm:$0xff] }
0x1131   : > { %v4314_v49 = vld [vmem:[#allocation17 + $0x118] sm:$0xff] }
0x1132   : > { %6181 = vmatpush1.bf16.msra.mxu1 %v6180_v19  ;;  %6501 = vmatpush1.bf16.msra.mxu0 %v6500_v11  ;;  %v6582_v19 = vpack.c.bf16 %v4294_v30, %v4292_v42  ;;  %v4291_v11 = vld [vmem:[#allocation17 + $0x60] sm:$0xff]  ;;  %v3376_v30 = vld [vmem:[#allocation14 + $0x8a8] sm:$0xff] }
0x1133   : > { %6183 = vmatprep.subr.bf16.mxu1 %v6182_v52  ;;  %6503 = vmatprep.subr.bf16.mxu0 %v6502_v53  ;;  %v4298_v52 = vld [vmem:[#allocation17 + $0x98] sm:$0xff]  ;;  %v6200_v53 = vpack.c.bf16 %v3215_v44, %v3199_v46  ;;  %v6584_v60 = vpack.c.bf16 %v4293_v1, %v4291_v11  ;;  %v4309_v46 = vld [vmem:[#allocation17 + $0xf0] sm:$0xff]  ;;  %v4312_v44 = vld [vmem:[#allocation17 + $0x108] sm:$0xff]  ;;  %v6218_v51 = vpack.c.bf16 %v3376_v30, %v3360_v38 }
0x1134   : > { %v3375_v11 = vld [vmem:[#allocation14 + $0x8a0] sm:$0xff]  ;;  %v3392_v1 = vld [vmem:[#allocation14 + $0x928] sm:$0xff] }
0x1135   : > { %v4322_v7 = vld [vmem:[#allocation17 + $0x158] sm:$0xff] }
0x1136   : > { %6185 = vmatpush1.bf16.msra.mxu1 %v6184_v62  ;;  %6505 = vmatpush1.bf16.msra.mxu0 %v6504_v63  ;;  %v6586_v62 = vpack.c.bf16 %v4298_v52, %v4296_v31  ;;  %v4295_v63 = vld [vmem:[#allocation17 + $0x80] sm:$0xff]  ;;  %v3408_v52 = vld [vmem:[#allocation14 + $0x9a8] sm:$0xff] }
0x1137   : > { %6187 = vmatprep.subr.bf16.mxu1 %v6186_v17  ;;  %6571 = vmatprep.subr.bf16.mxu0 %v6570_v3  ;;  %v4297_v17 = vld [vmem:[#allocation17 + $0x90] sm:$0xff]  ;;  %v6206_v3 = vpack.c.bf16 %v3280_v61, %v3264_v59  ;;  %v4318_v59 = vld [vmem:[#allocation17 + $0x138] sm:$0xff]  ;;  %v6222_v61 = vpack.c.bf16 %v3408_v52, %v3392_v1 }
0x1138   : > { %v6588_v8 = vpack.c.bf16 %v4297_v17, %v4295_v63  ;;  %v3407_v63 = vld [vmem:[#allocation14 + $0x9a0] sm:$0xff]  ;;  %v3424_v17 = vld [vmem:[#allocation14 + $0xa28] sm:$0xff] }
0x1139   : > { %3831 = vmatmul.mubr.f32.vlgmr.msra.gmra.mrb[26].mxu1 %v8555_v47  ;;  %4186 = vmatmul.mubr.f32.vlgmr.msra.gmra.mrb[18].mxu0 %v8555_v47  ;;  %v4326_v27 = vld [vmem:[#allocation17 + $0x178] sm:$0xff] }
0x113a   : > { %6189 = vmatpush1.bf16.msra.mxu1 %v6188_v14  ;;  %3901 = vmatprep.mubr.f32.mxu1 %v8557_v48  ;;  %v6590_v14 = vpack.c.bf16 %v4302_v22, %v4300_v0  ;;  %v3440_v22 = vld [vmem:[#allocation14 + $0xaa8] sm:$0xff] }
0x113b   : > { %6191 = vmatprep.subr.bf16.mxu1 %v6190_v16  ;;  %6573 = vmatpush1.bf16.msra.mxu0 %v6572_v5  ;;  %v4299_v16 = vld [vmem:[#allocation17 + $0xa0] sm:$0xff]  ;;  %v6208_v5 = vpack.c.bf16 %v3279_v6, %v3263_v4  ;;  %v4317_v4 = vld [vmem:[#allocation17 + $0x130] sm:$0xff]  ;;  %v4320_v6 = vld [vmem:[#allocation17 + $0x148] sm:$0xff]  ;;  %v6226_v41 = vpack.c.bf16 %v3440_v22, %v3424_v17 }
0x113c   : > { %6575 = vmatprep.subr.bf16.mxu0 %v6574_v23  ;;  %v3295_v23 = vld [vmem:[#allocation14 + $0x620] sm:$0xff]  ;;  %v6592_v55 = vpack.c.bf16 %v4301_v39, %v4299_v16  ;;  %v3456_v39 = vld [vmem:[#allocation14 + $0xb28] sm:$0xff] }
0x113d   : > { %v3439_v16 = vld [vmem:[#allocation14 + $0xaa0] sm:$0xff]  ;;  %v4330_v38 = vld [vmem:[#allocation17 + $0x198] sm:$0xff] }
0x113e   : > { %6193 = vmatpush1.bf16.msra.mxu1 %v6192_v29  ;;  %v6594_v29 = vpack.c.bf16 %v4306_v20, %v4304_v18  ;;  %v3472_v20 = vld [vmem:[#allocation14 + $0xba8] sm:$0xff] }
0x113f   : > { %6195 = vmatprep.subr.bf16.mxu1 %v6194_v32  ;;  %6577 = vmatpush1.bf16.msra.mxu0 %v6576_v36  ;;  %v4303_v32 = vld [vmem:[#allocation17 + $0xc0] sm:$0xff]  ;;  %v6212_v36 = vpack.c.bf16 %v3311_v26, %v3295_v23  ;;  %v4321_v23 = vld [vmem:[#allocation17 + $0x150] sm:$0xff]  ;;  %v4324_v26 = vld [vmem:[#allocation17 + $0x168] sm:$0xff]  ;;  %v6230_v28 = vpack.c.bf16 %v3472_v20, %v3456_v39 }
0x1140   : > { %6579 = vmatprep.subr.bf16.mxu0 %v6578_v54  ;;  %v3327_v54 = vld [vmem:[#allocation14 + $0x720] sm:$0xff]  ;;  %v6596_v42 = vpack.c.bf16 %v4305_v33, %v4303_v32  ;;  %v3488_v33 = vld [vmem:[#allocation14 + $0xc28] sm:$0xff] }
0x1141   : > { %v3471_v32 = vld [vmem:[#allocation14 + $0xba0] sm:$0xff]  ;;  %v4334_v1 = vld [vmem:[#allocation17 + $0x1b8] sm:$0xff] }
0x1142   : > { %6197 = vmatpush1.bf16.msra.mxu1 %v6196_v43  ;;  %v6598_v43 = vpack.c.bf16 %v4310_v35, %v4308_v34  ;;  %v3504_v35 = vld [vmem:[#allocation14 + $0xca8] sm:$0xff] }
0x1143   : > { %6199 = vmatprep.subr.bf16.mxu1 %v6198_v45  ;;  %6581 = vmatpush1.bf16.msra.mxu0 %v6580_v50  ;;  %v4307_v45 = vld [vmem:[#allocation17 + $0xe0] sm:$0xff]  ;;  %v6216_v50 = vpack.c.bf16 %v3343_v25, %v3327_v54  ;;  %v4325_v54 = vld [vmem:[#allocation17 + $0x170] sm:$0xff]  ;;  %v4328_v25 = vld [vmem:[#allocation17 + $0x188] sm:$0xff]  ;;  %v6234_v30 = vpack.c.bf16 %v3504_v35, %v3488_v33 }
0x1144   : > { %6583 = vmatprep.subr.bf16.mxu0 %v6582_v19  ;;  %v3359_v19 = vld [vmem:[#allocation14 + $0x820] sm:$0xff]  ;;  %v6600_v31 = vpack.c.bf16 %v4309_v46, %v4307_v45  ;;  %v3520_v46 = vld [vmem:[#allocation14 + $0xd28] sm:$0xff] }
0x1145   : > { %v3503_v45 = vld [vmem:[#allocation14 + $0xca0] sm:$0xff]  ;;  %v4338_v17 = vld [vmem:[#allocation17 + $0x1d8] sm:$0xff] }
0x1146   : > { %6201 = vmatpush1.bf16.msra.mxu1 %v6200_v53  ;;  %v6602_v53 = vpack.c.bf16 %v4314_v49, %v4312_v44  ;;  %v3536_v49 = vld [vmem:[#allocation14 + $0xda8] sm:$0xff] }
0x1147   : > { %6203 = vmatprep.subr.bf16.mxu1 %v6202_v56  ;;  %6585 = vmatpush1.bf16.msra.mxu0 %v6584_v60  ;;  %v4311_v56 = vld [vmem:[#allocation17 + $0x100] sm:$0xff]  ;;  %v6220_v60 = vpack.c.bf16 %v3375_v11, %v3359_v19  ;;  %v4329_v19 = vld [vmem:[#allocation17 + $0x190] sm:$0xff]  ;;  %v4332_v11 = vld [vmem:[#allocation17 + $0x1a8] sm:$0xff]  ;;  %v6238_v52 = vpack.c.bf16 %v3536_v49, %v3520_v46 }
0x1148   : > { %6587 = vmatprep.subr.bf16.mxu0 %v6586_v62  ;;  %v3391_v62 = vld [vmem:[#allocation14 + $0x920] sm:$0xff]  ;;  %v6604_v0 = vpack.c.bf16 %v4313_v57, %v4311_v56  ;;  %v3552_v57 = vld [vmem:[#allocation14 + $0xe28] sm:$0xff]  ;;  %v3153_v46 = vld [vmem:[#allocation14 + $0x1b0] sm:$0xff] }
0x1149   : > { %v3535_v56 = vld [vmem:[#allocation14 + $0xda0] sm:$0xff]  ;;  %v4342_v39 = vld [vmem:[#allocation17 + $0x1f8] sm:$0xff]  ;;  %v3186_v49 = vld [vmem:[#allocation14 + $0x2b8] sm:$0xff] }
0x114a   : > { %6205 = vmatpush1.bf16.msra.mxu1 %v6204_v2  ;;  %v6606_v2 = vpack.c.bf16 %v4318_v59, %v4316_v58  ;;  %v3568_v59 = vld [vmem:[#allocation14 + $0xea8] sm:$0xff] }
0x114b   : > { %6207 = vmatprep.subr.bf16.mxu1 %v6206_v3  ;;  %6589 = vmatpush1.bf16.msra.mxu0 %v6588_v8  ;;  %v4315_v3 = vld [vmem:[#allocation17 + $0x120] sm:$0xff]  ;;  %v6224_v8 = vpack.c.bf16 %v3407_v63, %v3391_v62  ;;  %v4333_v62 = vld [vmem:[#allocation17 + $0x1b0] sm:$0xff]  ;;  %v4336_v63 = vld [vmem:[#allocation17 + $0x1c8] sm:$0xff]  ;;  %v6242_v22 = vpack.c.bf16 %v3568_v59, %v3552_v57 }
0x114c   : > { %6591 = vmatprep.subr.bf16.mxu0 %v6590_v14  ;;  %v3423_v14 = vld [vmem:[#allocation14 + $0xa20] sm:$0xff]  ;;  %v6608_v18 = vpack.c.bf16 %v4317_v4, %v4315_v3  ;;  %v3584_v4 = vld [vmem:[#allocation14 + $0xf28] sm:$0xff]  ;;  %v3217_v57 = vld [vmem:[#allocation14 + $0x3b0] sm:$0xff] }
0x114d   : > { %v3567_v3 = vld [vmem:[#allocation14 + $0xea0] sm:$0xff]  ;;  %v4346_v33 = vld [vmem:[#allocation17 + $0x218] sm:$0xff]  ;;  %v3250_v59 = vld [vmem:[#allocation14 + $0x4b8] sm:$0xff] }
0x114e   : > { %6209 = vmatpush1.bf16.msra.mxu1 %v6208_v5  ;;  %v6610_v5 = vpack.c.bf16 %v4322_v7, %v4320_v6  ;;  %v3600_v7 = vld [vmem:[#allocation14 + $0xfa8] sm:$0xff] }
0x114f   : > { %6211 = vmatprep.subr.bf16.mxu1 %v6210_v21  ;;  %6593 = vmatpush1.bf16.msra.mxu0 %v6592_v55  ;;  %v4319_v21 = vld [vmem:[#allocation17 + $0x140] sm:$0xff]  ;;  %v6228_v55 = vpack.c.bf16 %v3439_v16, %v3423_v14  ;;  %v4337_v14 = vld [vmem:[#allocation17 + $0x1d0] sm:$0xff]  ;;  %v4340_v16 = vld [vmem:[#allocation17 + $0x1e8] sm:$0xff]  ;;  %v6246_v20 = vpack.c.bf16 %v3600_v7, %v3584_v4 }
0x1150   : > { %6595 = vmatprep.subr.bf16.mxu0 %v6594_v29  ;;  %v3455_v29 = vld [vmem:[#allocation14 + $0xb20] sm:$0xff]  ;;  %v6612_v34 = vpack.c.bf16 %v4321_v23, %v4319_v21  ;;  %v3106_v23 = vld [vmem:[#allocation14 + $0x38] sm:$0xff]  ;;  %v3281_v4 = vld [vmem:[#allocation14 + $0x5b0] sm:$0xff] }
0x1151   : > { %v3599_v21 = vld [vmem:[#allocation14 + $0xfa0] sm:$0xff]  ;;  %v3314_v7 = vld [vmem:[#allocation14 + $0x6b8] sm:$0xff] }
0x1152   : > { %6213 = vmatpush1.bf16.msra.mxu1 %v6212_v36  ;;  %v6614_v36 = vpack.c.bf16 %v4326_v27, %v4324_v26  ;;  %v3122_v27 = vld [vmem:[#allocation14 + $0xb8] sm:$0xff] }
0x1153   : > { %6215 = vmatprep.subr.bf16.mxu1 %v6214_v24  ;;  %6597 = vmatpush1.bf16.msra.mxu0 %v6596_v42  ;;  %v4323_v24 = vld [vmem:[#allocation17 + $0x160] sm:$0xff]  ;;  %v6232_v42 = vpack.c.bf16 %v3471_v32, %v3455_v29  ;;  %v4341_v29 = vld [vmem:[#allocation17 + $0x1f0] sm:$0xff]  ;;  %v4344_v32 = vld [vmem:[#allocation17 + $0x208] sm:$0xff]  ;;  %v6250_v35 = vpack.c.bf16 %v3122_v27, %v3106_v23 }
0x1154   : > { %6599 = vmatprep.subr.bf16.mxu0 %v6598_v43  ;;  %v3487_v43 = vld [vmem:[#allocation14 + $0xc20] sm:$0xff]  ;;  %v6616_v44 = vpack.c.bf16 %v4325_v54, %v4323_v24  ;;  %v3121_v24 = vld [vmem:[#allocation14 + $0xb0] sm:$0xff]  ;;  %v3378_v27 = vld [vmem:[#allocation14 + $0x8b8] sm:$0xff] }
0x1155   : > { %v3345_v23 = vld [vmem:[#allocation14 + $0x7b0] sm:$0xff] }
0x1156   : > { %6217 = vmatpush1.bf16.msra.mxu1 %v6216_v50  ;;  %v6618_v50 = vpack.c.bf16 %v4330_v38, %v4328_v25  ;;  %v3138_v25 = vld [vmem:[#allocation14 + $0x138] sm:$0xff] }
0x1157   : > { %6219 = vmatprep.subr.bf16.mxu1 %v6218_v51  ;;  %6601 = vmatpush1.bf16.msra.mxu0 %v6600_v31  ;;  %v4327_v51 = vld [vmem:[#allocation17 + $0x180] sm:$0xff]  ;;  %v6236_v31 = vpack.c.bf16 %v3503_v45, %v3487_v43  ;;  %v3154_v38 = vld [vmem:[#allocation14 + $0x1b8] sm:$0xff] }
0x1158   : > { %6603 = vmatprep.subr.bf16.mxu0 %v6602_v53  ;;  %v3519_v53 = vld [vmem:[#allocation14 + $0xd20] sm:$0xff]  ;;  %v6620_v58 = vpack.c.bf16 %v4329_v19, %v4327_v51  ;;  %v6254_v43 = vpack.c.bf16 %v3154_v38, %v3138_v25  ;;  %v3137_v45 = vld [vmem:[#allocation14 + $0x130] sm:$0xff]  ;;  %v3426_v25 = vld [vmem:[#allocation14 + $0xa38] sm:$0xff] }
0x1159   : > { %v3169_v19 = vld [vmem:[#allocation14 + $0x230] sm:$0xff]  ;;  %v3442_v38 = vld [vmem:[#allocation14 + $0xab8] sm:$0xff] }
0x115a   : > { %6221 = vmatpush1.bf16.msra.mxu1 %v6220_v60  ;;  %v6622_v60 = vpack.c.bf16 %v4334_v1, %v4332_v11  ;;  %v3185_v11 = vld [vmem:[#allocation14 + $0x2b0] sm:$0xff]  ;;  %v3202_v1 = vld [vmem:[#allocation14 + $0x338] sm:$0xff] }
0x115b   : > { %6223 = vmatprep.subr.bf16.mxu1 %v6222_v61  ;;  %6605 = vmatpush1.bf16.msra.mxu0 %v6604_v0  ;;  %v4331_v61 = vld [vmem:[#allocation17 + $0x1a0] sm:$0xff]  ;;  %v6240_v0 = vpack.c.bf16 %v3535_v56, %v3519_v53 }
0x115c   : > { %6607 = vmatprep.subr.bf16.mxu0 %v6606_v2  ;;  %v3551_v2 = vld [vmem:[#allocation14 + $0xe20] sm:$0xff]  ;;  %v6624_v6 = vpack.c.bf16 %v4333_v62, %v4331_v61  ;;  %v3201_v56 = vld [vmem:[#allocation14 + $0x330] sm:$0xff] }
0x115d   : > { %v3233_v62 = vld [vmem:[#allocation14 + $0x430] sm:$0xff] }
0x115e   : > { %6225 = vmatpush1.bf16.msra.mxu1 %v6224_v8  ;;  %v6626_v8 = vpack.c.bf16 %v4338_v17, %v4336_v63  ;;  %v3249_v63 = vld [vmem:[#allocation14 + $0x4b0] sm:$0xff]  ;;  %v3266_v17 = vld [vmem:[#allocation14 + $0x538] sm:$0xff] }
0x115f   : > { %6227 = vmatprep.subr.bf16.mxu1 %v6226_v41  ;;  %6609 = vmatpush1.bf16.msra.mxu0 %v6608_v18  ;;  %v4335_v41 = vld [vmem:[#allocation17 + $0x1c0] sm:$0xff]  ;;  %v6244_v18 = vpack.c.bf16 %v3567_v3, %v3551_v2 }
0x1160   : > { %6611 = vmatprep.subr.bf16.mxu0 %v6610_v5  ;;  %v3583_v5 = vld [vmem:[#allocation14 + $0xf20] sm:$0xff]  ;;  %v6628_v26 = vpack.c.bf16 %v4337_v14, %v4335_v41  ;;  %v3265_v3 = vld [vmem:[#allocation14 + $0x530] sm:$0xff] }
0x1161   : > { %v3297_v14 = vld [vmem:[#allocation14 + $0x630] sm:$0xff] }
0x1162   : > { %6229 = vmatpush1.bf16.msra.mxu1 %v6228_v55  ;;  %v6630_v55 = vpack.c.bf16 %v4342_v39, %v4340_v16  ;;  %v3313_v16 = vld [vmem:[#allocation14 + $0x6b0] sm:$0xff]  ;;  %v3330_v39 = vld [vmem:[#allocation14 + $0x738] sm:$0xff] }
0x1163   : > { %6231 = vmatprep.subr.bf16.mxu1 %v6230_v28  ;;  %6613 = vmatpush1.bf16.msra.mxu0 %v6612_v34  ;;  %v4339_v28 = vld [vmem:[#allocation17 + $0x1e0] sm:$0xff]  ;;  %v6248_v34 = vpack.c.bf16 %v3599_v21, %v3583_v5 }
0x1164   : > { %6615 = vmatprep.subr.bf16.mxu0 %v6614_v36  ;;  %v3105_v36 = vld [vmem:[#allocation14 + $0x30] sm:$0xff]  ;;  %v6632_v54 = vpack.c.bf16 %v4341_v29, %v4339_v28 }
0x1165   : > { %v3329_v21 = vld [vmem:[#allocation14 + $0x730] sm:$0xff] }
0x1166   : > { %6233 = vmatpush1.bf16.msra.mxu1 %v6232_v42  ;;  %v6634_v42 = vpack.c.bf16 %v4346_v33, %v4344_v32  ;;  %v3361_v29 = vld [vmem:[#allocation14 + $0x830] sm:$0xff]  ;;  %v3394_v33 = vld [vmem:[#allocation14 + $0x938] sm:$0xff] }
0x1167   : > { %6235 = vmatprep.subr.bf16.mxu1 %v6234_v30  ;;  %6617 = vmatpush1.bf16.msra.mxu0 %v6616_v44  ;;  %v6252_v30 = vpack.c.bf16 %v3121_v24, %v3105_v36  ;;  %v3170_v44 = vld [vmem:[#allocation14 + $0x238] sm:$0xff]  ;;  %v3377_v32 = vld [vmem:[#allocation14 + $0x8b0] sm:$0xff] }
0x1168   : > { %6619 = vmatprep.subr.bf16.mxu0 %v6618_v50  ;;  %v6256_v50 = vpack.c.bf16 %v3153_v46, %v3137_v45  ;;  %v6258_v51 = vpack.c.bf16 %v3186_v49, %v3170_v44  ;;  %v3393_v24 = vld [vmem:[#allocation14 + $0x930] sm:$0xff]  ;;  %v3458_v46 = vld [vmem:[#allocation14 + $0xb38] sm:$0xff] }
0x1169   : > { %v3441_v45 = vld [vmem:[#allocation14 + $0xab0] sm:$0xff]  ;;  %v3474_v44 = vld [vmem:[#allocation14 + $0xbb8] sm:$0xff] }
0x116a   : > { %6237 = vmatpush1.bf16.msra.mxu1 %v6236_v31  ;;  %v3218_v31 = vld [vmem:[#allocation14 + $0x3b8] sm:$0xff] }
0x116b   : > { %6239 = vmatprep.subr.bf16.mxu1 %v6238_v52  ;;  %6621 = vmatpush1.bf16.msra.mxu0 %v6620_v58  ;;  %v6260_v52 = vpack.c.bf16 %v3185_v11, %v3169_v19  ;;  %v6262_v53 = vpack.c.bf16 %v3218_v31, %v3202_v1  ;;  %v3234_v58 = vld [vmem:[#allocation14 + $0x438] sm:$0xff]  ;;  %v3473_v19 = vld [vmem:[#allocation14 + $0xbb0] sm:$0xff] }
0x116c   : > { %6623 = vmatprep.subr.bf16.mxu0 %v6622_v60  ;;  %v6264_v60 = vpack.c.bf16 %v3217_v57, %v3201_v56  ;;  %v6266_v61 = vpack.c.bf16 %v3250_v59, %v3234_v58  ;;  %v3490_v11 = vld [vmem:[#allocation14 + $0xc38] sm:$0xff]  ;;  %v3505_v56 = vld [vmem:[#allocation14 + $0xcb0] sm:$0xff] }
0x116d   : > { %v3506_v1 = vld [vmem:[#allocation14 + $0xcb8] sm:$0xff] }
0x116e   : > { %6241 = vmatpush1.bf16.msra.mxu1 %v6240_v0  ;;  %v3282_v0 = vld [vmem:[#allocation14 + $0x5b8] sm:$0xff] }
0x116f   : > { %6243 = vmatprep.subr.bf16.mxu1 %v6242_v22  ;;  %6625 = vmatpush1.bf16.msra.mxu0 %v6624_v6  ;;  %v6268_v22 = vpack.c.bf16 %v3249_v63, %v3233_v62  ;;  %v6270_v2 = vpack.c.bf16 %v3282_v0, %v3266_v17  ;;  %v3298_v6 = vld [vmem:[#allocation14 + $0x638] sm:$0xff]  ;;  %v3537_v62 = vld [vmem:[#allocation14 + $0xdb0] sm:$0xff] }
0x1170   : > { %6627 = vmatprep.subr.bf16.mxu0 %v6626_v8  ;;  %v6272_v8 = vpack.c.bf16 %v3281_v4, %v3265_v3  ;;  %v6274_v41 = vpack.c.bf16 %v3314_v7, %v3298_v6  ;;  %v3522_v57 = vld [vmem:[#allocation14 + $0xd38] sm:$0xff]  ;;  %v3569_v3 = vld [vmem:[#allocation14 + $0xeb0] sm:$0xff] }
0x1171   : > { %v3538_v58 = vld [vmem:[#allocation14 + $0xdb8] sm:$0xff] }
0x1172   : > { %6245 = vmatpush1.bf16.msra.mxu1 %v6244_v18  ;;  %v3346_v18 = vld [vmem:[#allocation14 + $0x7b8] sm:$0xff] }
0x1173   : > { %6247 = vmatprep.subr.bf16.mxu1 %v6246_v20  ;;  %6629 = vmatpush1.bf16.msra.mxu0 %v6628_v26  ;;  %v6276_v20 = vpack.c.bf16 %v3313_v16, %v3297_v14  ;;  %v6278_v5 = vpack.c.bf16 %v3346_v18, %v3330_v39  ;;  %v3362_v26 = vld [vmem:[#allocation14 + $0x838] sm:$0xff]  ;;  %v3601_v14 = vld [vmem:[#allocation14 + $0xfb0] sm:$0xff] }
0x1174   : > { %6631 = vmatprep.subr.bf16.mxu0 %v6630_v55  ;;  %v6280_v55 = vpack.c.bf16 %v3345_v23, %v3329_v21  ;;  %v6282_v28 = vpack.c.bf16 %v3378_v27, %v3362_v26  ;;  %v3554_v63 = vld [vmem:[#allocation14 + $0xe38] sm:$0xff]  ;;  %v3125_v21 = vld [vmem:[#allocation14 + $0xd0] sm:$0xff] }
0x1175   : > { %v3570_v17 = vld [vmem:[#allocation14 + $0xeb8] sm:$0xff] }
0x1176   : > { %6249 = vmatpush1.bf16.msra.mxu1 %v6248_v34  ;;  %v3410_v34 = vld [vmem:[#allocation14 + $0x9b8] sm:$0xff] }
0x1177   : > { %6251 = vmatprep.subr.bf16.mxu1 %v6250_v35  ;;  %6633 = vmatpush1.bf16.msra.mxu0 %v6632_v54  ;;  %v6284_v35 = vpack.c.bf16 %v3377_v32, %v3361_v29  ;;  %v6286_v36 = vpack.c.bf16 %v3410_v34, %v3394_v33  ;;  %v3409_v54 = vld [vmem:[#allocation14 + $0x9b0] sm:$0xff]  ;;  %v3586_v4 = vld [vmem:[#allocation14 + $0xf38] sm:$0xff] }
0x1178   : > { %6635 = vmatprep.subr.bf16.mxu0 %v6634_v42  ;;  %v6288_v42 = vpack.c.bf16 %v3409_v54, %v3393_v24  ;;  %v3602_v6 = vld [vmem:[#allocation14 + $0xfb8] sm:$0xff]  ;;  %v3157_v29 = vld [vmem:[#allocation14 + $0x1d0] sm:$0xff] }
0x1179   : > { %3902 = vmatmul.mubr.f32.vlgmr.msra.gmra.mrb[28].mxu1 %v8555_v47  ;;  %v3110_v16 = vld [vmem:[#allocation14 + $0x58] sm:$0xff]  ;;  %v3189_v24 = vld [vmem:[#allocation14 + $0x2d0] sm:$0xff] }
0x117a   : > { %6253 = vmatpush1.bf16.msra.mxu1 %v6252_v30  ;;  %3972 = vmatprep.mubr.f32.mxu1 %v8557_v48  ;;  %v6290_v30 = vpack.c.bf16 %v3442_v38, %v3426_v25  ;;  %v3126_v39 = vld [vmem:[#allocation14 + $0xd8] sm:$0xff] }
0x117b   : > { %6255 = vmatprep.subr.bf16.mxu1 %v6254_v43  ;;  %v3425_v43 = vld [vmem:[#allocation14 + $0xa30] sm:$0xff]  ;;  %v3142_v23 = vld [vmem:[#allocation14 + $0x158] sm:$0xff] }
0x117c   : > { %v6292_v49 = vpack.c.bf16 %v3441_v45, %v3425_v43  ;;  %v3158_v26 = vld [vmem:[#allocation14 + $0x1d8] sm:$0xff]  ;;  %v3221_v43 = vld [vmem:[#allocation14 + $0x3d0] sm:$0xff] }
0x117d   : > { %v3174_v32 = vld [vmem:[#allocation14 + $0x258] sm:$0xff] }
0x117e   : > { %6257 = vmatpush1.bf16.msra.mxu1 %v6256_v50  ;;  %v6294_v50 = vpack.c.bf16 %v3474_v44, %v3458_v46  ;;  %v3190_v33 = vld [vmem:[#allocation14 + $0x2d8] sm:$0xff] }
0x117f   : > { %6259 = vmatprep.subr.bf16.mxu1 %v6258_v51  ;;  %v3457_v51 = vld [vmem:[#allocation14 + $0xb30] sm:$0xff]  ;;  %v3206_v54 = vld [vmem:[#allocation14 + $0x358] sm:$0xff] }
0x1180   : > { %v6296_v31 = vpack.c.bf16 %v3473_v19, %v3457_v51  ;;  %v3222_v25 = vld [vmem:[#allocation14 + $0x3d8] sm:$0xff]  ;;  %v3253_v51 = vld [vmem:[#allocation14 + $0x4d0] sm:$0xff] }
0x1181   : > { %v3238_v45 = vld [vmem:[#allocation14 + $0x458] sm:$0xff] }
0x1182   : > { %6261 = vmatpush1.bf16.msra.mxu1 %v6260_v52  ;;  %v6298_v52 = vpack.c.bf16 %v3506_v1, %v3490_v11  ;;  %v3254_v46 = vld [vmem:[#allocation14 + $0x4d8] sm:$0xff] }
0x1183   : > { %6263 = vmatprep.subr.bf16.mxu1 %v6262_v53  ;;  %v3489_v53 = vld [vmem:[#allocation14 + $0xc30] sm:$0xff]  ;;  %v3270_v19 = vld [vmem:[#allocation14 + $0x558] sm:$0xff] }
0x1184   : > { %v6300_v59 = vpack.c.bf16 %v3505_v56, %v3489_v53  ;;  %v3286_v11 = vld [vmem:[#allocation14 + $0x5d8] sm:$0xff]  ;;  %v3269_v53 = vld [vmem:[#allocation14 + $0x550] sm:$0xff] }
0x1185   : > { %v3285_v56 = vld [vmem:[#allocation14 + $0x5d0] sm:$0xff] }
0x1186   : > { %6265 = vmatpush1.bf16.msra.mxu1 %v6264_v60  ;;  %v6302_v60 = vpack.c.bf16 %v3538_v58, %v3522_v57  ;;  %v3302_v57 = vld [vmem:[#allocation14 + $0x658] sm:$0xff] }
0x1187   : > { %6267 = vmatprep.subr.bf16.mxu1 %v6266_v61  ;;  %v3521_v61 = vld [vmem:[#allocation14 + $0xd30] sm:$0xff]  ;;  %v3318_v58 = vld [vmem:[#allocation14 + $0x6d8] sm:$0xff] }
0x1188   : > { %v6304_v0 = vpack.c.bf16 %v3537_v62, %v3521_v61  ;;  %v6400_v61 = vpack.c.bf16 %v3285_v56, %v3269_v53  ;;  %v6402_v62 = vpack.c.bf16 %v3318_v58, %v3302_v57  ;;  %v3446_v53 = vld [vmem:[#allocation14 + $0xad8] sm:$0xff]  ;;  %v4355_v57 = vld [vmem:[#allocation17 + $0x260] sm:$0xff]  ;;  %v4357_v58 = vld [vmem:[#allocation17 + $0x270] sm:$0xff] }
0x118a   : > { %6269 = vmatpush1.bf16.msra.mxu1 %v6268_v22  ;;  %v6306_v22 = vpack.c.bf16 %v3570_v17, %v3554_v63  ;;  %v3301_v63 = vld [vmem:[#allocation14 + $0x650] sm:$0xff] }
0x118b   : > { %6271 = vmatprep.subr.bf16.mxu1 %v6270_v2  ;;  %v3553_v2 = vld [vmem:[#allocation14 + $0xe30] sm:$0xff] }
0x118c   : > { %v6308_v7 = vpack.c.bf16 %v3569_v3, %v3553_v2  ;;  %v3317_v17 = vld [vmem:[#allocation14 + $0x6d0] sm:$0xff]  ;;  %v3334_v2 = vld [vmem:[#allocation14 + $0x758] sm:$0xff] }
0x118d   : > { %v3350_v3 = vld [vmem:[#allocation14 + $0x7d8] sm:$0xff] }
0x118e   : > { %6273 = vmatpush1.bf16.msra.mxu1 %v6272_v8  ;;  %v6310_v8 = vpack.c.bf16 %v3602_v6, %v3586_v4 }
0x118f   : > { %6275 = vmatprep.subr.bf16.mxu1 %v6274_v41  ;;  %v3585_v41 = vld [vmem:[#allocation14 + $0xf30] sm:$0xff] }
0x1190   : > { %v6312_v18 = vpack.c.bf16 %v3601_v14, %v3585_v41  ;;  %v4345_v41 = vld [vmem:[#allocation17 + $0x210] sm:$0xff] }
0x1192   : > { %6277 = vmatpush1.bf16.msra.mxu1 %v6276_v20  ;;  %v6378_v20 = vpack.c.bf16 %v3126_v39, %v3110_v16  ;;  %v6404_v16 = vpack.c.bf16 %v3317_v17, %v3301_v63  ;;  %v4348_v39 = vld [vmem:[#allocation17 + $0x228] sm:$0xff]  ;;  %v3429_v63 = vld [vmem:[#allocation14 + $0xa50] sm:$0xff] }
0x1193   : > { %6279 = vmatprep.subr.bf16.mxu1 %v6278_v5  ;;  %v3109_v5 = vld [vmem:[#allocation14 + $0x50] sm:$0xff] }
0x1194   : > { %v6380_v27 = vpack.c.bf16 %v3125_v21, %v3109_v5  ;;  %v3333_v5 = vld [vmem:[#allocation14 + $0x750] sm:$0xff] }
0x1195   : > { %v3349_v21 = vld [vmem:[#allocation14 + $0x7d0] sm:$0xff] }
0x1196   : > { %6281 = vmatpush1.bf16.msra.mxu1 %v6280_v55  ;;  %v6382_v55 = vpack.c.bf16 %v3158_v26, %v3142_v23  ;;  %v3445_v17 = vld [vmem:[#allocation14 + $0xad0] sm:$0xff] }
0x1197   : > { %6283 = vmatprep.subr.bf16.mxu1 %v6282_v28  ;;  %v3141_v28 = vld [vmem:[#allocation14 + $0x150] sm:$0xff] }
0x1198   : > { %v6384_v34 = vpack.c.bf16 %v3157_v29, %v3141_v28 }
0x119a   : > { %6285 = vmatpush1.bf16.msra.mxu1 %v6284_v35  ;;  %v6386_v35 = vpack.c.bf16 %v3190_v33, %v3174_v32  ;;  %v4347_v32 = vld [vmem:[#allocation17 + $0x220] sm:$0xff]  ;;  %v4349_v33 = vld [vmem:[#allocation17 + $0x230] sm:$0xff] }
0x119b   : > { %6287 = vmatprep.subr.bf16.mxu1 %v6286_v36  ;;  %v3173_v36 = vld [vmem:[#allocation14 + $0x250] sm:$0xff] }
0x119c   : > { %v6388_v38 = vpack.c.bf16 %v3189_v24, %v3173_v36  ;;  %v4354_v36 = vld [vmem:[#allocation17 + $0x258] sm:$0xff] }
0x119e   : > { %6289 = vmatpush1.bf16.msra.mxu1 %v6288_v42  ;;  %v6390_v42 = vpack.c.bf16 %v3222_v25, %v3206_v54  ;;  %v3365_v54 = vld [vmem:[#allocation14 + $0x850] sm:$0xff] }
0x119f   : > { %6291 = vmatprep.subr.bf16.mxu1 %v6290_v30  ;;  %v3205_v30 = vld [vmem:[#allocation14 + $0x350] sm:$0xff] }
0x11a0   : > { %v6392_v44 = vpack.c.bf16 %v3221_v43, %v3205_v30  ;;  %v3381_v25 = vld [vmem:[#allocation14 + $0x8d0] sm:$0xff]  ;;  %v3414_v30 = vld [vmem:[#allocation14 + $0x9d8] sm:$0xff] }
0x11a2   : > { %6293 = vmatpush1.bf16.msra.mxu1 %v6292_v49  ;;  %v6394_v49 = vpack.c.bf16 %v3254_v46, %v3238_v45  ;;  %v4351_v45 = vld [vmem:[#allocation17 + $0x240] sm:$0xff]  ;;  %v4353_v46 = vld [vmem:[#allocation17 + $0x250] sm:$0xff] }
0x11a3   : > { %6295 = vmatprep.subr.bf16.mxu1 %v6294_v50  ;;  %v3237_v50 = vld [vmem:[#allocation14 + $0x450] sm:$0xff] }
0x11a4   : > { %v6396_v1 = vpack.c.bf16 %v3253_v51, %v3237_v50  ;;  %v4358_v50 = vld [vmem:[#allocation17 + $0x278] sm:$0xff] }
0x11a6   : > { %6297 = vmatpush1.bf16.msra.mxu1 %v6296_v31  ;;  %v8572_v31 = vld [vmem:[#allocation16] sm:$0xff] }
0x11a7   : > { %6299 = vmatprep.subr.bf16.mxu1 %v6298_v52  ;;  %v6398_v52 = vpack.c.bf16 %v3286_v11, %v3270_v19  ;;  %v3397_v19 = vld [vmem:[#allocation14 + $0x950] sm:$0xff] }
0x11a8   : > { %v3413_v11 = vld [vmem:[#allocation14 + $0x9d0] sm:$0xff] }
0x11aa   : > { %6301 = vmatpush1.bf16.msra.mxu1 %v6300_v59  ;;  %v3618_v59 = vrot.slane %v8572_v31, %v8326_v10 }
0x11ab   : > { %6303 = vmatprep.subr.bf16.mxu1 %v6302_v60  ;;  %v3622_v60 = vrot.slane %v8572_v31, %v8336_v13 }
0x11ae   : > { %6305 = vmatpush1.bf16.msra.mxu1 %v6304_v0 }
0x11af   : > { %6307 = vmatprep.subr.bf16.mxu1 %v6306_v22 }
0x11b2   : > { %6309 = vmatpush1.bf16.msra.mxu1 %v6308_v7 }
0x11b3   : > { %6311 = vmatprep.subr.bf16.mxu1 %v6310_v8  ;;  %v4343_v8 = vld [vmem:[#allocation17 + $0x200] sm:$0xff] }
0x11b4   : > { %v6636_v26 = vpack.c.bf16 %v4345_v41, %v4343_v8  ;;  %v4361_v8 = vld [vmem:[#allocation17 + $0x290] sm:$0xff]  ;;  %v6420_v41 = vpack.c.bf16 %v3445_v17, %v3429_v63  ;;  %v3606_v63 = vld [vmem:[#allocation14 + $0xfd8] sm:$0xff] }
0x11b6   : > { %6313 = vmatpush1.bf16.msra.mxu1 %v6312_v18  ;;  %v4350_v18 = vld [vmem:[#allocation17 + $0x238] sm:$0xff] }
0x11b7   : > { %6379 = vmatprep.subr.bf16.mxu1 %v6378_v20  ;;  %v6406_v20 = vpack.c.bf16 %v3350_v3, %v3334_v2  ;;  %v6638_v29 = vpack.c.bf16 %v4350_v18, %v4348_v39  ;;  %v3462_v2 = vld [vmem:[#allocation14 + $0xb58] sm:$0xff]  ;;  %v3461_v18 = vld [vmem:[#allocation14 + $0xb50] sm:$0xff] }
0x11b8   : > { %v3478_v3 = vld [vmem:[#allocation14 + $0xbd8] sm:$0xff] }
0x11b9   : > { %3973 = vmatmul.mubr.f32.vlgmr.msra.gmra.mrb[30].mxu1 %v8555_v47  ;;  %v6422_v39 = vpack.c.bf16 %v3478_v3, %v3462_v2  ;;  %v4377_v2 = vld [vmem:[#allocation17 + $0x310] sm:$0xff] }
0x11ba   : > { %6381 = vmatpush1.bf16.msra.mxu1 %v6380_v27  ;;  %4114 = vmatprep.mubr.f32.mxu1 %v8557_v48  ;;  %v3366_v27 = vld [vmem:[#allocation14 + $0x858] sm:$0xff] }
0x11bb   : > { %6383 = vmatprep.subr.bf16.mxu1 %v6382_v55  ;;  %v3382_v55 = vld [vmem:[#allocation14 + $0x8d8] sm:$0xff] }
0x11bc   : > { %v6410_v24 = vpack.c.bf16 %v3382_v55, %v3366_v27  ;;  %v4363_v27 = vld [vmem:[#allocation17 + $0x2a0] sm:$0xff]  ;;  %v4365_v55 = vld [vmem:[#allocation17 + $0x2b0] sm:$0xff] }
0x11be   : > { %6385 = vmatpush1.bf16.msra.mxu1 %v6384_v34  ;;  %v6408_v34 = vpack.c.bf16 %v3349_v21, %v3333_v5  ;;  %v3494_v21 = vld [vmem:[#allocation14 + $0xc58] sm:$0xff] }
0x11bf   : > { %6387 = vmatprep.subr.bf16.mxu1 %v6386_v35  ;;  %v4352_v35 = vld [vmem:[#allocation17 + $0x248] sm:$0xff] }
0x11c0   : > { %v6642_v43 = vpack.c.bf16 %v4354_v36, %v4352_v35  ;;  %v3509_v35 = vld [vmem:[#allocation14 + $0xcd0] sm:$0xff]  ;;  %v6656_v36 = vpack.c.bf16 %v4365_v55, %v4363_v27  ;;  %v4386_v27 = vld [vmem:[#allocation17 + $0x358] sm:$0xff] }
0x11c2   : > { %6389 = vmatpush1.bf16.msra.mxu1 %v6388_v38  ;;  %v6640_v38 = vpack.c.bf16 %v4349_v33, %v4347_v32  ;;  %v4370_v32 = vld [vmem:[#allocation17 + $0x2d8] sm:$0xff] }
0x11c3   : > { %6391 = vmatprep.subr.bf16.mxu1 %v6390_v42  ;;  %v3398_v42 = vld [vmem:[#allocation14 + $0x958] sm:$0xff] }
0x11c4   : > { %v6414_v51 = vpack.c.bf16 %v3414_v30, %v3398_v42  ;;  %v4369_v42 = vld [vmem:[#allocation17 + $0x2d0] sm:$0xff] }
0x11c6   : > { %6393 = vmatpush1.bf16.msra.mxu1 %v6392_v44  ;;  %v6412_v44 = vpack.c.bf16 %v3381_v25, %v3365_v54  ;;  %v3542_v54 = vld [vmem:[#allocation14 + $0xdd8] sm:$0xff] }
0x11c7   : > { %6395 = vmatprep.subr.bf16.mxu1 %v6394_v49  ;;  %v4356_v49 = vld [vmem:[#allocation17 + $0x268] sm:$0xff] }
0x11c8   : > { %v6646_v56 = vpack.c.bf16 %v4358_v50, %v4356_v49  ;;  %v3541_v49 = vld [vmem:[#allocation14 + $0xdd0] sm:$0xff] }
0x11ca   : > { %6397 = vmatpush1.bf16.msra.mxu1 %v6396_v1  ;;  %v6644_v1 = vpack.c.bf16 %v4353_v46, %v4351_v45  ;;  %v4374_v45 = vld [vmem:[#allocation17 + $0x2f8] sm:$0xff] }
0x11cb   : > { %6399 = vmatprep.subr.bf16.mxu1 %v6398_v52  ;;  %v3430_v52 = vld [vmem:[#allocation14 + $0xa58] sm:$0xff] }
0x11cc   : > { %v3761_v0 = vpop.f32.mrb[24].mxu1  ;;  %v8578_v22 = vpop.f32.mrb[16].mxu0 }
0x11cd   : > { %v3762_v4 = vadd.f32 %v3761_v0, %v3618_v59  ;;  %v3763_v6 = vpop.f32.mrb[25].mxu1  ;;  %v8580_v7 = vpop.f32.mrb[17].mxu0  ;;  %v6416_v59 = vpack.c.bf16 %v3413_v11, %v3397_v19  ;;  %v6648_v0 = vpack.c.bf16 %v4357_v58, %v4355_v57  ;;  %v3574_v19 = vld [vmem:[#allocation14 + $0xed8] sm:$0xff]  ;;  %v4378_v57 = vld [vmem:[#allocation17 + $0x318] sm:$0xff] }
0x11ce   : > { %v3764_v14 = vadd.f32 %v3763_v6, %v3622_v60  ;;  %6401 = vmatpush1.bf16.msra.mxu1 %v6400_v61  ;;  %v4360_v60 = vld [vmem:[#allocation17 + $0x288] sm:$0xff]  ;;  %v4362_v61 = vld [vmem:[#allocation17 + $0x298] sm:$0xff]  ;;  %v4359_v6 = vld [vmem:[#allocation17 + $0x280] sm:$0xff] }
0x11cf   : > { %6403 = vmatprep.subr.bf16.mxu1 %v6402_v62  ;;  %v4263_v28 = vmax.f32 %v3762_v4, 0.0  ;;  %v6418_v62 = vpack.c.bf16 %v3446_v53, %v3430_v52  ;;  %v6650_v4 = vpack.c.bf16 %v4362_v61, %v4360_v60  ;;  %v6652_v5 = vpack.c.bf16 %v4361_v8, %v4359_v6  ;;  %v4373_v52 = vld [vmem:[#allocation17 + $0x2f0] sm:$0xff]  ;;  %v3573_v60 = vld [vmem:[#allocation14 + $0xed0] sm:$0xff]  ;;  %v4382_v6 = vld [vmem:[#allocation17 + $0x338] sm:$0xff] }
0x11d0   : > { %v4264_v23 = vmax.f32 %v3764_v14, 0.0  ;;  %v4364_v14 = vld [vmem:[#allocation17 + $0x2a8] sm:$0xff] }
0x11d2   : > { %6405 = vmatpush1.bf16.msra.mxu1 %v6404_v16  ;;  %4867 = vmatprep.mubr.f32.mxu0 %v4264_v23  ;;  %v4366_v16 = vld [vmem:[#allocation17 + $0x2b8] sm:$0xff]  ;;  %v3510_v23 = vld [vmem:[#allocation14 + $0xcd8] sm:$0xff] }
0x11d3   : > { %4868 = vmatmul.mubr.f32.vlgmr.msra.gmra.mrb[20].mxu0 %v4263_v28  ;;  %6407 = vmatprep.subr.bf16.mxu1 %v6406_v20  ;;  %v3477_v20 = vld [vmem:[#allocation14 + $0xbd0] sm:$0xff]  ;;  %v6426_v33 = vpack.c.bf16 %v3510_v23, %v3494_v21  ;;  %v4381_v21 = vld [vmem:[#allocation17 + $0x330] sm:$0xff] }
0x11d4   : > { %6637 = vmatpush1.bf16.msra.mxu0 %v6636_v26  ;;  %v6654_v26 = vpack.c.bf16 %v4366_v16, %v4364_v14  ;;  %v6424_v28 = vpack.c.bf16 %v3477_v20, %v3461_v18  ;;  %v3605_v14 = vld [vmem:[#allocation14 + $0xfd0] sm:$0xff]  ;;  %v3130_v18 = vld [vmem:[#allocation14 + $0xf8] sm:$0xff] }
0x11d5   : > { %6639 = vmatprep.subr.bf16.mxu0 %v6638_v29  ;;  %v4368_v29 = vld [vmem:[#allocation17 + $0x2c8] sm:$0xff] }
0x11d6   : > { %6409 = vmatpush1.bf16.msra.mxu1 %v6408_v34  ;;  %v3493_v34 = vld [vmem:[#allocation14 + $0xc50] sm:$0xff]  ;;  %v6658_v25 = vpack.c.bf16 %v4370_v32, %v4368_v29 }
0x11d7   : > { %6411 = vmatprep.subr.bf16.mxu1 %v6410_v24  ;;  %v3526_v24 = vld [vmem:[#allocation14 + $0xd58] sm:$0xff]  ;;  %v6428_v30 = vpack.c.bf16 %v3509_v35, %v3493_v34  ;;  %v3129_v29 = vld [vmem:[#allocation14 + $0xf0] sm:$0xff] }
0x11d8   : > { %6641 = vmatpush1.bf16.msra.mxu0 %v6640_v38  ;;  %v4367_v38 = vld [vmem:[#allocation17 + $0x2c0] sm:$0xff]  ;;  %v6430_v46 = vpack.c.bf16 %v3542_v54, %v3526_v24  ;;  %v3162_v34 = vld [vmem:[#allocation14 + $0x1f8] sm:$0xff]  ;;  %v4385_v24 = vld [vmem:[#allocation17 + $0x350] sm:$0xff] }
0x11d9   : > { %6643 = vmatprep.subr.bf16.mxu0 %v6642_v43  ;;  %v4372_v43 = vld [vmem:[#allocation17 + $0x2e8] sm:$0xff]  ;;  %v6660_v50 = vpack.c.bf16 %v4369_v42, %v4367_v38  ;;  %v4390_v38 = vld [vmem:[#allocation17 + $0x378] sm:$0xff] }
0x11da   : > { %6413 = vmatpush1.bf16.msra.mxu1 %v6412_v44  ;;  %v3525_v44 = vld [vmem:[#allocation14 + $0xd50] sm:$0xff]  ;;  %v6662_v11 = vpack.c.bf16 %v4374_v45, %v4372_v43 }
0x11db   : > { %6415 = vmatprep.subr.bf16.mxu1 %v6414_v51  ;;  %v3558_v51 = vld [vmem:[#allocation14 + $0xe58] sm:$0xff]  ;;  %v6432_v53 = vpack.c.bf16 %v3541_v49, %v3525_v44  ;;  %v3161_v43 = vld [vmem:[#allocation14 + $0x1f0] sm:$0xff] }
0x11dc   : > { %6645 = vmatpush1.bf16.msra.mxu0 %v6644_v1  ;;  %v4371_v1 = vld [vmem:[#allocation17 + $0x2e0] sm:$0xff]  ;;  %v6434_v58 = vpack.c.bf16 %v3574_v19, %v3558_v51  ;;  %v3194_v44 = vld [vmem:[#allocation14 + $0x2f8] sm:$0xff]  ;;  %v4389_v51 = vld [vmem:[#allocation17 + $0x370] sm:$0xff] }
0x11dd   : > { %6647 = vmatprep.subr.bf16.mxu0 %v6646_v56  ;;  %v4376_v56 = vld [vmem:[#allocation17 + $0x308] sm:$0xff]  ;;  %v6664_v61 = vpack.c.bf16 %v4373_v52, %v4371_v1  ;;  %v4394_v1 = vld [vmem:[#allocation17 + $0x398] sm:$0xff] }
0x11de   : > { %6417 = vmatpush1.bf16.msra.mxu1 %v6416_v59  ;;  %v3557_v59 = vld [vmem:[#allocation14 + $0xe50] sm:$0xff]  ;;  %v6666_v17 = vpack.c.bf16 %v4378_v57, %v4376_v56 }
0x11df   : > { %6419 = vmatprep.subr.bf16.mxu1 %v6418_v62  ;;  %v3590_v62 = vld [vmem:[#allocation14 + $0xf58] sm:$0xff]  ;;  %v6436_v3 = vpack.c.bf16 %v3573_v60, %v3557_v59  ;;  %v3193_v56 = vld [vmem:[#allocation14 + $0x2f0] sm:$0xff] }
0x11e0   : > { %6649 = vmatpush1.bf16.msra.mxu0 %v6648_v0  ;;  %v4375_v0 = vld [vmem:[#allocation17 + $0x300] sm:$0xff]  ;;  %v6438_v8 = vpack.c.bf16 %v3606_v63, %v3590_v62  ;;  %v3226_v59 = vld [vmem:[#allocation14 + $0x3f8] sm:$0xff]  ;;  %v4393_v62 = vld [vmem:[#allocation17 + $0x390] sm:$0xff] }
0x11e1   : > { %6651 = vmatprep.subr.bf16.mxu0 %v6650_v4  ;;  %v4380_v4 = vld [vmem:[#allocation17 + $0x328] sm:$0xff]  ;;  %v6668_v16 = vpack.c.bf16 %v4377_v2, %v4375_v0  ;;  %v4398_v0 = vld [vmem:[#allocation17 + $0x3b8] sm:$0xff] }
0x11e2   : > { %6421 = vmatpush1.bf16.msra.mxu1 %v6420_v41  ;;  %v3589_v41 = vld [vmem:[#allocation14 + $0xf50] sm:$0xff]  ;;  %v6670_v20 = vpack.c.bf16 %v4382_v6, %v4380_v4 }
0x11e3   : > { %6423 = vmatprep.subr.bf16.mxu1 %v6422_v39  ;;  %v3114_v39 = vld [vmem:[#allocation14 + $0x78] sm:$0xff]  ;;  %v6440_v23 = vpack.c.bf16 %v3605_v14, %v3589_v41  ;;  %v3225_v4 = vld [vmem:[#allocation14 + $0x3f0] sm:$0xff] }
0x11e4   : > { %6653 = vmatpush1.bf16.msra.mxu0 %v6652_v5  ;;  %v4379_v5 = vld [vmem:[#allocation17 + $0x320] sm:$0xff]  ;;  %v6506_v55 = vpack.c.bf16 %v3130_v18, %v3114_v39  ;;  %v3258_v41 = vld [vmem:[#allocation14 + $0x4f8] sm:$0xff]  ;;  %v4397_v39 = vld [vmem:[#allocation17 + $0x3b0] sm:$0xff] }
0x11e5   : > { %6655 = vmatprep.subr.bf16.mxu0 %v6654_v26  ;;  %v4384_v26 = vld [vmem:[#allocation17 + $0x348] sm:$0xff]  ;;  %v6672_v32 = vpack.c.bf16 %v4381_v21, %v4379_v5  ;;  %v4402_v5 = vld [vmem:[#allocation17 + $0x3d8] sm:$0xff] }
0x11e6   : > { %6425 = vmatpush1.bf16.msra.mxu1 %v6424_v28  ;;  %v3113_v28 = vld [vmem:[#allocation14 + $0x70] sm:$0xff]  ;;  %v6674_v35 = vpack.c.bf16 %v4386_v27, %v4384_v26 }
0x11e7   : > { %6427 = vmatprep.subr.bf16.mxu1 %v6426_v33  ;;  %v3146_v33 = vld [vmem:[#allocation14 + $0x178] sm:$0xff]  ;;  %v6508_v54 = vpack.c.bf16 %v3129_v29, %v3113_v28  ;;  %v3257_v26 = vld [vmem:[#allocation14 + $0x4f0] sm:$0xff] }
0x11e8   : > { %6657 = vmatpush1.bf16.msra.mxu0 %v6656_v36  ;;  %v4383_v36 = vld [vmem:[#allocation17 + $0x340] sm:$0xff]  ;;  %v6510_v42 = vpack.c.bf16 %v3162_v34, %v3146_v33  ;;  %v3290_v28 = vld [vmem:[#allocation14 + $0x5f8] sm:$0xff]  ;;  %v4401_v33 = vld [vmem:[#allocation17 + $0x3d0] sm:$0xff] }
0x11e9   : > { %6659 = vmatprep.subr.bf16.mxu0 %v6658_v25  ;;  %v4388_v25 = vld [vmem:[#allocation17 + $0x368] sm:$0xff]  ;;  %v6676_v45 = vpack.c.bf16 %v4385_v24, %v4383_v36  ;;  %v4406_v36 = vld [vmem:[#allocation17 + $0x3f8] sm:$0xff] }
0x11ea   : > { %6429 = vmatpush1.bf16.msra.mxu1 %v6428_v30  ;;  %v3145_v30 = vld [vmem:[#allocation14 + $0x170] sm:$0xff]  ;;  %v6678_v49 = vpack.c.bf16 %v4390_v38, %v4388_v25 }
0x11eb   : > { %6431 = vmatprep.subr.bf16.mxu1 %v6430_v46  ;;  %v3178_v46 = vld [vmem:[#allocation14 + $0x278] sm:$0xff]  ;;  %v6512_v19 = vpack.c.bf16 %v3161_v43, %v3145_v30  ;;  %v3289_v25 = vld [vmem:[#allocation14 + $0x5f0] sm:$0xff]  ;;  %v3626_v43 = vrot.slane %v8572_v31, %v8331_v12 }
0x11ec   : > { %6661 = vmatpush1.bf16.msra.mxu0 %v6660_v50  ;;  %v4387_v50 = vld [vmem:[#allocation17 + $0x360] sm:$0xff]  ;;  %v6514_v52 = vpack.c.bf16 %v3194_v44, %v3178_v46  ;;  %v3322_v30 = vld [vmem:[#allocation14 + $0x6f8] sm:$0xff]  ;;  %v4405_v44 = vld [vmem:[#allocation17 + $0x3f0] sm:$0xff] }
0x11ed   : > { %6663 = vmatprep.subr.bf16.mxu0 %v6662_v11  ;;  %v4392_v11 = vld [vmem:[#allocation17 + $0x388] sm:$0xff]  ;;  %v6680_v57 = vpack.c.bf16 %v4389_v51, %v4387_v50  ;;  %v4403_v46 = vld [vmem:[#allocation17 + $0x3e0] sm:$0xff] }
0x11ee   : > { %6433 = vmatpush1.bf16.msra.mxu1 %v6432_v53  ;;  %v3177_v53 = vld [vmem:[#allocation14 + $0x270] sm:$0xff]  ;;  %v6682_v60 = vpack.c.bf16 %v4394_v1, %v4392_v11  ;;  %v4408_v51 = vld [vmem:[#allocation17 + $0x408] sm:$0xff] }
0x11ef   : > { %6435 = vmatprep.subr.bf16.mxu1 %v6434_v58  ;;  %v3210_v58 = vld [vmem:[#allocation14 + $0x378] sm:$0xff]  ;;  %v6516_v63 = vpack.c.bf16 %v3193_v56, %v3177_v53  ;;  %v3305_v1 = vld [vmem:[#allocation14 + $0x670] sm:$0xff] }
0x11f0   : > { %6665 = vmatpush1.bf16.msra.mxu0 %v6664_v61  ;;  %v4391_v61 = vld [vmem:[#allocation17 + $0x380] sm:$0xff]  ;;  %v6518_v2 = vpack.c.bf16 %v3226_v59, %v3210_v58  ;;  %v3338_v58 = vld [vmem:[#allocation14 + $0x778] sm:$0xff] }
0x11f1   : > { %6667 = vmatprep.subr.bf16.mxu0 %v6666_v17  ;;  %v4396_v17 = vld [vmem:[#allocation17 + $0x3a8] sm:$0xff]  ;;  %v6684_v6 = vpack.c.bf16 %v4393_v62, %v4391_v61 }
0x11f2   : > { %6437 = vmatpush1.bf16.msra.mxu1 %v6436_v3  ;;  %v3209_v3 = vld [vmem:[#allocation14 + $0x370] sm:$0xff]  ;;  %v6686_v14 = vpack.c.bf16 %v4398_v0, %v4396_v17  ;;  %v3354_v59 = vld [vmem:[#allocation14 + $0x7f8] sm:$0xff]  ;;  %v4409_v0 = vld [vmem:[#allocation17 + $0x410] sm:$0xff] }
0x11f3   : > { %6439 = vmatprep.subr.bf16.mxu1 %v6438_v8  ;;  %v3242_v8 = vld [vmem:[#allocation14 + $0x478] sm:$0xff]  ;;  %v6520_v18 = vpack.c.bf16 %v3225_v4, %v3209_v3  ;;  %v4407_v17 = vld [vmem:[#allocation17 + $0x400] sm:$0xff] }
0x11f4   : > { %6669 = vmatpush1.bf16.msra.mxu0 %v6668_v16  ;;  %v4395_v16 = vld [vmem:[#allocation17 + $0x3a0] sm:$0xff]  ;;  %v6522_v21 = vpack.c.bf16 %v3258_v41, %v3242_v8  ;;  %v4412_v4 = vld [vmem:[#allocation17 + $0x428] sm:$0xff]  ;;  %v6534_v8 = vpack.c.bf16 %v3354_v59, %v3338_v58 }
0x11f5   : > { %6671 = vmatprep.subr.bf16.mxu0 %v6670_v20  ;;  %v4400_v20 = vld [vmem:[#allocation17 + $0x3c8] sm:$0xff]  ;;  %v6688_v27 = vpack.c.bf16 %v4397_v39, %v4395_v16  ;;  %v3337_v41 = vld [vmem:[#allocation14 + $0x770] sm:$0xff]  ;;  %v6700_v39 = vpack.c.bf16 %v4409_v0, %v4407_v17 }
0x11f6   : > { %6441 = vmatpush1.bf16.msra.mxu1 %v6440_v23  ;;  %v3241_v23 = vld [vmem:[#allocation14 + $0x470] sm:$0xff]  ;;  %v6690_v29 = vpack.c.bf16 %v4402_v5, %v4400_v20  ;;  %v3386_v20 = vld [vmem:[#allocation14 + $0x8f8] sm:$0xff] }
0x11f7   : > { %6507 = vmatprep.subr.bf16.mxu1 %v6506_v55  ;;  %v3274_v55 = vld [vmem:[#allocation14 + $0x578] sm:$0xff]  ;;  %v6524_v34 = vpack.c.bf16 %v3257_v26, %v3241_v23  ;;  %v4411_v23 = vld [vmem:[#allocation17 + $0x420] sm:$0xff]  ;;  %v4413_v26 = vld [vmem:[#allocation17 + $0x430] sm:$0xff] }
0x11f8   : > { %6673 = vmatpush1.bf16.msra.mxu0 %v6672_v32  ;;  %v4399_v32 = vld [vmem:[#allocation17 + $0x3c0] sm:$0xff]  ;;  %v6526_v24 = vpack.c.bf16 %v3290_v28, %v3274_v55  ;;  %v4416_v55 = vld [vmem:[#allocation17 + $0x448] sm:$0xff]  ;;  %v4418_v28 = vld [vmem:[#allocation17 + $0x458] sm:$0xff] }
0x11f9   : > { %4115 = vmatmul.mubr.f32.vlgmr.msra.gmra.mrb[32].mxu1 %v8555_v47  ;;  %6675 = vmatprep.subr.bf16.mxu0 %v6674_v35  ;;  %v4404_v35 = vld [vmem:[#allocation17 + $0x3e8] sm:$0xff]  ;;  %v6692_v38 = vpack.c.bf16 %v4401_v33, %v4399_v32  ;;  %v3369_v32 = vld [vmem:[#allocation14 + $0x870] sm:$0xff] }
0x11fa   : > { %6509 = vmatpush1.bf16.msra.mxu1 %v6508_v54  ;;  %4256 = vmatprep.mubr.f32.mxu1 %v8557_v48  ;;  %v3273_v54 = vld [vmem:[#allocation14 + $0x570] sm:$0xff] }
0x11fb   : > { %6511 = vmatprep.subr.bf16.mxu1 %v6510_v42  ;;  %v3306_v42 = vld [vmem:[#allocation14 + $0x678] sm:$0xff]  ;;  %v6528_v50 = vpack.c.bf16 %v3289_v25, %v3273_v54  ;;  %v3385_v33 = vld [vmem:[#allocation14 + $0x8f0] sm:$0xff]  ;;  %v4417_v25 = vld [vmem:[#allocation17 + $0x450] sm:$0xff] }
0x11fc   : > { %6677 = vmatpush1.bf16.msra.mxu0 %v6676_v45  ;;  %v6694_v45 = vpack.c.bf16 %v4406_v36, %v4404_v35  ;;  %v6530_v11 = vpack.c.bf16 %v3322_v30, %v3306_v42  ;;  %v3402_v35 = vld [vmem:[#allocation14 + $0x978] sm:$0xff]  ;;  %v4415_v54 = vld [vmem:[#allocation17 + $0x440] sm:$0xff]  ;;  %v4422_v30 = vld [vmem:[#allocation17 + $0x478] sm:$0xff] }
0x11fd   : > { %6679 = vmatprep.subr.bf16.mxu0 %v6678_v49  ;;  %v3630_v49 = vrot.slane %v8572_v31, %v8341_v15  ;;  %v3418_v36 = vld [vmem:[#allocation14 + $0x9f8] sm:$0xff]  ;;  %v3433_v58 = vld [vmem:[#allocation14 + $0xa70] sm:$0xff] }
0x11fe   : > { %6513 = vmatpush1.bf16.msra.mxu1 %v6512_v19  ;;  %v4410_v19 = vld [vmem:[#allocation17 + $0x418] sm:$0xff]  ;;  %v4420_v42 = vld [vmem:[#allocation17 + $0x468] sm:$0xff]  ;;  %v3449_v59 = vld [vmem:[#allocation14 + $0xaf0] sm:$0xff] }
0x11ff   : > { %6515 = vmatprep.subr.bf16.mxu1 %v6514_v52  ;;  %v3321_v52 = vld [vmem:[#allocation14 + $0x6f0] sm:$0xff] }
0x1200   : > { %6681 = vmatpush1.bf16.msra.mxu0 %v6680_v57  ;;  %v6696_v57 = vpack.c.bf16 %v4405_v44, %v4403_v46  ;;  %v6532_v3 = vpack.c.bf16 %v3321_v52, %v3305_v1  ;;  %v3417_v46 = vld [vmem:[#allocation14 + $0x9f0] sm:$0xff]  ;;  %v6708_v44 = vpack.c.bf16 %v4417_v25, %v4415_v54  ;;  %v4424_v52 = vld [vmem:[#allocation17 + $0x488] sm:$0xff] }
0x1201   : > { %6683 = vmatprep.subr.bf16.mxu0 %v6682_v60  ;;  %v4423_v0 = vld [vmem:[#allocation17 + $0x480] sm:$0xff]  ;;  %v4436_v25 = vld [vmem:[#allocation17 + $0x4e8] sm:$0xff] }
0x1202   : > { %6517 = vmatpush1.bf16.msra.mxu1 %v6516_v63  ;;  %v6698_v63 = vpack.c.bf16 %v4410_v19, %v4408_v51  ;;  %v6710_v51 = vpack.c.bf16 %v4422_v30, %v4420_v42  ;;  %v4419_v19 = vld [vmem:[#allocation17 + $0x460] sm:$0xff] }
0x1203   : > { %6519 = vmatprep.subr.bf16.mxu1 %v6518_v2  ;;  %v3529_v30 = vld [vmem:[#allocation14 + $0xd70] sm:$0xff] }
0x1204   : > { %6685 = vmatpush1.bf16.msra.mxu0 %v6684_v6  ;;  %v4414_v6 = vld [vmem:[#allocation17 + $0x438] sm:$0xff] }
0x1205   : > { %6687 = vmatprep.subr.bf16.mxu0 %v6686_v14  ;;  %v3353_v14 = vld [vmem:[#allocation14 + $0x7f0] sm:$0xff] }
0x1206   : > { %6521 = vmatpush1.bf16.msra.mxu1 %v6520_v18  ;;  %v3370_v18 = vld [vmem:[#allocation14 + $0x878] sm:$0xff] }
0x1207   : > { %6523 = vmatprep.subr.bf16.mxu1 %v6522_v21  ;;  %v6702_v21 = vpack.c.bf16 %v4414_v6, %v4412_v4  ;;  %v4428_v4 = vld [vmem:[#allocation17 + $0x4a8] sm:$0xff]  ;;  %v4430_v6 = vld [vmem:[#allocation17 + $0x4b8] sm:$0xff] }
0x1208   : > { %6689 = vmatpush1.bf16.msra.mxu0 %v6688_v27  ;;  %v6536_v27 = vpack.c.bf16 %v3353_v14, %v3337_v41  ;;  %v3465_v41 = vld [vmem:[#allocation14 + $0xb70] sm:$0xff] }
0x1209   : > { %6691 = vmatprep.subr.bf16.mxu0 %v6690_v29  ;;  %v6538_v29 = vpack.c.bf16 %v3386_v20, %v3370_v18  ;;  %v3481_v14 = vld [vmem:[#allocation14 + $0xbf0] sm:$0xff]  ;;  %v3514_v18 = vld [vmem:[#allocation14 + $0xcf8] sm:$0xff]  ;;  %v6718_v20 = vpack.c.bf16 %v4430_v6, %v4428_v4 }
0x120a   : > { %6525 = vmatpush1.bf16.msra.mxu1 %v6524_v34  ;;  %v6704_v34 = vpack.c.bf16 %v4413_v26, %v4411_v23  ;;  %v6552_v23 = vpack.c.bf16 %v3481_v14, %v3465_v41  ;;  %v4432_v26 = vld [vmem:[#allocation17 + $0x4c8] sm:$0xff]  ;;  %v3593_v6 = vld [vmem:[#allocation14 + $0xf70] sm:$0xff] }
0x120b   : > { %6527 = vmatprep.subr.bf16.mxu1 %v6526_v24  ;;  %v6706_v24 = vpack.c.bf16 %v4418_v28, %v4416_v55  ;;  %v3497_v28 = vld [vmem:[#allocation14 + $0xc70] sm:$0xff] }
0x120c   : > { %v3832_v53 = vpop.f32.mrb[26].mxu1  ;;  %v8588_v56 = vpop.f32.mrb[18].mxu0  ;;  %6693 = vmatpush1.bf16.msra.mxu0 %v6692_v38  ;;  %v6540_v38 = vpack.c.bf16 %v3385_v33, %v3369_v32  ;;  %v3530_v33 = vld [vmem:[#allocation14 + $0xd78] sm:$0xff] }
0x120d   : > { %v3833_v60 = vadd.f32 %v3832_v53, %v3626_v43  ;;  %v3834_v61 = vpop.f32.mrb[27].mxu1  ;;  %v8590_v62 = vpop.f32.mrb[19].mxu0  ;;  %6695 = vmatprep.subr.bf16.mxu0 %v6694_v45  ;;  %v6542_v43 = vpack.c.bf16 %v3418_v36, %v3402_v35  ;;  %v3401_v45 = vld [vmem:[#allocation14 + $0x970] sm:$0xff]  ;;  %v4426_v53 = vld [vmem:[#allocation17 + $0x498] sm:$0xff] }
0x120e   : > { %v3835_v2 = vadd.f32 %v3834_v61, %v3630_v49  ;;  %6529 = vmatpush1.bf16.msra.mxu1 %v6528_v50  ;;  %v3434_v49 = vld [vmem:[#allocation14 + $0xa78] sm:$0xff]  ;;  %v6544_v1 = vpack.c.bf16 %v3417_v46, %v3401_v45  ;;  %v6714_v17 = vpack.c.bf16 %v4426_v53, %v4424_v52  ;;  %v4431_v36 = vld [vmem:[#allocation17 + $0x4c0] sm:$0xff] }
0x120f   : > { %6531 = vmatprep.subr.bf16.mxu1 %v6530_v11  ;;  %v4265_v5 = vmax.f32 %v3833_v60, 0.0  ;;  %v3450_v50 = vld [vmem:[#allocation14 + $0xaf8] sm:$0xff]  ;;  %v4421_v11 = vld [vmem:[#allocation17 + $0x470] sm:$0xff]  ;;  %v3561_v53 = vld [vmem:[#allocation14 + $0xe70] sm:$0xff] }
0x1210   : > { %v4266_v16 = vmax.f32 %v3835_v2, 0.0  ;;  %6697 = vmatpush1.bf16.msra.mxu0 %v6696_v57  ;;  %v6546_v57 = vpack.c.bf16 %v3450_v50, %v3434_v49  ;;  %v6712_v60 = vpack.c.bf16 %v4421_v11, %v4419_v19  ;;  %v3466_v61 = vld [vmem:[#allocation14 + $0xb78] sm:$0xff]  ;;  %v4425_v2 = vld [vmem:[#allocation17 + $0x490] sm:$0xff]  ;;  %v4435_v50 = vld [vmem:[#allocation17 + $0x4e0] sm:$0xff] }
0x1211   : > { %6699 = vmatprep.subr.bf16.mxu0 %v6698_v63  ;;  %v3482_v63 = vld [vmem:[#allocation14 + $0xbf8] sm:$0xff] }
0x1212   : > { %6533 = vmatpush1.bf16.msra.mxu1 %v6532_v3  ;;  %4938 = vmatprep.mubr.f32.mxu0 %v4266_v16  ;;  %v6548_v3 = vpack.c.bf16 %v3449_v59, %v3433_v58  ;;  %v6716_v16 = vpack.c.bf16 %v4425_v2, %v4423_v0  ;;  %v3562_v46 = vld [vmem:[#allocation14 + $0xe78] sm:$0xff] }
0x1213   : > { %4939 = vmatmul.mubr.f32.vlgmr.msra.gmra.mrb[20].mxu0 %v4265_v5  ;;  %6535 = vmatprep.subr.bf16.mxu1 %v6534_v8  ;;  %v6550_v8 = vpack.c.bf16 %v3482_v63, %v3466_v61  ;;  %v4427_v5 = vld [vmem:[#allocation17 + $0x4a0] sm:$0xff]  ;;  %v4440_v11 = vld [vmem:[#allocation17 + $0x508] sm:$0xff] }
0x1214   : > { %6701 = vmatpush1.bf16.msra.mxu0 %v6700_v39  ;;  %v3498_v39 = vld [vmem:[#allocation14 + $0xc78] sm:$0xff]  ;;  %v4439_v63 = vld [vmem:[#allocation17 + $0x500] sm:$0xff] }
0x1215   : > { %6703 = vmatprep.subr.bf16.mxu0 %v6702_v21  ;;  %v4429_v21 = vld [vmem:[#allocation17 + $0x4b0] sm:$0xff]  ;;  %v6554_v55 = vpack.c.bf16 %v3514_v18, %v3498_v39  ;;  %v3594_v59 = vld [vmem:[#allocation14 + $0xf78] sm:$0xff] }
0x1216   : > { %6537 = vmatpush1.bf16.msra.mxu1 %v6536_v27  ;;  %v4434_v27 = vld [vmem:[#allocation17 + $0x4d8] sm:$0xff]  ;;  %v6720_v32 = vpack.c.bf16 %v4429_v21, %v4427_v5  ;;  %v4444_v2 = vld [vmem:[#allocation17 + $0x528] sm:$0xff]  ;;  %v4445_v39 = vld [vmem:[#allocation17 + $0x530] sm:$0xff] }
0x1217   : > { %6539 = vmatprep.subr.bf16.mxu1 %v6538_v29  ;;  %v3513_v29 = vld [vmem:[#allocation14 + $0xcf0] sm:$0xff]  ;;  %v6722_v35 = vpack.c.bf16 %v4434_v27, %v4432_v26  ;;  %v4450_v5 = vld [vmem:[#allocation17 + $0x558] sm:$0xff]  ;;  %v4449_v27 = vld [vmem:[#allocation17 + $0x550] sm:$0xff] }
0x1218   : > { %6705 = vmatpush1.bf16.msra.mxu0 %v6704_v34  ;;  %v3546_v34 = vld [vmem:[#allocation14 + $0xdf8] sm:$0xff]  ;;  %v6556_v54 = vpack.c.bf16 %v3513_v29, %v3497_v28  ;;  %v4447_v26 = vld [vmem:[#allocation17 + $0x540] sm:$0xff]  ;;  %v4454_v28 = vld [vmem:[#allocation17 + $0x578] sm:$0xff] }
0x1219   : > { %6707 = vmatprep.subr.bf16.mxu0 %v6706_v24  ;;  %v4433_v24 = vld [vmem:[#allocation17 + $0x4d0] sm:$0xff]  ;;  %v6558_v42 = vpack.c.bf16 %v3546_v34, %v3530_v33  ;;  %v6740_v29 = vpack.c.bf16 %v4449_v27, %v4447_v26  ;;  %v4451_v33 = vld [vmem:[#allocation17 + $0x560] sm:$0xff]  ;;  %v4480_v27 = vld [vmem:[#allocation17 + $0x648] sm:$0xff] }
0x121a   : > { %6541 = vmatpush1.bf16.msra.mxu1 %v6540_v38  ;;  %v4438_v38 = vld [vmem:[#allocation17 + $0x4f8] sm:$0xff]  ;;  %v6724_v45 = vpack.c.bf16 %v4433_v24, %v4431_v36  ;;  %v4453_v34 = vld [vmem:[#allocation17 + $0x570] sm:$0xff] }
0x121b   : > { %6543 = vmatprep.subr.bf16.mxu1 %v6542_v43  ;;  %v3545_v43 = vld [vmem:[#allocation14 + $0xdf0] sm:$0xff]  ;;  %v6726_v49 = vpack.c.bf16 %v4438_v38, %v4436_v25  ;;  %v4458_v36 = vld [vmem:[#allocation17 + $0x598] sm:$0xff]  ;;  %v6744_v24 = vpack.c.bf16 %v4453_v34, %v4451_v33  ;;  %v4457_v38 = vld [vmem:[#allocation17 + $0x590] sm:$0xff] }
0x121c   : > { %6709 = vmatpush1.bf16.msra.mxu0 %v6708_v44  ;;  %v3578_v44 = vld [vmem:[#allocation14 + $0xef8] sm:$0xff]  ;;  %v6560_v19 = vpack.c.bf16 %v3545_v43, %v3529_v30  ;;  %v4455_v25 = vld [vmem:[#allocation17 + $0x580] sm:$0xff]  ;;  %v4462_v30 = vld [vmem:[#allocation17 + $0x5b8] sm:$0xff] }
0x121d   : > { %6711 = vmatprep.subr.bf16.mxu0 %v6710_v51  ;;  %v4437_v51 = vld [vmem:[#allocation17 + $0x4f0] sm:$0xff]  ;;  %v6562_v52 = vpack.c.bf16 %v3578_v44, %v3562_v46  ;;  %v6748_v43 = vpack.c.bf16 %v4457_v38, %v4455_v25  ;;  %v4459_v46 = vld [vmem:[#allocation17 + $0x5a0] sm:$0xff]  ;;  %v4484_v34 = vld [vmem:[#allocation17 + $0x668] sm:$0xff] }
0x121e   : > { %6545 = vmatpush1.bf16.msra.mxu1 %v6544_v1  ;;  %v4442_v1 = vld [vmem:[#allocation17 + $0x518] sm:$0xff]  ;;  %v6728_v58 = vpack.c.bf16 %v4437_v51, %v4435_v50  ;;  %v4461_v44 = vld [vmem:[#allocation17 + $0x5b0] sm:$0xff]  ;;  %v4488_v38 = vld [vmem:[#allocation17 + $0x688] sm:$0xff] }
0x121f   : > { %6547 = vmatprep.subr.bf16.mxu1 %v6546_v57  ;;  %v3577_v57 = vld [vmem:[#allocation14 + $0xef0] sm:$0xff]  ;;  %v6730_v61 = vpack.c.bf16 %v4442_v1, %v4440_v11  ;;  %v4466_v50 = vld [vmem:[#allocation17 + $0x5d8] sm:$0xff]  ;;  %v6752_v51 = vpack.c.bf16 %v4461_v44, %v4459_v46  ;;  %v4465_v1 = vld [vmem:[#allocation17 + $0x5d0] sm:$0xff] }
0x1220   : > { %6713 = vmatpush1.bf16.msra.mxu0 %v6712_v60  ;;  %v3610_v60 = vld [vmem:[#allocation14 + $0xff8] sm:$0xff]  ;;  %v6564_v0 = vpack.c.bf16 %v3577_v57, %v3561_v53  ;;  %v4463_v11 = vld [vmem:[#allocation17 + $0x5c0] sm:$0xff]  ;;  %v4470_v53 = vld [vmem:[#allocation17 + $0x5f8] sm:$0xff] }
0x1221   : > { %6715 = vmatprep.subr.bf16.mxu0 %v6714_v17  ;;  %v4441_v17 = vld [vmem:[#allocation17 + $0x510] sm:$0xff]  ;;  %v6566_v4 = vpack.c.bf16 %v3610_v60, %v3594_v59  ;;  %v6756_v57 = vpack.c.bf16 %v4465_v1, %v4463_v11  ;;  %v4467_v60 = vld [vmem:[#allocation17 + $0x5e0] sm:$0xff]  ;;  %v4492_v44 = vld [vmem:[#allocation17 + $0x6a8] sm:$0xff] }
0x1222   : > { %6549 = vmatpush1.bf16.msra.mxu1 %v6548_v3  ;;  %v4446_v3 = vld [vmem:[#allocation17 + $0x538] sm:$0xff]  ;;  %v6732_v41 = vpack.c.bf16 %v4441_v17, %v4439_v63  ;;  %v3638_v63 = vrot.slane %v8572_v31, %v8436_v37  ;;  %v4472_v17 = vld [vmem:[#allocation17 + $0x608] sm:$0xff]  ;;  %v4477_v26 = vld [vmem:[#allocation17 + $0x630] sm:$0xff] }
0x1223   : > { %6551 = vmatprep.subr.bf16.mxu1 %v6550_v8  ;;  %v3609_v8 = vld [vmem:[#allocation14 + $0xff0] sm:$0xff]  ;;  %v6734_v14 = vpack.c.bf16 %v4446_v3, %v4444_v2  ;;  %v4481_v33 = vld [vmem:[#allocation17 + $0x650] sm:$0xff]  ;;  %v4496_v1 = vld [vmem:[#allocation17 + $0x6c8] sm:$0xff] }
0x1224   : > { %6717 = vmatpush1.bf16.msra.mxu0 %v6716_v16  ;;  %v4443_v16 = vld [vmem:[#allocation17 + $0x520] sm:$0xff]  ;;  %v6568_v18 = vpack.c.bf16 %v3609_v8, %v3593_v6  ;;  %v4485_v25 = vld [vmem:[#allocation17 + $0x670] sm:$0xff] }
0x1225   : > { %6719 = vmatprep.subr.bf16.mxu0 %v6718_v20  ;;  %v4448_v20 = vld [vmem:[#allocation17 + $0x548] sm:$0xff]  ;;  %v6736_v21 = vpack.c.bf16 %v4445_v39, %v4443_v16  ;;  %v4489_v46 = vld [vmem:[#allocation17 + $0x690] sm:$0xff] }
0x1226   : > { %6553 = vmatpush1.bf16.msra.mxu1 %v6552_v23  ;;  %v6738_v23 = vpack.c.bf16 %v4450_v5, %v4448_v20  ;;  %v4476_v39 = vld [vmem:[#allocation17 + $0x628] sm:$0xff]  ;;  %v4493_v11 = vld [vmem:[#allocation17 + $0x6b0] sm:$0xff] }
0x1227   : > { %6555 = vmatprep.subr.bf16.mxu1 %v6554_v55  ;;  %v4452_v55 = vld [vmem:[#allocation17 + $0x568] sm:$0xff] }
0x1228   : > { %6721 = vmatpush1.bf16.msra.mxu0 %v6720_v32  ;;  %v6742_v32 = vpack.c.bf16 %v4454_v28, %v4452_v55  ;;  %v4482_v55 = vld [vmem:[#allocation17 + $0x658] sm:$0xff] }
0x1229   : > { %6723 = vmatprep.subr.bf16.mxu0 %v6722_v35  ;;  %v4456_v35 = vld [vmem:[#allocation17 + $0x588] sm:$0xff] }
0x122a   : > { %6557 = vmatpush1.bf16.msra.mxu1 %v6556_v54  ;;  %v6746_v54 = vpack.c.bf16 %v4458_v36, %v4456_v35  ;;  %v4486_v35 = vld [vmem:[#allocation17 + $0x678] sm:$0xff] }
0x122b   : > { %6559 = vmatprep.subr.bf16.mxu1 %v6558_v42  ;;  %v4460_v42 = vld [vmem:[#allocation17 + $0x5a8] sm:$0xff] }
0x122c   : > { %6725 = vmatpush1.bf16.msra.mxu0 %v6724_v45  ;;  %v6750_v45 = vpack.c.bf16 %v4462_v30, %v4460_v42  ;;  %v4490_v42 = vld [vmem:[#allocation17 + $0x698] sm:$0xff] }
0x122d   : > { %6727 = vmatprep.subr.bf16.mxu0 %v6726_v49  ;;  %v4464_v49 = vld [vmem:[#allocation17 + $0x5c8] sm:$0xff] }
0x122e   : > { %6561 = vmatpush1.bf16.msra.mxu1 %v6560_v19  ;;  %v6754_v19 = vpack.c.bf16 %v4466_v50, %v4464_v49  ;;  %v4494_v49 = vld [vmem:[#allocation17 + $0x6b8] sm:$0xff] }
0x122f   : > { %6563 = vmatprep.subr.bf16.mxu1 %v6562_v52  ;;  %v4468_v52 = vld [vmem:[#allocation17 + $0x5e8] sm:$0xff] }
0x1230   : > { %6729 = vmatpush1.bf16.msra.mxu0 %v6728_v58  ;;  %v3634_v58 = vrot.slane %v8572_v31, %v8382_v40  ;;  %v6758_v59 = vpack.c.bf16 %v4470_v53, %v4468_v52  ;;  %v4498_v52 = vld [vmem:[#allocation17 + $0x6d8] sm:$0xff] }
0x1231   : > { %6731 = vmatprep.subr.bf16.mxu0 %v6730_v61  ;;  %v4469_v61 = vld [vmem:[#allocation17 + $0x5f0] sm:$0xff] }
0x1232   : > { %6565 = vmatpush1.bf16.msra.mxu1 %v6564_v0  ;;  %v4474_v0 = vld [vmem:[#allocation17 + $0x618] sm:$0xff]  ;;  %v6760_v3 = vpack.c.bf16 %v4469_v61, %v4467_v60  ;;  %v4500_v60 = vld [vmem:[#allocation17 + $0x6e8] sm:$0xff] }
0x1233   : > { %6567 = vmatprep.subr.bf16.mxu1 %v6566_v4  ;;  %v6762_v8 = vpack.c.bf16 %v4474_v0, %v4472_v17  ;;  %v4502_v61 = vld [vmem:[#allocation17 + $0x6f8] sm:$0xff]  ;;  %v4499_v0 = vld [vmem:[#allocation17 + $0x6e0] sm:$0xff] }
0x1234   : > { %6733 = vmatpush1.bf16.msra.mxu0 %v6732_v41  ;;  %v4471_v41 = vld [vmem:[#allocation17 + $0x600] sm:$0xff]  ;;  %v6790_v17 = vpack.c.bf16 %v4502_v61, %v4500_v60  ;;  %v4534_v60 = vld [vmem:[#allocation17 + $0x7f8] sm:$0xff] }
0x1235   : > { %6735 = vmatprep.subr.bf16.mxu0 %v6734_v14  ;;  %v4473_v14 = vld [vmem:[#allocation17 + $0x610] sm:$0xff]  ;;  %v8599_v61 = vld [vmem:[#allocation16 + $0x8] sm:$0xff] }
0x1236   : > { %6569 = vmatpush1.bf16.msra.mxu1 %v6568_v18  ;;  %v4478_v18 = vld [vmem:[#allocation17 + $0x638] sm:$0xff]  ;;  %v6764_v5 = vpack.c.bf16 %v4473_v14, %v4471_v41  ;;  %v4503_v41 = vld [vmem:[#allocation17 + $0x700] sm:$0xff]  ;;  %v4505_v14 = vld [vmem:[#allocation17 + $0x710] sm:$0xff] }
0x1237   : > { %v6766_v31 = vpack.c.bf16 %v4478_v18, %v4476_v39  ;;  %v4510_v39 = vld [vmem:[#allocation17 + $0x738] sm:$0xff]  ;;  %v6796_v18 = vpack.c.bf16 %v4505_v14, %v4503_v41  ;;  %v4536_v41 = vld [vmem:[#allocation17 + $0x808] sm:$0xff] }
0x1238   : > { %6737 = vmatpush1.bf16.msra.mxu0 %v6736_v21  ;;  %v4538_v14 = vld [vmem:[#allocation17 + $0x818] sm:$0xff] }
0x1239   : > { %4257 = vmatmul.mubr.f32.vlgmr.msra.gmra.mrb[34].mxu1 %v8555_v47  ;;  %6739 = vmatprep.subr.bf16.mxu0 %v6738_v23  ;;  %v4475_v23 = vld [vmem:[#allocation17 + $0x620] sm:$0xff] }
0x123a   : > { %v6768_v28 = vpack.c.bf16 %v4477_v26, %v4475_v23  ;;  %v4514_v23 = vld [vmem:[#allocation17 + $0x758] sm:$0xff] }
0x123c   : > { %6741 = vmatpush1.bf16.msra.mxu0 %v6740_v29  ;;  %v6770_v29 = vpack.c.bf16 %v4482_v55, %v4480_v27  ;;  %v4511_v55 = vld [vmem:[#allocation17 + $0x740] sm:$0xff] }
0x123d   : > { %6743 = vmatprep.subr.bf16.mxu0 %v6742_v32  ;;  %v4479_v32 = vld [vmem:[#allocation17 + $0x640] sm:$0xff] }
0x123e   : > { %v6772_v36 = vpack.c.bf16 %v4481_v33, %v4479_v32  ;;  %v4518_v32 = vld [vmem:[#allocation17 + $0x778] sm:$0xff] }
0x1240   : > { %6745 = vmatpush1.bf16.msra.mxu0 %v6744_v24  ;;  %v6774_v24 = vpack.c.bf16 %v4486_v35, %v4484_v34  ;;  %v4515_v35 = vld [vmem:[#allocation17 + $0x760] sm:$0xff] }
0x1241   : > { %6747 = vmatprep.subr.bf16.mxu0 %v6746_v54  ;;  %v4483_v54 = vld [vmem:[#allocation17 + $0x660] sm:$0xff] }
0x1242   : > { %v6776_v30 = vpack.c.bf16 %v4485_v25, %v4483_v54  ;;  %v4522_v54 = vld [vmem:[#allocation17 + $0x798] sm:$0xff] }
0x1244   : > { %6749 = vmatpush1.bf16.msra.mxu0 %v6748_v43  ;;  %v6778_v43 = vpack.c.bf16 %v4490_v42, %v4488_v38  ;;  %v4519_v42 = vld [vmem:[#allocation17 + $0x780] sm:$0xff] }
0x1245   : > { %6751 = vmatprep.subr.bf16.mxu0 %v6750_v45  ;;  %v4487_v45 = vld [vmem:[#allocation17 + $0x680] sm:$0xff] }
0x1246   : > { %v6780_v50 = vpack.c.bf16 %v4489_v46, %v4487_v45  ;;  %v4526_v45 = vld [vmem:[#allocation17 + $0x7b8] sm:$0xff] }
0x1248   : > { %6753 = vmatpush1.bf16.msra.mxu0 %v6752_v51  ;;  %v6782_v51 = vpack.c.bf16 %v4494_v49, %v4492_v44  ;;  %v4523_v49 = vld [vmem:[#allocation17 + $0x7a0] sm:$0xff] }
0x1249   : > { %6755 = vmatprep.subr.bf16.mxu0 %v6754_v19  ;;  %v4491_v19 = vld [vmem:[#allocation17 + $0x6a0] sm:$0xff] }
0x124a   : > { %v6784_v53 = vpack.c.bf16 %v4493_v11, %v4491_v19  ;;  %v4530_v19 = vld [vmem:[#allocation17 + $0x7d8] sm:$0xff] }
0x124c   : > { %v3903_v2 = vpop.f32.mrb[28].mxu1  ;;  %6757 = vmatpush1.bf16.msra.mxu0 %v6756_v57  ;;  %v6786_v57 = vpack.c.bf16 %v4498_v52, %v4496_v1  ;;  %v3641_v52 = vsub.s32 6, %v8323_v9 }
0x124d   : > { %v3904_v4 = vadd.f32 %v3903_v2, %v3634_v58  ;;  %v3905_v6 = vpop.f32.mrb[29].mxu1  ;;  %6759 = vmatprep.subr.bf16.mxu0 %v6758_v59  ;;  %v4495_v58 = vld [vmem:[#allocation17 + $0x6c0] sm:$0xff]  ;;  %v4497_v59 = vld [vmem:[#allocation17 + $0x6d0] sm:$0xff] }
0x124e   : > { %v3906_v16 = vadd.f32 %v3905_v6, %v3638_v63  ;;  %v6788_v63 = vpack.c.bf16 %v4497_v59, %v4495_v58  ;;  %v4501_v2 = vld [vmem:[#allocation17 + $0x6f0] sm:$0xff]  ;;  %v3645_v58 = vsub.s32 7, %v8323_v9  ;;  %v4532_v59 = vld [vmem:[#allocation17 + $0x7e8] sm:$0xff] }
0x124f   : > { %v4267_v21 = vmax.f32 %v3904_v4, 0.0  ;;  %v4506_v4 = vld [vmem:[#allocation17 + $0x718] sm:$0xff]  ;;  %v6792_v6 = vpack.c.bf16 %v4501_v2, %v4499_v0  ;;  %v6822_v2 = vpack.c.bf16 %v4534_v60, %v4532_v59 }
0x1250   : > { %v4268_v20 = vmax.f32 %v3906_v16, 0.0  ;;  %6761 = vmatpush1.bf16.msra.mxu0 %v6760_v3  ;;  %v4504_v3 = vld [vmem:[#allocation17 + $0x708] sm:$0xff]  ;;  %v4558_v59 = vld [vmem:[#allocation17 + $0x8b8] sm:$0xff] }
0x1251   : > { %6763 = vmatprep.subr.bf16.mxu0 %v6762_v8  ;;  %v6794_v8 = vpack.c.bf16 %v4506_v4, %v4504_v3  ;;  %v4508_v16 = vld [vmem:[#allocation17 + $0x728] sm:$0xff]  ;;  %v4531_v3 = vld [vmem:[#allocation17 + $0x7e0] sm:$0xff]  ;;  %v4533_v4 = vld [vmem:[#allocation17 + $0x7f0] sm:$0xff] }
0x1252   : > { %5009 = vmatprep.mubr.f32.mxu0 %v4268_v20  ;;  %v6798_v20 = vpack.c.bf16 %v4510_v39, %v4508_v16  ;;  %v6824_v39 = vpack.c.bf16 %v4533_v4, %v4531_v3  ;;  %v4562_v3 = vld [vmem:[#allocation17 + $0x8d8] sm:$0xff] }
0x1253   : > { %5010 = vmatmul.mubr.f32.vlgmr.msra.gmra.mrb[20].mxu0 %v4267_v21  ;;  %v4509_v21 = vld [vmem:[#allocation17 + $0x730] sm:$0xff] }
0x1254   : > { %6765 = vmatpush1.bf16.msra.mxu0 %v6764_v5  ;;  %v4507_v5 = vld [vmem:[#allocation17 + $0x720] sm:$0xff] }
0x1255   : > { %6767 = vmatprep.subr.bf16.mxu0 %v6766_v31  ;;  %v4512_v31 = vld [vmem:[#allocation17 + $0x748] sm:$0xff]  ;;  %v6800_v26 = vpack.c.bf16 %v4509_v21, %v4507_v5  ;;  %v6826_v5 = vpack.c.bf16 %v4538_v14, %v4536_v41  ;;  %v4535_v21 = vld [vmem:[#allocation17 + $0x800] sm:$0xff]  ;;  %v4561_v41 = vld [vmem:[#allocation17 + $0x8d0] sm:$0xff] }
0x1256   : > { %v6802_v27 = vpack.c.bf16 %v4514_v23, %v4512_v31  ;;  %v4537_v31 = vld [vmem:[#allocation17 + $0x810] sm:$0xff]  ;;  %v4564_v14 = vld [vmem:[#allocation17 + $0x8e8] sm:$0xff] }
0x1258   : > { %6769 = vmatpush1.bf16.msra.mxu0 %v6768_v28  ;;  %v4513_v28 = vld [vmem:[#allocation17 + $0x750] sm:$0xff] }
0x1259   : > { %6771 = vmatprep.subr.bf16.mxu0 %v6770_v29  ;;  %v4516_v29 = vld [vmem:[#allocation17 + $0x768] sm:$0xff]  ;;  %v6804_v33 = vpack.c.bf16 %v4513_v28, %v4511_v55  ;;  %v4542_v55 = vld [vmem:[#allocation17 + $0x838] sm:$0xff] }
0x125a   : > { %v6806_v34 = vpack.c.bf16 %v4518_v32, %v4516_v29  ;;  %v6828_v29 = vpack.c.bf16 %v4537_v31, %v4535_v21  ;;  %v4568_v21 = vld [vmem:[#allocation17 + $0x908] sm:$0xff]  ;;  %v4570_v31 = vld [vmem:[#allocation17 + $0x918] sm:$0xff] }
0x125c   : > { %6773 = vmatpush1.bf16.msra.mxu0 %v6772_v36  ;;  %v4517_v36 = vld [vmem:[#allocation17 + $0x770] sm:$0xff] }
0x125d   : > { %6775 = vmatprep.subr.bf16.mxu0 %v6774_v24  ;;  %v4520_v24 = vld [vmem:[#allocation17 + $0x788] sm:$0xff]  ;;  %v6808_v25 = vpack.c.bf16 %v4517_v36, %v4515_v35  ;;  %v4541_v35 = vld [vmem:[#allocation17 + $0x830] sm:$0xff] }
0x125e   : > { %v6810_v38 = vpack.c.bf16 %v4522_v54, %v4520_v24  ;;  %v4544_v24 = vld [vmem:[#allocation17 + $0x848] sm:$0xff]  ;;  %v4546_v54 = vld [vmem:[#allocation17 + $0x858] sm:$0xff] }
0x1260   : > { %6777 = vmatpush1.bf16.msra.mxu0 %v6776_v30  ;;  %v4521_v30 = vld [vmem:[#allocation17 + $0x790] sm:$0xff] }
0x1261   : > { %6779 = vmatprep.subr.bf16.mxu0 %v6778_v43  ;;  %v4524_v43 = vld [vmem:[#allocation17 + $0x7a8] sm:$0xff]  ;;  %v6812_v46 = vpack.c.bf16 %v4521_v30, %v4519_v42  ;;  %v4545_v42 = vld [vmem:[#allocation17 + $0x850] sm:$0xff] }
0x1262   : > { %v6814_v44 = vpack.c.bf16 %v4526_v45, %v4524_v43  ;;  %v4548_v30 = vld [vmem:[#allocation17 + $0x868] sm:$0xff]  ;;  %v4550_v43 = vld [vmem:[#allocation17 + $0x878] sm:$0xff] }
0x1264   : > { %6781 = vmatpush1.bf16.msra.mxu0 %v6780_v50  ;;  %v4525_v50 = vld [vmem:[#allocation17 + $0x7b0] sm:$0xff] }
0x1265   : > { %6783 = vmatprep.subr.bf16.mxu0 %v6782_v51  ;;  %v4528_v51 = vld [vmem:[#allocation17 + $0x7c8] sm:$0xff]  ;;  %v6816_v11 = vpack.c.bf16 %v4525_v50, %v4523_v49  ;;  %v4549_v49 = vld [vmem:[#allocation17 + $0x870] sm:$0xff] }
0x1266   : > { %v6818_v1 = vpack.c.bf16 %v4530_v19, %v4528_v51  ;;  %v4552_v50 = vld [vmem:[#allocation17 + $0x888] sm:$0xff]  ;;  %v4554_v51 = vld [vmem:[#allocation17 + $0x898] sm:$0xff] }
0x1268   : > { %6785 = vmatpush1.bf16.msra.mxu0 %v6784_v53  ;;  %v4527_v53 = vld [vmem:[#allocation17 + $0x7c0] sm:$0xff] }
0x1269   : > { %6787 = vmatprep.subr.bf16.mxu0 %v6786_v57  ;;  %v4529_v57 = vld [vmem:[#allocation17 + $0x7d0] sm:$0xff] }
0x126c   : > { %6789 = vmatpush1.bf16.msra.mxu0 %v6788_v63  ;;  %v6820_v63 = vpack.c.bf16 %v4529_v57, %v4527_v53  ;;  %v4553_v53 = vld [vmem:[#allocation17 + $0x890] sm:$0xff]  ;;  %v4556_v57 = vld [vmem:[#allocation17 + $0x8a8] sm:$0xff] }
0x126d   : > { %6791 = vmatprep.subr.bf16.mxu0 %v6790_v17  ;;  %v7328_v17 = vld [vmem:[#allocation16] sm:$0xff] }
0x126e   : > { %v3642_v0 = vrot.slane %v7328_v17, %v3641_v52 }
0x1270   : > { %6793 = vmatpush1.bf16.msra.mxu0 %v6792_v6  ;;  %v3654_v6 = vrot.slane %v8599_v61, %v8336_v13 }
0x1271   : > { %6795 = vmatprep.subr.bf16.mxu0 %v6794_v8  ;;  %v3646_v8 = vrot.slane %v7328_v17, %v3645_v58  ;;  %v4555_v17 = vld [vmem:[#allocation17 + $0x8a0] sm:$0xff] }
0x1272   : > { %v4048_v23 = vadd.f32 %v8580_v7, %v3654_v6  ;;  %v6834_v7 = vpack.c.bf16 %v4546_v54, %v4544_v24  ;;  %v4578_v24 = vld [vmem:[#allocation17 + $0x958] sm:$0xff] }
0x1274   : > { %6797 = vmatpush1.bf16.msra.mxu0 %v6796_v18  ;;  %v4272_v36 = vmax.f32 %v4048_v23, 0.0 }
0x1275   : > { %6799 = vmatprep.subr.bf16.mxu0 %v6798_v20 }
0x1278   : > { %6801 = vmatpush1.bf16.msra.mxu0 %v6800_v26 }
0x1279   : > { %6803 = vmatprep.subr.bf16.mxu0 %v6802_v27  ;;  %v4540_v27 = vld [vmem:[#allocation17 + $0x828] sm:$0xff] }
0x127c   : > { %6805 = vmatpush1.bf16.msra.mxu0 %v6804_v33  ;;  %v6830_v33 = vpack.c.bf16 %v4542_v55, %v4540_v27  ;;  %v4567_v27 = vld [vmem:[#allocation17 + $0x900] sm:$0xff]  ;;  %v4569_v55 = vld [vmem:[#allocation17 + $0x910] sm:$0xff] }
0x127d   : > { %6807 = vmatprep.subr.bf16.mxu0 %v6806_v34  ;;  %v4539_v34 = vld [vmem:[#allocation17 + $0x820] sm:$0xff] }
0x1280   : > { %6809 = vmatpush1.bf16.msra.mxu0 %v6808_v25  ;;  %v6832_v25 = vpack.c.bf16 %v4541_v35, %v4539_v34  ;;  %v4571_v34 = vld [vmem:[#allocation17 + $0x920] sm:$0xff]  ;;  %v4573_v35 = vld [vmem:[#allocation17 + $0x930] sm:$0xff] }
0x1281   : > { %6811 = vmatprep.subr.bf16.mxu0 %v6810_v38  ;;  %v4543_v38 = vld [vmem:[#allocation17 + $0x840] sm:$0xff]  ;;  %v6864_v54 = vpack.c.bf16 %v4573_v35, %v4571_v34  ;;  %v4604_v35 = vld [vmem:[#allocation17 + $0xa28] sm:$0xff] }
0x1282   : > { %v6836_v45 = vpack.c.bf16 %v4545_v42, %v4543_v38  ;;  %v4577_v38 = vld [vmem:[#allocation17 + $0x950] sm:$0xff]  ;;  %v4580_v42 = vld [vmem:[#allocation17 + $0x968] sm:$0xff] }
0x1284   : > { %6813 = vmatpush1.bf16.msra.mxu0 %v6812_v46  ;;  %v6838_v46 = vpack.c.bf16 %v4550_v43, %v4548_v30  ;;  %v4582_v30 = vld [vmem:[#allocation17 + $0x978] sm:$0xff] }
0x1285   : > { %6815 = vmatprep.subr.bf16.mxu0 %v6814_v44  ;;  %v4547_v44 = vld [vmem:[#allocation17 + $0x860] sm:$0xff] }
0x1286   : > { %v6840_v19 = vpack.c.bf16 %v4549_v49, %v4547_v44  ;;  %v4581_v44 = vld [vmem:[#allocation17 + $0x970] sm:$0xff]  ;;  %v4584_v49 = vld [vmem:[#allocation17 + $0x988] sm:$0xff] }
0x1288   : > { %6817 = vmatpush1.bf16.msra.mxu0 %v6816_v11  ;;  %v6842_v11 = vpack.c.bf16 %v4554_v51, %v4552_v50  ;;  %v4586_v50 = vld [vmem:[#allocation17 + $0x998] sm:$0xff] }
0x1289   : > { %6819 = vmatprep.subr.bf16.mxu0 %v6818_v1  ;;  %v4551_v1 = vld [vmem:[#allocation17 + $0x880] sm:$0xff] }
0x128a   : > { %v6844_v60 = vpack.c.bf16 %v4553_v53, %v4551_v1  ;;  %v4585_v1 = vld [vmem:[#allocation17 + $0x990] sm:$0xff]  ;;  %v4588_v53 = vld [vmem:[#allocation17 + $0x9a8] sm:$0xff] }
0x128c   : > { %v3974_v16 = vpop.f32.mrb[30].mxu1  ;;  %6821 = vmatpush1.bf16.msra.mxu0 %v6820_v63  ;;  %v6846_v63 = vpack.c.bf16 %v4558_v59, %v4556_v57  ;;  %v4590_v57 = vld [vmem:[#allocation17 + $0x9b8] sm:$0xff] }
0x128d   : > { %v3975_v18 = vadd.f32 %v3974_v16, %v3642_v0  ;;  %v3976_v20 = vpop.f32.mrb[31].mxu1  ;;  %6823 = vmatprep.subr.bf16.mxu0 %v6822_v2  ;;  %v4557_v0 = vld [vmem:[#allocation17 + $0x8b0] sm:$0xff]  ;;  %v4560_v2 = vld [vmem:[#allocation17 + $0x8c8] sm:$0xff]  ;;  %v4566_v16 = vld [vmem:[#allocation17 + $0x8f8] sm:$0xff] }
0x128e   : > { %v3977_v26 = vadd.f32 %v3976_v20, %v3646_v8  ;;  %v6848_v4 = vpack.c.bf16 %v4557_v0, %v4555_v17  ;;  %v6850_v6 = vpack.c.bf16 %v4562_v3, %v4560_v2  ;;  %v4559_v8 = vld [vmem:[#allocation17 + $0x8c0] sm:$0xff]  ;;  %v4589_v17 = vld [vmem:[#allocation17 + $0x9b0] sm:$0xff]  ;;  %v4592_v0 = vld [vmem:[#allocation17 + $0x9c8] sm:$0xff] }
0x128f   : > { %v4269_v32 = vmax.f32 %v3975_v18, 0.0  ;;  %v6854_v18 = vpack.c.bf16 %v4566_v16, %v4564_v14  ;;  %v4563_v20 = vld [vmem:[#allocation17 + $0x8e0] sm:$0xff]  ;;  %v4594_v2 = vld [vmem:[#allocation17 + $0x9d8] sm:$0xff] }
0x1290   : > { %v4270_v28 = vmax.f32 %v3977_v26, 0.0  ;;  %6825 = vmatpush1.bf16.msra.mxu0 %v6824_v39  ;;  %v6852_v39 = vpack.c.bf16 %v4561_v41, %v4559_v8  ;;  %v6858_v26 = vpack.c.bf16 %v4570_v31, %v4568_v21  ;;  %v4593_v8 = vld [vmem:[#allocation17 + $0x9d0] sm:$0xff]  ;;  %v4596_v41 = vld [vmem:[#allocation17 + $0x9e8] sm:$0xff]  ;;  %v4598_v14 = vld [vmem:[#allocation17 + $0x9f8] sm:$0xff]  ;;  %v3662_v21 = vrot.slane %v8599_v61, %v8341_v15 }
0x1291   : > { %6827 = vmatprep.subr.bf16.mxu0 %v6826_v5  ;;  %v4565_v5 = vld [vmem:[#allocation17 + $0x8f0] sm:$0xff]  ;;  %v4600_v31 = vld [vmem:[#allocation17 + $0xa08] sm:$0xff] }
0x1292   : > { %5080 = vmatprep.mubr.f32.mxu0 %v4270_v28  ;;  %v6856_v23 = vpack.c.bf16 %v4565_v5, %v4563_v20  ;;  %v4572_v28 = vld [vmem:[#allocation17 + $0x928] sm:$0xff]  ;;  %v4595_v20 = vld [vmem:[#allocation17 + $0x9e0] sm:$0xff]  ;;  %v4597_v5 = vld [vmem:[#allocation17 + $0x9f0] sm:$0xff] }
0x1293   : > { %5081 = vmatmul.mubr.f32.vlgmr.msra.gmra.mrb[20].mxu0 %v4269_v32  ;;  %v6860_v32 = vpack.c.bf16 %v4569_v55, %v4567_v27  ;;  %v6888_v27 = vpack.c.bf16 %v4597_v5, %v4595_v20  ;;  %v4628_v20 = vld [vmem:[#allocation17 + $0xae8] sm:$0xff]  ;;  %v4630_v5 = vld [vmem:[#allocation17 + $0xaf8] sm:$0xff] }
0x1294   : > { %6829 = vmatpush1.bf16.msra.mxu0 %v6828_v29  ;;  %5151 = vmatprep.mubr.f32.mxu0 %v4272_v36  ;;  %v4574_v29 = vld [vmem:[#allocation17 + $0x938] sm:$0xff]  ;;  %v4576_v36 = vld [vmem:[#allocation17 + $0x948] sm:$0xff] }
0x1295   : > { %6831 = vmatprep.subr.bf16.mxu0 %v6830_v33  ;;  %v6862_v33 = vpack.c.bf16 %v4574_v29, %v4572_v28 }
0x1298   : > { %6833 = vmatpush1.bf16.msra.mxu0 %v6832_v25  ;;  %v6866_v25 = vpack.c.bf16 %v4578_v24, %v4576_v36  ;;  %v4606_v36 = vld [vmem:[#allocation17 + $0xa38] sm:$0xff] }
0x1299   : > { %6835 = vmatprep.subr.bf16.mxu0 %v6834_v7  ;;  %v4575_v7 = vld [vmem:[#allocation17 + $0x940] sm:$0xff]  ;;  %v6894_v15 = vpack.c.bf16 %v4606_v36, %v4604_v35  ;;  %v4636_v35 = vld [vmem:[#allocation17 + $0xb28] sm:$0xff]  ;;  %v4638_v36 = vld [vmem:[#allocation17 + $0xb38] sm:$0xff] }
0x129a   : > { %v6868_v43 = vpack.c.bf16 %v4577_v38, %v4575_v7  ;;  %v4605_v7 = vld [vmem:[#allocation17 + $0xa30] sm:$0xff] }
0x129c   : > { %6837 = vmatpush1.bf16.msra.mxu0 %v6836_v45  ;;  %v6870_v45 = vpack.c.bf16 %v4582_v30, %v4580_v42  ;;  %v4608_v42 = vld [vmem:[#allocation17 + $0xa48] sm:$0xff]  ;;  %v4610_v30 = vld [vmem:[#allocation17 + $0xa58] sm:$0xff] }
0x129d   : > { %6839 = vmatprep.subr.bf16.mxu0 %v6838_v46  ;;  %v4579_v46 = vld [vmem:[#allocation17 + $0x960] sm:$0xff] }
0x129e   : > { %v6872_v51 = vpack.c.bf16 %v4581_v44, %v4579_v46  ;;  %v4609_v46 = vld [vmem:[#allocation17 + $0xa50] sm:$0xff]  ;;  %v4612_v44 = vld [vmem:[#allocation17 + $0xa68] sm:$0xff] }
0x12a0   : > { %6841 = vmatpush1.bf16.msra.mxu0 %v6840_v19  ;;  %v6874_v19 = vpack.c.bf16 %v4586_v50, %v4584_v49  ;;  %v4614_v49 = vld [vmem:[#allocation17 + $0xa78] sm:$0xff] }
0x12a1   : > { %6843 = vmatprep.subr.bf16.mxu0 %v6842_v11  ;;  %v4583_v11 = vld [vmem:[#allocation17 + $0x980] sm:$0xff] }
0x12a2   : > { %v6876_v59 = vpack.c.bf16 %v4585_v1, %v4583_v11  ;;  %v4613_v11 = vld [vmem:[#allocation17 + $0xa70] sm:$0xff]  ;;  %v4616_v1 = vld [vmem:[#allocation17 + $0xa88] sm:$0xff] }
0x12a4   : > { %6845 = vmatpush1.bf16.msra.mxu0 %v6844_v60  ;;  %v6878_v60 = vpack.c.bf16 %v4590_v57, %v4588_v53  ;;  %v4618_v53 = vld [vmem:[#allocation17 + $0xa98] sm:$0xff] }
0x12a5   : > { %6847 = vmatprep.subr.bf16.mxu0 %v6846_v63  ;;  %v4587_v63 = vld [vmem:[#allocation17 + $0x9a0] sm:$0xff] }
0x12a6   : > { %v6880_v3 = vpack.c.bf16 %v4589_v17, %v4587_v63  ;;  %v4617_v63 = vld [vmem:[#allocation17 + $0xa90] sm:$0xff]  ;;  %v4620_v17 = vld [vmem:[#allocation17 + $0xaa8] sm:$0xff] }
0x12a8   : > { %6849 = vmatpush1.bf16.msra.mxu0 %v6848_v4  ;;  %v6882_v4 = vpack.c.bf16 %v4594_v2, %v4592_v0  ;;  %v4622_v0 = vld [vmem:[#allocation17 + $0xab8] sm:$0xff] }
0x12a9   : > { %6851 = vmatprep.subr.bf16.mxu0 %v6850_v6  ;;  %v4591_v6 = vld [vmem:[#allocation17 + $0x9c0] sm:$0xff] }
0x12aa   : > { %v6884_v16 = vpack.c.bf16 %v4593_v8, %v4591_v6  ;;  %v4621_v6 = vld [vmem:[#allocation17 + $0xab0] sm:$0xff]  ;;  %v4624_v8 = vld [vmem:[#allocation17 + $0xac8] sm:$0xff] }
0x12ac   : > { %6853 = vmatpush1.bf16.msra.mxu0 %v6852_v39  ;;  %v3650_v39 = vrot.slane %v8599_v61, %v8326_v10 }
0x12ad   : > { %6855 = vmatprep.subr.bf16.mxu0 %v6854_v18  ;;  %v6886_v18 = vpack.c.bf16 %v4598_v14, %v4596_v41  ;;  %v4626_v41 = vld [vmem:[#allocation17 + $0xad8] sm:$0xff] }
0x12ae   : > { %v4046_v55 = vadd.f32 %v8578_v22, %v3650_v39  ;;  %v4623_v39 = vld [vmem:[#allocation17 + $0xac0] sm:$0xff] }
0x12b0   : > { %6857 = vmatpush1.bf16.msra.mxu0 %v6856_v23  ;;  %v4602_v23 = vld [vmem:[#allocation17 + $0xa18] sm:$0xff] }
0x12b1   : > { %6859 = vmatprep.subr.bf16.mxu0 %v6858_v26  ;;  %v6890_v29 = vpack.c.bf16 %v4602_v23, %v4600_v31  ;;  %v6918_v31 = vpack.c.bf16 %v4630_v5, %v4628_v20  ;;  %v4627_v23 = vld [vmem:[#allocation17 + $0xae0] sm:$0xff]  ;;  %v3658_v5 = vrot.slane %v8599_v61, %v8331_v12 }
0x12b2   : > { %v4663_v12 = vld [vmem:[#allocation17 + $0xc00] sm:$0xff] }
0x12b4   : > { %6861 = vmatpush1.bf16.msra.mxu0 %v6860_v32  ;;  %v4599_v32 = vld [vmem:[#allocation17 + $0xa00] sm:$0xff] }
0x12b5   : > { %6863 = vmatprep.subr.bf16.mxu0 %v6862_v33  ;;  %v4601_v33 = vld [vmem:[#allocation17 + $0xa10] sm:$0xff] }
0x12b6   : > { %v6892_v24 = vpack.c.bf16 %v4601_v33, %v4599_v32  ;;  %v4631_v33 = vld [vmem:[#allocation17 + $0xb00] sm:$0xff] }
0x12b8   : > { %6865 = vmatpush1.bf16.msra.mxu0 %v6864_v54  ;;  %v4271_v54 = vmax.f32 %v4046_v55, 0.0  ;;  %v4632_v55 = vld [vmem:[#allocation17 + $0xb08] sm:$0xff] }
0x12b9   : > { %6867 = vmatprep.subr.bf16.mxu0 %v6866_v25  ;;  %v4603_v25 = vld [vmem:[#allocation17 + $0xa20] sm:$0xff] }
0x12ba   : > { %v6896_v22 = vpack.c.bf16 %v4605_v7, %v4603_v25  ;;  %v4637_v25 = vld [vmem:[#allocation17 + $0xb30] sm:$0xff]  ;;  %v4640_v7 = vld [vmem:[#allocation17 + $0xb48] sm:$0xff] }
0x12bc   : > { %6869 = vmatpush1.bf16.msra.mxu0 %v6868_v43  ;;  %v6898_v43 = vpack.c.bf16 %v4610_v30, %v4608_v42 }
0x12bd   : > { %6871 = vmatprep.subr.bf16.mxu0 %v6870_v45  ;;  %v4607_v45 = vld [vmem:[#allocation17 + $0xa40] sm:$0xff] }
0x12be   : > { %v6900_v50 = vpack.c.bf16 %v4609_v46, %v4607_v45  ;;  %v4644_v45 = vld [vmem:[#allocation17 + $0xb68] sm:$0xff]  ;;  %v4646_v46 = vld [vmem:[#allocation17 + $0xb78] sm:$0xff] }
0x12c0   : > { %6873 = vmatpush1.bf16.msra.mxu0 %v6872_v51  ;;  %v6902_v51 = vpack.c.bf16 %v4614_v49, %v4612_v44  ;;  %v6934_v49 = vpack.c.bf16 %v4646_v46, %v4644_v45  ;;  %v4671_v46 = vld [vmem:[#allocation17 + $0xc40] sm:$0xff] }
0x12c1   : > { %6875 = vmatprep.subr.bf16.mxu0 %v6874_v19  ;;  %v4611_v19 = vld [vmem:[#allocation17 + $0xa60] sm:$0xff] }
0x12c2   : > { %v6904_v57 = vpack.c.bf16 %v4613_v11, %v4611_v19  ;;  %v4648_v19 = vld [vmem:[#allocation17 + $0xb88] sm:$0xff]  ;;  %v4650_v11 = vld [vmem:[#allocation17 + $0xb98] sm:$0xff] }
0x12c4   : > { %6877 = vmatpush1.bf16.msra.mxu0 %v6876_v59  ;;  %v6906_v59 = vpack.c.bf16 %v4618_v53, %v4616_v1  ;;  %v6938_v53 = vpack.c.bf16 %v4650_v11, %v4648_v19  ;;  %v4675_v19 = vld [vmem:[#allocation17 + $0xc60] sm:$0xff]  ;;  %v4677_v11 = vld [vmem:[#allocation17 + $0xc70] sm:$0xff] }
0x12c5   : > { %6879 = vmatprep.subr.bf16.mxu0 %v6878_v60  ;;  %v4615_v60 = vld [vmem:[#allocation17 + $0xa80] sm:$0xff] }
0x12c6   : > { %v6908_v2 = vpack.c.bf16 %v4617_v63, %v4615_v60  ;;  %v4652_v60 = vld [vmem:[#allocation17 + $0xba8] sm:$0xff]  ;;  %v4654_v63 = vld [vmem:[#allocation17 + $0xbb8] sm:$0xff] }
0x12c8   : > { %6881 = vmatpush1.bf16.msra.mxu0 %v6880_v3  ;;  %v6910_v3 = vpack.c.bf16 %v4622_v0, %v4620_v17  ;;  %v6942_v0 = vpack.c.bf16 %v4654_v63, %v4652_v60  ;;  %v4679_v60 = vld [vmem:[#allocation17 + $0xc80] sm:$0xff]  ;;  %v4681_v63 = vld [vmem:[#allocation17 + $0xc90] sm:$0xff] }
0x12c9   : > { %6883 = vmatprep.subr.bf16.mxu0 %v6882_v4  ;;  %v4619_v4 = vld [vmem:[#allocation17 + $0xaa0] sm:$0xff] }
0x12ca   : > { %v6912_v14 = vpack.c.bf16 %v4621_v6, %v4619_v4  ;;  %v4656_v4 = vld [vmem:[#allocation17 + $0xbc8] sm:$0xff]  ;;  %v4658_v6 = vld [vmem:[#allocation17 + $0xbd8] sm:$0xff] }
0x12cc   : > { %v8612_v26 = vpop.f32.mrb[32].mxu1  ;;  %6885 = vmatpush1.bf16.msra.mxu0 %v6884_v16  ;;  %v6914_v16 = vpack.c.bf16 %v4626_v41, %v4624_v8  ;;  %v6946_v41 = vpack.c.bf16 %v4658_v6, %v4656_v4  ;;  %v4683_v4 = vld [vmem:[#allocation17 + $0xca0] sm:$0xff]  ;;  %v4685_v6 = vld [vmem:[#allocation17 + $0xcb0] sm:$0xff] }
0x12cd   : > { %v4118_v28 = vpop.f32.mrb[33].mxu1  ;;  %6887 = vmatprep.subr.bf16.mxu0 %v6886_v18  ;;  %v4625_v18 = vld [vmem:[#allocation17 + $0xad0] sm:$0xff] }
0x12ce   : > { %v4119_v34 = vadd.f32 %v4118_v28, %v3662_v21  ;;  %v6916_v21 = vpack.c.bf16 %v4625_v18, %v4623_v39  ;;  %v4634_v28 = vld [vmem:[#allocation17 + $0xb18] sm:$0xff]  ;;  %v4660_v39 = vld [vmem:[#allocation17 + $0xbe8] sm:$0xff] }
0x12cf   : > { %v6922_v32 = vpack.c.bf16 %v4634_v28, %v4632_v55  ;;  %v4662_v18 = vld [vmem:[#allocation17 + $0xbf8] sm:$0xff]  ;;  %v4664_v55 = vld [vmem:[#allocation17 + $0xc08] sm:$0xff] }
0x12d0   : > { %6889 = vmatpush1.bf16.msra.mxu0 %v6888_v27  ;;  %v4274_v38 = vmax.f32 %v4119_v34, 0.0  ;;  %v4629_v27 = vld [vmem:[#allocation17 + $0xaf0] sm:$0xff]  ;;  %v4666_v28 = vld [vmem:[#allocation17 + $0xc18] sm:$0xff] }
0x12d1   : > { %6891 = vmatprep.subr.bf16.mxu0 %v6890_v29  ;;  %v6920_v29 = vpack.c.bf16 %v4629_v27, %v4627_v23  ;;  %v4633_v34 = vld [vmem:[#allocation17 + $0xb10] sm:$0xff]  ;;  %v3670_v27 = vrot.slane %v8599_v61, %v8436_v37 }
0x12d2   : > { %v4661_v23 = vld [vmem:[#allocation17 + $0xbf0] sm:$0xff] }
0x12d3   : > { %5152 = vmatmul.mubr.f32.vlgmr.msra.gmra.mrb[20].mxu0 %v4271_v54  ;;  %v6926_v54 = vpack.c.bf16 %v4638_v36, %v4636_v35  ;;  %v6954_v35 = vpack.c.bf16 %v4666_v28, %v4664_v55  ;;  %v4665_v36 = vld [vmem:[#allocation17 + $0xc10] sm:$0xff]  ;;  %v4696_v55 = vld [vmem:[#allocation17 + $0xd08] sm:$0xff]  ;;  %v4698_v28 = vld [vmem:[#allocation17 + $0xd18] sm:$0xff] }
0x12d4   : > { %6893 = vmatpush1.bf16.msra.mxu0 %v6892_v24  ;;  %5222 = vmatprep.mubr.f32.mxu0 %v4274_v38  ;;  %v6924_v24 = vpack.c.bf16 %v4633_v34, %v4631_v33  ;;  %v4642_v38 = vld [vmem:[#allocation17 + $0xb58] sm:$0xff]  ;;  %v4117_v33 = vadd.f32 %v8612_v26, %v3658_v5  ;;  %v6956_v37 = vpack.c.bf16 %v4665_v36, %v4663_v12  ;;  %v4697_v12 = vld [vmem:[#allocation17 + $0xd10] sm:$0xff]  ;;  %v4700_v36 = vld [vmem:[#allocation17 + $0xd28] sm:$0xff] }
0x12d5   : > { %6895 = vmatprep.subr.bf16.mxu0 %v6894_v15  ;;  %v4635_v15 = vld [vmem:[#allocation17 + $0xb20] sm:$0xff]  ;;  %v6930_v30 = vpack.c.bf16 %v4642_v38, %v4640_v7  ;;  %v4674_v26 = vld [vmem:[#allocation17 + $0xc58] sm:$0xff] }
0x12d6   : > { %v6928_v42 = vpack.c.bf16 %v4637_v25, %v4635_v15  ;;  %v4670_v15 = vld [vmem:[#allocation17 + $0xc38] sm:$0xff]  ;;  %v4273_v25 = vmax.f32 %v4117_v33, 0.0  ;;  %v4667_v38 = vld [vmem:[#allocation17 + $0xc20] sm:$0xff]  ;;  %v6986_v33 = vpack.c.bf16 %v4698_v28, %v4696_v55 }
0x12d7   : > { %v4694_v5 = vld [vmem:[#allocation17 + $0xcf8] sm:$0xff] }
0x12d8   : > { %6897 = vmatpush1.bf16.msra.mxu0 %v6896_v22  ;;  %v4639_v22 = vld [vmem:[#allocation17 + $0xb40] sm:$0xff] }
0x12d9   : > { %6899 = vmatprep.subr.bf16.mxu0 %v6898_v43  ;;  %v4641_v43 = vld [vmem:[#allocation17 + $0xb50] sm:$0xff] }
0x12da   : > { %v6932_v44 = vpack.c.bf16 %v4641_v43, %v4639_v22  ;;  %v4672_v22 = vld [vmem:[#allocation17 + $0xc48] sm:$0xff] }
0x12db   : > { %v6962_v45 = vpack.c.bf16 %v4674_v26, %v4672_v22  ;;  %v4703_v22 = vld [vmem:[#allocation17 + $0xd40] sm:$0xff]  ;;  %v4705_v26 = vld [vmem:[#allocation17 + $0xd50] sm:$0xff] }
0x12dc   : > { %6901 = vmatpush1.bf16.msra.mxu0 %v6900_v50  ;;  %v4643_v50 = vld [vmem:[#allocation17 + $0xb60] sm:$0xff] }
0x12dd   : > { %6903 = vmatprep.subr.bf16.mxu0 %v6902_v51  ;;  %v4645_v51 = vld [vmem:[#allocation17 + $0xb70] sm:$0xff] }
0x12de   : > { %v6936_v1 = vpack.c.bf16 %v4645_v51, %v4643_v50 }
0x12e0   : > { %6905 = vmatpush1.bf16.msra.mxu0 %v6904_v57  ;;  %v4647_v57 = vld [vmem:[#allocation17 + $0xb80] sm:$0xff] }
0x12e1   : > { %6907 = vmatprep.subr.bf16.mxu0 %v6906_v59  ;;  %v4649_v59 = vld [vmem:[#allocation17 + $0xb90] sm:$0xff] }
0x12e2   : > { %v6940_v17 = vpack.c.bf16 %v4649_v59, %v4647_v57  ;;  %v6968_v57 = vpack.c.bf16 %v4677_v11, %v4675_v19 }
0x12e4   : > { %6909 = vmatpush1.bf16.msra.mxu0 %v6908_v2  ;;  %v4651_v2 = vld [vmem:[#allocation17 + $0xba0] sm:$0xff] }
0x12e5   : > { %6911 = vmatprep.subr.bf16.mxu0 %v6910_v3  ;;  %v4653_v3 = vld [vmem:[#allocation17 + $0xbb0] sm:$0xff] }
0x12e6   : > { %v6944_v8 = vpack.c.bf16 %v4653_v3, %v4651_v2  ;;  %v6972_v2 = vpack.c.bf16 %v4681_v63, %v4679_v60 }
0x12e8   : > { %6913 = vmatpush1.bf16.msra.mxu0 %v6912_v14  ;;  %v4655_v14 = vld [vmem:[#allocation17 + $0xbc0] sm:$0xff] }
0x12e9   : > { %6915 = vmatprep.subr.bf16.mxu0 %v6914_v16  ;;  %v4657_v16 = vld [vmem:[#allocation17 + $0xbd0] sm:$0xff] }
0x12ea   : > { %v6948_v20 = vpack.c.bf16 %v4657_v16, %v4655_v14  ;;  %v6976_v14 = vpack.c.bf16 %v4685_v6, %v4683_v4 }
0x12ec   : > { %6917 = vmatpush1.bf16.msra.mxu0 %v6916_v21  ;;  %v6950_v21 = vpack.c.bf16 %v4662_v18, %v4660_v39  ;;  %v4687_v39 = vld [vmem:[#allocation17 + $0xcc0] sm:$0xff]  ;;  %v4689_v18 = vld [vmem:[#allocation17 + $0xcd0] sm:$0xff] }
0x12ed   : > { %6919 = vmatprep.subr.bf16.mxu0 %v6918_v31  ;;  %v4659_v31 = vld [vmem:[#allocation17 + $0xbe0] sm:$0xff] }
0x12f0   : > { %6921 = vmatpush1.bf16.msra.mxu0 %v6920_v29 }
0x12f1   : > { %6923 = vmatprep.subr.bf16.mxu0 %v6922_v32  ;;  %v6952_v32 = vpack.c.bf16 %v4661_v23, %v4659_v31  ;;  %v4691_v23 = vld [vmem:[#allocation17 + $0xce0] sm:$0xff] }
0x12f4   : > { %6925 = vmatpush1.bf16.msra.mxu0 %v6924_v24  ;;  %v4190_v24 = vadd.f32 %v8590_v62, %v3670_v27  ;;  %v4673_v62 = vld [vmem:[#allocation17 + $0xc50] sm:$0xff] }
0x12f5   : > { %6927 = vmatprep.subr.bf16.mxu0 %v6926_v54  ;;  %v4668_v54 = vld [vmem:[#allocation17 + $0xc28] sm:$0xff]  ;;  %v6964_v50 = vpack.c.bf16 %v4673_v62, %v4671_v46  ;;  %v4693_v27 = vld [vmem:[#allocation17 + $0xcf0] sm:$0xff]  ;;  %v6996_v46 = vpack.c.bf16 %v4705_v26, %v4703_v22  ;;  %v4742_v22 = vld [vmem:[#allocation17 + $0xe78] sm:$0xff] }
0x12f6   : > { %v6958_v7 = vpack.c.bf16 %v4670_v15, %v4668_v54 }
0x12f8   : > { %6929 = vmatpush1.bf16.msra.mxu0 %v6928_v42  ;;  %v4669_v42 = vld [vmem:[#allocation17 + $0xc30] sm:$0xff] }
0x12f9   : > { %6931 = vmatprep.subr.bf16.mxu0 %v6930_v30  ;;  %v4276_v30 = vmax.f32 %v4190_v24, 0.0  ;;  %v6960_v43 = vpack.c.bf16 %v4669_v42, %v4667_v38  ;;  %v4702_v24 = vld [vmem:[#allocation17 + $0xd38] sm:$0xff] }
0x12fa   : > { %v6990_v15 = vpack.c.bf16 %v4702_v24, %v4700_v36  ;;  %v4706_v38 = vld [vmem:[#allocation17 + $0xd58] sm:$0xff] }
0x12fb   : > { %v4734_v36 = vld [vmem:[#allocation17 + $0xe38] sm:$0xff] }
0x12fc   : > { %6933 = vmatpush1.bf16.msra.mxu0 %v6932_v44  ;;  %v4676_v44 = vld [vmem:[#allocation17 + $0xc68] sm:$0xff] }
0x12fd   : > { %6935 = vmatprep.subr.bf16.mxu0 %v6934_v49  ;;  %v4678_v49 = vld [vmem:[#allocation17 + $0xc78] sm:$0xff] }
0x12fe   : > { %v6966_v51 = vpack.c.bf16 %v4678_v49, %v4676_v44  ;;  %v4707_v44 = vld [vmem:[#allocation17 + $0xd60] sm:$0xff]  ;;  %v4709_v49 = vld [vmem:[#allocation17 + $0xd70] sm:$0xff] }
0x12ff   : > { %v7000_v19 = vpack.c.bf16 %v4709_v49, %v4707_v44  ;;  %v4746_v44 = vld [vmem:[#allocation17 + $0xe98] sm:$0xff] }
0x1300   : > { %6937 = vmatpush1.bf16.msra.mxu0 %v6936_v1  ;;  %v4680_v1 = vld [vmem:[#allocation17 + $0xc88] sm:$0xff] }
0x1301   : > { %6939 = vmatprep.subr.bf16.mxu0 %v6938_v53  ;;  %v4682_v53 = vld [vmem:[#allocation17 + $0xc98] sm:$0xff] }
0x1302   : > { %v6970_v59 = vpack.c.bf16 %v4682_v53, %v4680_v1  ;;  %v4711_v1 = vld [vmem:[#allocation17 + $0xd80] sm:$0xff]  ;;  %v4713_v53 = vld [vmem:[#allocation17 + $0xd90] sm:$0xff] }
0x1303   : > { %v7004_v60 = vpack.c.bf16 %v4713_v53, %v4711_v1  ;;  %v4750_v1 = vld [vmem:[#allocation17 + $0xeb8] sm:$0xff] }
0x1304   : > { %6941 = vmatpush1.bf16.msra.mxu0 %v6940_v17  ;;  %v4684_v17 = vld [vmem:[#allocation17 + $0xca8] sm:$0xff] }
0x1305   : > { %6943 = vmatprep.subr.bf16.mxu0 %v6942_v0  ;;  %v4686_v0 = vld [vmem:[#allocation17 + $0xcb8] sm:$0xff] }
0x1306   : > { %v6974_v3 = vpack.c.bf16 %v4686_v0, %v4684_v17  ;;  %v4715_v17 = vld [vmem:[#allocation17 + $0xda0] sm:$0xff]  ;;  %v4717_v0 = vld [vmem:[#allocation17 + $0xdb0] sm:$0xff] }
0x1307   : > { %v7008_v4 = vpack.c.bf16 %v4717_v0, %v4715_v17  ;;  %v4754_v17 = vld [vmem:[#allocation17 + $0xed8] sm:$0xff] }
0x1308   : > { %6945 = vmatpush1.bf16.msra.mxu0 %v6944_v8  ;;  %v4688_v8 = vld [vmem:[#allocation17 + $0xcc8] sm:$0xff] }
0x1309   : > { %6947 = vmatprep.subr.bf16.mxu0 %v6946_v41  ;;  %v4690_v41 = vld [vmem:[#allocation17 + $0xcd8] sm:$0xff] }
0x130a   : > { %v6978_v16 = vpack.c.bf16 %v4690_v41, %v4688_v8  ;;  %v4719_v8 = vld [vmem:[#allocation17 + $0xdc0] sm:$0xff]  ;;  %v4721_v41 = vld [vmem:[#allocation17 + $0xdd0] sm:$0xff] }
0x130c   : > { %v8619_v29 = vpop.f32.mrb[34].mxu1  ;;  %6949 = vmatpush1.bf16.msra.mxu0 %v6948_v20  ;;  %v4692_v20 = vld [vmem:[#allocation17 + $0xce8] sm:$0xff] }
0x130d   : > { %v8622_v34 = vpop.f32.mrb[35].mxu1  ;;  %6951 = vmatprep.subr.bf16.mxu0 %v6950_v21  ;;  %v6980_v21 = vpack.c.bf16 %v4689_v18, %v4687_v39  ;;  %v6982_v31 = vpack.c.bf16 %v4694_v5, %v4692_v20  ;;  %v7012_v39 = vpack.c.bf16 %v4721_v41, %v4719_v8  ;;  %v3666_v18 = vrot.slane %v8599_v61, %v8382_v40  ;;  %v4723_v5 = vld [vmem:[#allocation17 + $0xde0] sm:$0xff]  ;;  %v4758_v8 = vld [vmem:[#allocation17 + $0xef8] sm:$0xff] }
0x130f   : > { %v4188_v28 = vadd.f32 %v8588_v56, %v3666_v18  ;;  %v4760_v18 = vld [vmem:[#allocation17 + $0xf08] sm:$0xff] }
0x1310   : > { %6953 = vmatpush1.bf16.msra.mxu0 %v6952_v32  ;;  %v6984_v32 = vpack.c.bf16 %v4693_v27, %v4691_v23  ;;  %v4728_v23 = vld [vmem:[#allocation17 + $0xe08] sm:$0xff]  ;;  %v4730_v27 = vld [vmem:[#allocation17 + $0xe18] sm:$0xff] }
0x1311   : > { %6955 = vmatprep.subr.bf16.mxu0 %v6954_v35  ;;  %v4695_v35 = vld [vmem:[#allocation17 + $0xd00] sm:$0xff] }
0x1312   : > { %v6988_v54 = vpack.c.bf16 %v4697_v12, %v4695_v35  ;;  %v4729_v35 = vld [vmem:[#allocation17 + $0xe10] sm:$0xff]  ;;  %v4732_v12 = vld [vmem:[#allocation17 + $0xe28] sm:$0xff] }
0x1313   : > { %5223 = vmatmul.mubr.f32.vlgmr.msra.gmra.mrb[20].mxu0 %v4273_v25  ;;  %v4701_v25 = vld [vmem:[#allocation17 + $0xd30] sm:$0xff] }
0x1314   : > { %6957 = vmatpush1.bf16.msra.mxu0 %v6956_v37  ;;  %5293 = vmatprep.mubr.f32.mxu0 %v4276_v30  ;;  %v4699_v37 = vld [vmem:[#allocation17 + $0xd20] sm:$0xff] }
0x1315   : > { %6959 = vmatprep.subr.bf16.mxu0 %v6958_v7  ;;  %v4704_v7 = vld [vmem:[#allocation17 + $0xd48] sm:$0xff]  ;;  %v6992_v42 = vpack.c.bf16 %v4701_v25, %v4699_v37 }
0x1316   : > { %v6994_v30 = vpack.c.bf16 %v4706_v38, %v4704_v7  ;;  %v4736_v25 = vld [vmem:[#allocation17 + $0xe48] sm:$0xff]  ;;  %v4738_v7 = vld [vmem:[#allocation17 + $0xe58] sm:$0xff] }
0x1317   : > { %v7026_v38 = vpack.c.bf16 %v4738_v7, %v4736_v25  ;;  %v4771_v7 = vld [vmem:[#allocation17 + $0xf60] sm:$0xff] }
0x1318   : > { %6961 = vmatpush1.bf16.msra.mxu0 %v6960_v43  ;;  %v4708_v43 = vld [vmem:[#allocation17 + $0xd68] sm:$0xff] }
0x1319   : > { %6963 = vmatprep.subr.bf16.mxu0 %v6962_v45  ;;  %v4710_v45 = vld [vmem:[#allocation17 + $0xd78] sm:$0xff] }
0x131a   : > { %v6998_v62 = vpack.c.bf16 %v4710_v45, %v4708_v43  ;;  %v4739_v45 = vld [vmem:[#allocation17 + $0xe60] sm:$0xff] }
0x131c   : > { %6965 = vmatpush1.bf16.msra.mxu0 %v6964_v50  ;;  %v4712_v50 = vld [vmem:[#allocation17 + $0xd88] sm:$0xff] }
0x131d   : > { %6967 = vmatprep.subr.bf16.mxu0 %v6966_v51  ;;  %v4714_v51 = vld [vmem:[#allocation17 + $0xd98] sm:$0xff] }
0x131e   : > { %v7002_v11 = vpack.c.bf16 %v4714_v51, %v4712_v50  ;;  %v4743_v51 = vld [vmem:[#allocation17 + $0xe80] sm:$0xff] }
0x1320   : > { %6969 = vmatpush1.bf16.msra.mxu0 %v6968_v57  ;;  %v4716_v57 = vld [vmem:[#allocation17 + $0xda8] sm:$0xff] }
0x1321   : > { %6971 = vmatprep.subr.bf16.mxu0 %v6970_v59  ;;  %v4718_v59 = vld [vmem:[#allocation17 + $0xdb8] sm:$0xff] }
0x1322   : > { %v7006_v63 = vpack.c.bf16 %v4718_v59, %v4716_v57  ;;  %v4747_v59 = vld [vmem:[#allocation17 + $0xea0] sm:$0xff] }
0x1324   : > { %6973 = vmatpush1.bf16.msra.mxu0 %v6972_v2  ;;  %v4720_v2 = vld [vmem:[#allocation17 + $0xdc8] sm:$0xff] }
0x1325   : > { %6975 = vmatprep.subr.bf16.mxu0 %v6974_v3  ;;  %v4722_v3 = vld [vmem:[#allocation17 + $0xdd8] sm:$0xff] }
0x1326   : > { %v7010_v6 = vpack.c.bf16 %v4722_v3, %v4720_v2  ;;  %v4751_v3 = vld [vmem:[#allocation17 + $0xec0] sm:$0xff] }
0x1328   : > { %6977 = vmatpush1.bf16.msra.mxu0 %v6976_v14  ;;  %v4724_v14 = vld [vmem:[#allocation17 + $0xde8] sm:$0xff] }
0x1329   : > { %6979 = vmatprep.subr.bf16.mxu0 %v6978_v16  ;;  %v4726_v16 = vld [vmem:[#allocation17 + $0xdf8] sm:$0xff] }
0x132a   : > { %v7014_v20 = vpack.c.bf16 %v4726_v16, %v4724_v14  ;;  %v4755_v16 = vld [vmem:[#allocation17 + $0xee0] sm:$0xff] }
0x132c   : > { %6981 = vmatpush1.bf16.msra.mxu0 %v6980_v21  ;;  %v4725_v21 = vld [vmem:[#allocation17 + $0xdf0] sm:$0xff] }
0x132d   : > { %6983 = vmatprep.subr.bf16.mxu0 %v6982_v31  ;;  %v3678_v31 = vrot.slane %v8599_v61, %v3645_v58  ;;  %v7016_v55 = vpack.c.bf16 %v4725_v21, %v4723_v5  ;;  %v4731_v58 = vld [vmem:[#allocation17 + $0xe20] sm:$0xff]  ;;  %v4733_v61 = vld [vmem:[#allocation17 + $0xe30] sm:$0xff] }
0x132e   : > { %v7024_v56 = vpack.c.bf16 %v4733_v61, %v4731_v58  ;;  %v4772_v58 = vld [vmem:[#allocation17 + $0xf68] sm:$0xff]  ;;  %v4774_v61 = vld [vmem:[#allocation17 + $0xf78] sm:$0xff] }
0x132f   : > { %v4261_v40 = vadd.f32 %v8622_v34, %v3678_v31  ;;  %v4737_v34 = vld [vmem:[#allocation17 + $0xe50] sm:$0xff]  ;;  %v4759_v31 = vld [vmem:[#allocation17 + $0xf00] sm:$0xff]  ;;  %v7062_v25 = vpack.c.bf16 %v4774_v61, %v4772_v58 }
0x1330   : > { %6985 = vmatpush1.bf16.msra.mxu0 %v6984_v32  ;;  %v7018_v32 = vpack.c.bf16 %v4730_v27, %v4728_v23  ;;  %v4761_v23 = vld [vmem:[#allocation17 + $0xf10] sm:$0xff]  ;;  %v4764_v27 = vld [vmem:[#allocation17 + $0xf28] sm:$0xff] }
0x1331   : > { %6987 = vmatprep.subr.bf16.mxu0 %v6986_v33  ;;  %v4727_v33 = vld [vmem:[#allocation17 + $0xe00] sm:$0xff]  ;;  %v4278_v37 = vmax.f32 %v4261_v40, 0.0  ;;  %v4768_v40 = vld [vmem:[#allocation17 + $0xf48] sm:$0xff] }
0x1332   : > { %v7020_v24 = vpack.c.bf16 %v4729_v35, %v4727_v33  ;;  %v4763_v33 = vld [vmem:[#allocation17 + $0xf20] sm:$0xff]  ;;  %v4765_v35 = vld [vmem:[#allocation17 + $0xf30] sm:$0xff] }
0x1334   : > { %6989 = vmatpush1.bf16.msra.mxu0 %v6988_v54  ;;  %v4275_v54 = vmax.f32 %v4188_v28, 0.0  ;;  %v7052_v28 = vpack.c.bf16 %v4761_v23, %v4759_v31 }
0x1335   : > { %6991 = vmatprep.subr.bf16.mxu0 %v6990_v15  ;;  %v7022_v15 = vpack.c.bf16 %v4734_v36, %v4732_v12  ;;  %v4770_v12 = vld [vmem:[#allocation17 + $0xf58] sm:$0xff]  ;;  %v7056_v36 = vpack.c.bf16 %v4765_v35, %v4763_v33 }
0x1338   : > { %6993 = vmatpush1.bf16.msra.mxu0 %v6992_v42  ;;  %v4735_v42 = vld [vmem:[#allocation17 + $0xe40] sm:$0xff] }
0x1339   : > { %6995 = vmatprep.subr.bf16.mxu0 %v6994_v30  ;;  %v4740_v30 = vld [vmem:[#allocation17 + $0xe68] sm:$0xff]  ;;  %v7028_v26 = vpack.c.bf16 %v4737_v34, %v4735_v42  ;;  %v4778_v42 = vld [vmem:[#allocation17 + $0xf98] sm:$0xff] }
0x133a   : > { %v7030_v43 = vpack.c.bf16 %v4742_v22, %v4740_v30  ;;  %v4775_v22 = vld [vmem:[#allocation17 + $0xf80] sm:$0xff] }
0x133c   : > { %6997 = vmatpush1.bf16.msra.mxu0 %v6996_v46  ;;  %v4741_v46 = vld [vmem:[#allocation17 + $0xe70] sm:$0xff] }
0x133d   : > { %6999 = vmatprep.subr.bf16.mxu0 %v6998_v62  ;;  %v4744_v62 = vld [vmem:[#allocation17 + $0xe88] sm:$0xff]  ;;  %v7032_v49 = vpack.c.bf16 %v4741_v46, %v4739_v45  ;;  %v4782_v45 = vld [vmem:[#allocation17 + $0xfb8] sm:$0xff] }
0x133e   : > { %v7034_v50 = vpack.c.bf16 %v4746_v44, %v4744_v62  ;;  %v4779_v44 = vld [vmem:[#allocation17 + $0xfa0] sm:$0xff] }
0x1340   : > { %7001 = vmatpush1.bf16.msra.mxu0 %v7000_v19  ;;  %v4745_v19 = vld [vmem:[#allocation17 + $0xe90] sm:$0xff] }
0x1341   : > { %7003 = vmatprep.subr.bf16.mxu0 %v7002_v11  ;;  %v4748_v11 = vld [vmem:[#allocation17 + $0xea8] sm:$0xff]  ;;  %v7036_v53 = vpack.c.bf16 %v4745_v19, %v4743_v51  ;;  %v4786_v51 = vld [vmem:[#allocation17 + $0xfd8] sm:$0xff] }
0x1342   : > { %v7038_v57 = vpack.c.bf16 %v4750_v1, %v4748_v11  ;;  %v4783_v1 = vld [vmem:[#allocation17 + $0xfc0] sm:$0xff] }
0x1344   : > { %7005 = vmatpush1.bf16.msra.mxu0 %v7004_v60  ;;  %v4749_v60 = vld [vmem:[#allocation17 + $0xeb0] sm:$0xff] }
0x1345   : > { %7007 = vmatprep.subr.bf16.mxu0 %v7006_v63  ;;  %v4752_v63 = vld [vmem:[#allocation17 + $0xec8] sm:$0xff]  ;;  %v7040_v0 = vpack.c.bf16 %v4749_v60, %v4747_v59  ;;  %v4790_v59 = vld [vmem:[#allocation17 + $0xff8] sm:$0xff] }
0x1346   : > { %v7042_v2 = vpack.c.bf16 %v4754_v17, %v4752_v63  ;;  %v7329_v63 = vld [vmem:[#allocation16 + $0x8] sm:$0xff] }
0x1347   : > { %v3674_v17 = vrot.slane %v7329_v63, %v3641_v52 }
0x1348   : > { %7009 = vmatpush1.bf16.msra.mxu0 %v7008_v4  ;;  %v4753_v4 = vld [vmem:[#allocation17 + $0xed0] sm:$0xff] }
0x1349   : > { %7011 = vmatprep.subr.bf16.mxu0 %v7010_v6  ;;  %v4756_v6 = vld [vmem:[#allocation17 + $0xee8] sm:$0xff]  ;;  %v7044_v41 = vpack.c.bf16 %v4753_v4, %v4751_v3  ;;  %v4789_v3 = vld [vmem:[#allocation17 + $0xff0] sm:$0xff] }
0x134a   : > { %v7046_v14 = vpack.c.bf16 %v4758_v8, %v4756_v6  ;;  %v4259_v6 = vadd.f32 %v8619_v29, %v3674_v17 }
0x134c   : > { %7013 = vmatpush1.bf16.msra.mxu0 %v7012_v39  ;;  %v4757_v39 = vld [vmem:[#allocation17 + $0xef0] sm:$0xff]  ;;  %v4277_v8 = vmax.f32 %v4259_v6, 0.0 }
0x134d   : > { %7015 = vmatprep.subr.bf16.mxu0 %v7014_v20  ;;  %v4762_v20 = vld [vmem:[#allocation17 + $0xf18] sm:$0xff]  ;;  %v7048_v5 = vpack.c.bf16 %v4757_v39, %v4755_v16 }
0x134e   : > { %v7050_v21 = vpack.c.bf16 %v4762_v20, %v4760_v18 }
0x1350   : > { %7017 = vmatpush1.bf16.msra.mxu0 %v7016_v55  ;;  %v4766_v55 = vld [vmem:[#allocation17 + $0xf38] sm:$0xff] }
0x1351   : > { %7019 = vmatprep.subr.bf16.mxu0 %v7018_v32  ;;  %v7054_v32 = vpack.c.bf16 %v4766_v55, %v4764_v27 }
0x1353   : > { %5294 = vmatmul.mubr.f32.vlgmr.msra.gmra.mrb[20].mxu0 %v4275_v54  ;;  %v4767_v54 = vld [vmem:[#allocation17 + $0xf40] sm:$0xff] }
0x1354   : > { %7021 = vmatpush1.bf16.msra.mxu0 %v7020_v24  ;;  %5364 = vmatprep.mubr.f32.mxu0 %v4278_v37  ;;  %v7058_v24 = vpack.c.bf16 %v4770_v12, %v4768_v40  ;;  %v5389_v12 = vld [vmem:[#allocation20] sm:$0x3] }
0x1355   : > { %7023 = vmatprep.subr.bf16.mxu0 %v7022_v15  ;;  %v4769_v15 = vld [vmem:[#allocation17 + $0xf50] sm:$0xff] }
0x1356   : > { %v7060_v37 = vpack.c.bf16 %v4769_v15, %v4767_v54 }
0x1358   : > { %7025 = vmatpush1.bf16.msra.mxu0 %v7024_v56  ;;  %v4773_v56 = vld [vmem:[#allocation17 + $0xf70] sm:$0xff] }
0x1359   : > { %7027 = vmatprep.subr.bf16.mxu0 %v7026_v38  ;;  %v4776_v38 = vld [vmem:[#allocation17 + $0xf88] sm:$0xff]  ;;  %v7064_v34 = vpack.c.bf16 %v4773_v56, %v4771_v7 }
0x135a   : > { %v7066_v30 = vpack.c.bf16 %v4778_v42, %v4776_v38 }
0x135c   : > { %7029 = vmatpush1.bf16.msra.mxu0 %v7028_v26  ;;  %v4777_v26 = vld [vmem:[#allocation17 + $0xf90] sm:$0xff] }
0x135d   : > { %7031 = vmatprep.subr.bf16.mxu0 %v7030_v43  ;;  %v4780_v43 = vld [vmem:[#allocation17 + $0xfa8] sm:$0xff]  ;;  %v7068_v46 = vpack.c.bf16 %v4777_v26, %v4775_v22 }
0x135e   : > { %v7070_v62 = vpack.c.bf16 %v4782_v45, %v4780_v43 }
0x1360   : > { %7033 = vmatpush1.bf16.msra.mxu0 %v7032_v49  ;;  %v4781_v49 = vld [vmem:[#allocation17 + $0xfb0] sm:$0xff] }
0x1361   : > { %7035 = vmatprep.subr.bf16.mxu0 %v7034_v50  ;;  %v4784_v50 = vld [vmem:[#allocation17 + $0xfc8] sm:$0xff]  ;;  %v7072_v19 = vpack.c.bf16 %v4781_v49, %v4779_v44 }
0x1362   : > { %v7074_v11 = vpack.c.bf16 %v4786_v51, %v4784_v50 }
0x1364   : > { %7037 = vmatpush1.bf16.msra.mxu0 %v7036_v53  ;;  %v4785_v53 = vld [vmem:[#allocation17 + $0xfd0] sm:$0xff] }
0x1365   : > { %7039 = vmatprep.subr.bf16.mxu0 %v7038_v57  ;;  %v4788_v57 = vld [vmem:[#allocation17 + $0xfe8] sm:$0xff]  ;;  %v7076_v60 = vpack.c.bf16 %v4785_v53, %v4783_v1 }
0x1368   : > { %7041 = vmatpush1.bf16.msra.mxu0 %v7040_v0  ;;  %v7078_v0 = vpack.c.bf16 %v4790_v59, %v4788_v57 }
0x1369   : > { %7043 = vmatprep.subr.bf16.mxu0 %v7042_v2  ;;  %v4787_v2 = vld [vmem:[#allocation17 + $0xfe0] sm:$0xff] }
0x136a   : > { %v7080_v4 = vpack.c.bf16 %v4789_v3, %v4787_v2 }
0x136c   : > { %7045 = vmatpush1.bf16.msra.mxu0 %v7044_v41  ;;  %v4791_v41 = vld [vmem:[#allocation19] sm:$0x3] }
0x136d   : > { %7047 = vmatprep.subr.bf16.mxu0 %v7046_v14  ;;  %v4796_v14 = vrot.slane %v4791_v41, %v8326_v10  ;;  %v4800_v16 = vrot.slane %v4791_v41, %v8336_v13 }
0x1370   : > { %7049 = vmatpush1.bf16.msra.mxu0 %v7048_v5 }
0x1371   : > { %7051 = vmatprep.subr.bf16.mxu0 %v7050_v21 }
0x1374   : > { %7053 = vmatpush1.bf16.msra.mxu0 %v7052_v28 }
0x1375   : > { %7055 = vmatprep.subr.bf16.mxu0 %v7054_v32 }
0x1378   : > { %7057 = vmatpush1.bf16.msra.mxu0 %v7056_v36  ;;  %v5398_v36 = vrot.slane %v5389_v12, %v8336_v13 }
0x1379   : > { %7059 = vmatprep.subr.bf16.mxu0 %v7058_v24 }
0x137c   : > { %7061 = vmatpush1.bf16.msra.mxu0 %v7060_v37 }
0x137d   : > { %7063 = vmatprep.subr.bf16.mxu0 %v7062_v25 }
0x1380   : > { %7065 = vmatpush1.bf16.msra.mxu0 %v7064_v34 }
0x1381   : > { %7067 = vmatprep.subr.bf16.mxu0 %v7066_v30 }
0x1384   : > { %7069 = vmatpush1.bf16.msra.mxu0 %v7068_v46 }
0x1385   : > { %7071 = vmatprep.subr.bf16.mxu0 %v7070_v62 }
0x1388   : > { %7073 = vmatpush1.bf16.msra.mxu0 %v7072_v19 }
0x1389   : > { %7075 = vmatprep.subr.bf16.mxu0 %v7074_v11 }
0x138c   : > { %7077 = vmatpush1.bf16.msra.mxu0 %v7076_v60 }
0x138d   : > { %7079 = vmatprep.subr.bf16.mxu0 %v7078_v0 }
0x1390   : > { %7081 = vmatpush1.bf16.msra.mxu0 %v7080_v4 }
0x1393   : > { %5365 = vmatmul.mubr.f32.vlgmr.msra.gmra.mrb[20].mxu0 %v4277_v8 }
0x1466   : > { %v5366_v39 = vpop.f32.mrb[20].mxu0 }
0x1467   : > { %v7082_v9 = vadd.f32 %v5366_v39, %v4796_v14  ;;  %v5368_v52 = vpop.f32.mrb[21].mxu0 }
0x1468   : > { %v7083_v18 = vadd.f32 %v5368_v52, %v4800_v16 }
0x1469   : > { %v5371_v20 = vadd.f32 %v7082_v9, %v8555_v47  ;;  %v5403_v47 = vld [vmem:[#allocation22] sm:$0x3] }
0x146a   : > { %v5372_v5 = vadd.f32 %v7083_v18, %v8557_v48  ;;  %v5394_v48 = vrot.slane %v5389_v12, %v8326_v10  ;;  %v5408_v58 = vrot.slane %v5403_v47, %v8326_v10  ;;  %v5412_v61 = vrot.slane %v5403_v47, %v8336_v13 }
0x146c   : > { %v5373_v21 = vadd.f32 %v5372_v5, %v5371_v20 }
0x146e   : > { %5374 = vadd.xlane.f32.xlu1 %v5373_v21 }
0x14fb   : > { %v5375_v29 = vpop.xlane.xlu1 %5374 }
0x14fc   : > { %v5376_v31 = vmul.f32 0.00390625, %v5375_v29 }
0x14fe   : > { %v5377_v23 = vsub.f32 %v5371_v20, %v5376_v31  ;;  %v5378_v27 = vsub.f32 %v5372_v5, %v5376_v31 }
0x1500   : > { %v5379_v55 = vmul.f32 %v5377_v23, %v5377_v23  ;;  %v5380_v28 = vmul.f32 %v5378_v27, %v5378_v27 }
0x1502   : > { %v5381_v32 = vadd.f32 %v5380_v28, %v5379_v55 }
0x1504   : > { %5382 = vadd.xlane.f32.xlu1 %v5381_v32 }
0x1591   : > { %v5383_v33 = vpop.xlane.xlu1 %5382 }
0x1592   : > { %v5384_v35 = vmul.f32 0.00390625, %v5383_v33 }
0x1594   : > { %v5385_v40 = vadd.f32 1e-05, %v5384_v35 }
0x1596   : > { %7324 = vrsqrt.f32 %v5385_v40 }
0x15a0   : > { %v7325_v24 = vpop.eup %7324 }
0x15a1   : > { %v5387_v54 = vmul.f32 %v7325_v24, %v5377_v23  ;;  %v5388_v15 = vmul.f32 %v7325_v24, %v5378_v27 }
0x15a3   : > { %v5401_v37 = vmul.f32 %v5394_v48, %v5387_v54  ;;  %v5402_v25 = vmul.f32 %v5398_v36, %v5388_v15 }
0x15a5   : > { %v5415_v7 = vadd.f32 %v5408_v58, %v5401_v37  ;;  %v5416_v56 = vadd.f32 %v5412_v61, %v5402_v25 }
0x15a7   : > { %5417 = vst [vmem:[%s614_s17] sm:$0xff] %v5415_v7  ;;  %5418 = vst [vmem:[%s614_s17 + $0x8] sm:$0xff] %v5416_v56 }
0x15a8   : > { %7709 = shalt.err (!%p7706_p2)
}
0x15a9   : > { %s7710_s20 = scalar_lea.hbm %s8649_s24, 256  ;;  %s7714_s22 = scalar_lea.hbm %s8759_s13, 512 }
0x15aa   : > { %p7711_p6 = scmp.ne.s32.totalorder %s8649_s24, %s7710_s20  ;;  %p7715_p11 = scmp.lt.u32.totalorder %s8649_s24, %s8759_s13 }
0x15ab   : > { %p7716_p3 = scmp.lt.u32.totalorder %s7714_s22, %s7710_s20  ;;  %p7718_p13 = scmp.lt.u32.totalorder %s7710_s20, %s8649_s24 }
0x15ac   : > { %p7712_p5 = pnand %p7711_p6, %p8760_p1 }
0x15ad   : > { %p7717_p12 = por %p7716_p3, %p7715_p11 }
0x15ae   : > { %p7713_p10 = pneg %p7712_p5 }
0x15af   : > { %p7719_p7 = por %p7718_p13, %p7717_p12 }
0x15b1   : > { %p7720_p9 = pnand %p7719_p7, %p7713_p10 }
0x15b3   : > { %7723 = shalt.err (!%p7720_p9)
}
0x15b4   : > { %7162 = dma.vmem_to_hbm [thread:$0]  (%p8760_p1), %s8651_s30, 256, %s8649_s24, %s5420_s1  }
0x15b5 PF: > { %s8761_s3 = sld [smem:[#allocation32_spill]]  ;;  %p8762_p4 = scmp.ne.s32.totalorder %s8740_s21, 0 }
0x15b6   : > { %p8763_p8 = scmp.ge.s32.totalorder %s7786_s28, 2 }
0x15b8   : > { %p7206_p0 = pnand %p8763_p8, %p8762_p4 }
0x15bb   : > { %s5446_s23 = sand.u32 1, %s8761_s3  }
0x15bc   : > { %s5447_s0 = scalar_lea.sflag [#allocation4], %s5446_s23 }
0x15bd   : > { %7769 = dma.done.wait (!%p7206_p0), %s5447_s0, 256  }
0x15be   : > { %7771 = vsyncadd (!%p7206_p0), %s5447_s0, 4294967040  ;;  %p32_p2 = scmp.ge.s32.totalorder %s8197_s15, 4   ;;  %s8764_s25 = smov %s7778_s26 }
0x15bf   : > { %s8765_s26 = smov %s7782_s27  ;;  %s8766_s27 = smov %s8208_s19 }
0x15c0   : > { %s8767_s28 = smov %s8197_s15  ;;  %34 = sbr.rel (!%p32_p2) target bundleno = 17 (0x11), region = 165 }
0x15c7   :  { %5452 = vsyncpa [#allocation3], 1 }
0x15c8   :  { %5454 = vsyncpa [#allocation3 + $0x1], 1 }
0x15c9   :  { %5455 = vsyncpa [#allocation6], 1 }
0x15ca   :  { %5456 = vsyncpa [#allocation9], 1 }
0x15cb   :  { %5457 = vsyncpa [#allocation12], 1 }
0x15cc   :  { %5458 = vsyncpa [#allocation15], 1 }
0x15cd   :  { %5459 = vsyncpa [#allocation18], 1 }
0x15ce   :  { %5460 = vsyncpa [#allocation21], 1 }
0x15cf   :  { %5461 = vsyncpa [#allocation4], 1 }
0x15d0   :  { %5463 = vsyncpa [#allocation4 + $0x1], 1 }

</bundles_post_ra>
